<compile_context>
chip_gen: v7x
topology: tpu7x:2x2x1
jax: 0.10.0
libtpu: 0.0.40
codegen_flags: <defaults>
</compile_context>

<pallas_src>
import functools

import jax
import jax.numpy as jnp
import numpy as np
from jax.experimental import pallas as pl
from jax.experimental.pallas import tpu as pltpu

COMPUTE_DTYPE = jnp.float32
_NEG_SLOPE = 0.1


def _leaky_relu(v):
    return jnp.where(v > 0, v, _NEG_SLOPE * v)


# ----------------------------------------------------------------------------
# Host-side constant builders (exact, depend only on static shapes)
# ----------------------------------------------------------------------------
def _interp_matrix(n):
    """(2n, n) bilinear x2 interpolation matrix, torch align_corners=False."""
    m = np.zeros((2 * n, n), np.float32)
    o = np.arange(2 * n)
    src = np.maximum((o + 0.5) / 2.0 - 0.5, 0.0)
    i0 = np.minimum(np.floor(src).astype(np.int64), n - 1)
    frac = (src - np.floor(src)).astype(np.float32)
    i1 = np.minimum(i0 + 1, n - 1)
    m[o, i0] += (1.0 - frac)
    m[o, i1] += frac
    return m


def _col_masks(w, s):
    """(2, s) 0/1 masks killing column wrap-around for dx=-1 (row 0) / dx=+1."""
    col = np.arange(s) % w
    return np.stack([(col >= 1), (col <= w - 2)], 0).astype(np.float32)


# ----------------------------------------------------------------------------
# Fused kernel: conv1 + lrelu + bilinear x2 + concat-conv2 + lrelu
# ----------------------------------------------------------------------------
def _make_kernel(W, Wu, PAD1, PADU):
    TAPS = [(dy, dx) for dy in (-1, 0, 1) for dx in (-1, 0, 1)]

    def kernel(x_ref, s_ref, w1_ref, w2u_ref, w2s_ref, b1_ref, b2_ref,
               m1_ref, m2_ref, upm_ref, o_ref, xbuf, ubuf, sbuf):
        # x_ref : (Cin, S)      input, flattened spatial on lanes (S = H*W)
        # s_ref : (Cs, Su)      skip connection, Su = (2H)*(2W)
        # w1_ref: (9, Cout, Cin)   conv1 taps  (t = ky*3+kx)
        # w2u_ref/(9,Cout,Cout), w2s_ref/(9,Cout,Cs): conv2 taps split by input
        # b1_ref/b2_ref: (Cout, 1) biases (f32)
        # m1_ref: (2, S)  column masks for W ;  m2_ref: (2, Su) for Wu
        # upm_ref: (S, Su) exact bilinear-x2 interpolation matrix
        # o_ref : (Cout, Su)
        # xbuf  : (Cin, S + 2*PAD1)  zero-margined slab
        # ubuf  : (Cout, Su + 2*PADU)
        # sbuf  : (Cs,  Su + 2*PADU)
        Cin, S = x_ref.shape
        Cs, Su = s_ref.shape
        Cout = b1_ref.shape[0]

        # ---- stage inputs into zero-margined slabs (zero ONLY the margins;
        #      interior written once, all stores lane-aligned & unmasked) -----
        xbuf[:, 0:PAD1] = jnp.zeros((Cin, PAD1), xbuf.dtype)
        xbuf[:, PAD1 + S:PAD1 + S + PAD1] = jnp.zeros((Cin, PAD1), xbuf.dtype)
        xbuf[:, PAD1:PAD1 + S] = x_ref[...]

        sbuf[:, 0:PADU] = jnp.zeros((Cs, PADU), sbuf.dtype)
        sbuf[:, PADU + Su:PADU + Su + PADU] = jnp.zeros((Cs, PADU), sbuf.dtype)
        sbuf[:, PADU:PADU + Su] = s_ref[...]

        # ---- conv1: 9 accumulating MXU matmuls, output (Cout, S) lane-dense -
        w1 = w1_ref[...]
        m1 = m1_ref[...]
        acc1 = jnp.zeros((Cout, S), jnp.float32)
        for t, (dy, dx) in enumerate(TAPS):
            sh = dy * W + dx
            xt = xbuf[:, PAD1 + sh:PAD1 + sh + S]       # shifted view (Cin, S)
            if dx == -1:
                xt = xt * m1[0:1, :]
            elif dx == 1:
                xt = xt * m1[1:2, :]
            acc1 = acc1 + jnp.dot(w1[t], xt, preferred_element_type=jnp.float32)
        y1 = _leaky_relu(acc1 + b1_ref[...])             # bias + lrelu in f32

        # ---- bilinear x2 upsample: one exact matmul (does the interleave) ---
        u = jnp.dot(y1.astype(upm_ref.dtype), upm_ref[...],
                    preferred_element_type=jnp.float32)  # (Cout, Su)
        ubuf[:, 0:PADU] = jnp.zeros((Cout, PADU), ubuf.dtype)
        ubuf[:, PADU + Su:PADU + Su + PADU] = jnp.zeros((Cout, PADU), ubuf.dtype)
        ubuf[:, PADU:PADU + Su] = u.astype(ubuf.dtype)

        # ---- fused concat + conv2: 18 accumulating MXU matmuls --------------
        w2u = w2u_ref[...]
        w2s = w2s_ref[...]
        m2 = m2_ref[...]
        acc2 = jnp.zeros((Cout, Su), jnp.float32)
        for t, (dy, dx) in enumerate(TAPS):
            sh = dy * Wu + dx
            ut = ubuf[:, PADU + sh:PADU + sh + Su]
            st = sbuf[:, PADU + sh:PADU + sh + Su]
            if dx == -1:
                ut = ut * m2[0:1, :]
                st = st * m2[0:1, :]
            elif dx == 1:
                ut = ut * m2[1:2, :]
                st = st * m2[1:2, :]
            acc2 = acc2 + jnp.dot(w2u[t], ut, preferred_element_type=jnp.float32)
            acc2 = acc2 + jnp.dot(w2s[t], st, preferred_element_type=jnp.float32)

        o_ref[...] = _leaky_relu(acc2 + b2_ref[...]).astype(o_ref.dtype)

    return kernel


# ----------------------------------------------------------------------------
# Forward wrapper (NCHW in / NCHW out, like the PyTorch module)
# ----------------------------------------------------------------------------
@jax.jit
def up_forward(x_nchw, skp_nchw, params):
    out_dtype = x_nchw.dtype
    B, Cin, H, W = x_nchw.shape
    _, Cs, Hu, Wu = skp_nchw.shape
    Cout = params["b1"].shape[-1]
    assert Hu == 2 * H and Wu == 2 * W and Cs == Cout
    S, Su = H * W, Hu * Wu
    PAD1 = max(128, -(-(W + 1) // 128) * 128)
    PADU = max(128, -(-(Wu + 1) // 128) * 128)
    CD = COMPUTE_DTYPE

    # Only free, contiguous reshapes (no activation transposes / layout passes)
    x2 = x_nchw.reshape(B, Cin, S).astype(CD)
    skp2 = skp_nchw.reshape(B, Cs, Su).astype(CD)

    # Weights as per-tap (Cout, Cin) matrices; conv2 split along input channels
    # so the channel concat never materializes.
    w1t = jnp.transpose(params["w1"], (0, 1, 3, 2)).reshape(9, Cout, Cin).astype(CD)
    w2 = params["w2"]
    w2ut = jnp.transpose(w2[:, :, :Cout, :], (0, 1, 3, 2)).reshape(9, Cout, Cout).astype(CD)
    w2st = jnp.transpose(w2[:, :, Cout:, :], (0, 1, 3, 2)).reshape(9, Cout, Cs).astype(CD)
    b1c = params["b1"].reshape(Cout, 1).astype(jnp.float32)
    b2c = params["b2"].reshape(Cout, 1).astype(jnp.float32)

    m1 = jnp.asarray(_col_masks(W, S), CD)
    m2 = jnp.asarray(_col_masks(Wu, Su), CD)
    upm = jnp.asarray(np.kron(_interp_matrix(H), _interp_matrix(W)).T, CD)  # (S, Su)

    kernel = _make_kernel(W, Wu, PAD1, PADU)

    out_flat = pl.pallas_call(
        kernel,
        out_shape=jax.ShapeDtypeStruct((B, Cout, Su), out_dtype),
        grid=(B,),
        in_specs=[
            pl.BlockSpec((None, Cin, S), lambda b: (b, 0, 0)),
            pl.BlockSpec((None, Cs, Su), lambda b: (b, 0, 0)),
            pl.BlockSpec((9, Cout, Cin), lambda b: (0, 0, 0)),
            pl.BlockSpec((9, Cout, Cout), lambda b: (0, 0, 0)),
            pl.BlockSpec((9, Cout, Cs), lambda b: (0, 0, 0)),
            pl.BlockSpec((Cout, 1), lambda b: (0, 0)),
            pl.BlockSpec((Cout, 1), lambda b: (0, 0)),
            pl.BlockSpec((2, S), lambda b: (0, 0)),
            pl.BlockSpec((2, Su), lambda b: (0, 0)),
            pl.BlockSpec((S, Su), lambda b: (0, 0)),
        ],
        out_specs=pl.BlockSpec((None, Cout, Su), lambda b: (b, 0, 0)),
        scratch_shapes=[
            pltpu.VMEM((Cin, S + 2 * PAD1), CD),
            pltpu.VMEM((Cout, Su + 2 * PADU), CD),
            pltpu.VMEM((Cs, Su + 2 * PADU), CD),
        ],
        compiler_params=pltpu.CompilerParams(
            dimension_semantics=("parallel",),
            vmem_limit_bytes=32 * 1024 * 1024,
        ),
    )(x2, skp2, w1t, w2ut, w2st, b1c, b2c, m1, m2, upm)

    return out_flat.reshape(B, Cout, Hu, Wu)   # free contiguous reshape (NCHW)


# ----------------------------------------------------------------------------
# Pure-JAX reference (NCHW, matches PyTorch semantics) for verification
# ----------------------------------------------------------------------------
def _lrelu_ref(x):
    return jnp.where(x > 0, x, 0.1 * x)


def _conv_ref(x_nchw, w_hwio, b):
    w = jnp.transpose(w_hwio, (3, 2, 0, 1))      # OIHW
    y = jax.lax.conv_general_dilated(
        x_nchw, w, (1, 1), ((1, 1), (1, 1)),
        dimension_numbers=("NCHW", "OIHW", "NCHW"))
    return y + b.reshape(1, -1, 1, 1)


def _up_idx(n):
    o = np.arange(2 * n)
    src = np.maximum((o + 0.5) / 2.0 - 0.5, 0.0)   # torch align_corners=False
    i0 = np.minimum(np.floor(src).astype(np.int32), n - 1)
    frac = (src - np.floor(src)).astype(np.float32)
    i1 = np.minimum(i0 + 1, n - 1)
    return i0, i1, frac


def _bilinear_ref_nchw(x):
    B, C, H, W = x.shape
    r0, r1, rf = _up_idx(H)
    c0, c1, cf = _up_idx(W)
    rf = jnp.asarray(rf)[None, None, :, None]
    cf = jnp.asarray(cf)[None, None, None, :]
    row = x[:, :, r0, :] * (1 - rf) + x[:, :, r1, :] * rf        # (B,C,2H,W)
    return row[:, :, :, c0] * (1 - cf) + row[:, :, :, c1] * cf   # (B,C,2H,2W)


def up_forward_ref(x, skp, params):
    h = _lrelu_ref(_conv_ref(x, params["w1"], params["b1"]))
    h = _bilinear_ref_nchw(h)
    h = jnp.concatenate([h, skp], axis=1)
    return _lrelu_ref(_conv_ref(h, params["w2"], params["b2"]))


# ----------------------------------------------------------------------------
if __name__ == "__main__":
    B, Cin, Cout, H, W = 2, 4, 4, 16, 16
    key = jax.random.PRNGKey(0)
    kx_, ks_, k1, k2, k3, k4 = jax.random.split(key, 6)

    x = jax.random.normal(kx_, (B, Cin, H, W), jnp.float32)
    skp = jax.random.normal(ks_, (B, Cout, 2 * H, 2 * W), jnp.float32)

    # deterministic synthetic parameters (HWIO conv weights, (1, Cout) bias)
    params = {
        "w1": jax.random.normal(k1, (3, 3, Cin, Cout), jnp.float32) * 0.2,
        "b1": jax.random.normal(k2, (1, Cout), jnp.float32) * 0.1,
        "w2": jax.random.normal(k3, (3, 3, 2 * Cout, Cout), jnp.float32) * 0.2,
        "b2": jax.random.normal(k4, (1, Cout), jnp.float32) * 0.1,
    }

    out = jax.block_until_ready(up_forward(x, skp, params))
    ref = jax.block_until_ready(up_forward_ref(x, skp, params))
    assert out.shape == (B, Cout, 2 * H, 2 * W)
    np.testing.assert_allclose(np.asarray(out), np.asarray(ref),
                               rtol=1e-4, atol=1e-4)
    print("KERNEL_OK")
</pallas_src>

<mosaic_0001>
module attributes {stable_mosaic.version = 11 : i64} {
  func.func @kernel(%arg0: i32, %arg1: memref<1x4x256xf32, #tpu.memory_space<vmem>>, %arg2: memref<1x4x1024xf32, #tpu.memory_space<vmem>>, %arg3: memref<9x4x4xf32, #tpu.memory_space<vmem>>, %arg4: memref<9x4x4xf32, #tpu.memory_space<vmem>>, %arg5: memref<9x4x4xf32, #tpu.memory_space<vmem>>, %arg6: memref<4x1xf32, #tpu.memory_space<vmem>>, %arg7: memref<4x1xf32, #tpu.memory_space<vmem>>, %arg8: memref<2x256xf32, #tpu.memory_space<vmem>>, %arg9: memref<2x1024xf32, #tpu.memory_space<vmem>>, %arg10: memref<256x1024xf32, #tpu.memory_space<vmem>>, %arg11: memref<1x4x1024xf32, #tpu.memory_space<vmem>>, %arg12: memref<4x512xf32, #tpu.memory_space<vmem>>, %arg13: memref<4x1280xf32, #tpu.memory_space<vmem>>, %arg14: memref<4x1280xf32, #tpu.memory_space<vmem>>) attributes {dimension_semantics = [#tpu.dimension_semantics<parallel>], iteration_bounds = array<i64: 2>, scalar_prefetch = 0 : i64, scratch_operands = 3 : i64, tpu.core_type = #tpu.core_type<tc>, window_params = [{transform_indices = @transform_0, window_bounds = array<i64: 1, 4, 256>}, {transform_indices = @transform_1, window_bounds = array<i64: 1, 4, 1024>}, {pipeline_mode = #tpu.pipeline_mode<synchronous>, transform_indices = @transform_2, window_bounds = array<i64: 9, 4, 4>}, {pipeline_mode = #tpu.pipeline_mode<synchronous>, transform_indices = @transform_3, window_bounds = array<i64: 9, 4, 4>}, {pipeline_mode = #tpu.pipeline_mode<synchronous>, transform_indices = @transform_4, window_bounds = array<i64: 9, 4, 4>}, {pipeline_mode = #tpu.pipeline_mode<synchronous>, transform_indices = @transform_5, window_bounds = array<i64: 4, 1>}, {pipeline_mode = #tpu.pipeline_mode<synchronous>, transform_indices = @transform_6, window_bounds = array<i64: 4, 1>}, {pipeline_mode = #tpu.pipeline_mode<synchronous>, transform_indices = @transform_7, window_bounds = array<i64: 2, 256>}, {pipeline_mode = #tpu.pipeline_mode<synchronous>, transform_indices = @transform_8, window_bounds = array<i64: 2, 1024>}, {pipeline_mode = #tpu.pipeline_mode<synchronous>, transform_indices = @transform_9, window_bounds = array<i64: 256, 1024>}, {transform_indices = @transform_10, window_bounds = array<i64: 1, 4, 1024>}]} {
    %cst = arith.constant 0.000000e+00 : f32
    %0 = vector.broadcast %cst : f32 to vector<4x128xf32>
    %c0 = arith.constant 0 : index
    %c0_0 = arith.constant 0 : index
    %1 = vector.load %arg12[%c0, %c0_0] : memref<4x512xf32, #tpu.memory_space<vmem>>, vector<4x128xf32>
    tpu.vector_store %arg12[%c0, %c0_0], %0 {strides = array<i32>} : memref<4x512xf32, #tpu.memory_space<vmem>>, vector<4x128xf32>,
    %cst_1 = arith.constant 0.000000e+00 : f32
    %2 = vector.broadcast %cst_1 : f32 to vector<4x128xf32>
    %c0_2 = arith.constant 0 : index
    %c384 = arith.constant 384 : index
    %3 = vector.load %arg12[%c0_2, %c384] : memref<4x512xf32, #tpu.memory_space<vmem>>, vector<4x128xf32>
    tpu.vector_store %arg12[%c0_2, %c384], %2 {strides = array<i32>} : memref<4x512xf32, #tpu.memory_space<vmem>>, vector<4x128xf32>,
    %c0_3 = arith.constant 0 : index
    %c0_4 = arith.constant 0 : index
    %c0_5 = arith.constant 0 : index
    %4 = vector.load %arg1[%c0_3, %c0_4, %c0_5] : memref<1x4x256xf32, #tpu.memory_space<vmem>>, vector<1x4x256xf32>
    %5 = vector.shape_cast %4 : vector<1x4x256xf32> to vector<4x256xf32>
    %c0_6 = arith.constant 0 : index
    %c128 = arith.constant 128 : index
    %6 = vector.load %arg12[%c0_6, %c128] : memref<4x512xf32, #tpu.memory_space<vmem>>, vector<4x256xf32>
    tpu.vector_store %arg12[%c0_6, %c128], %5 {strides = array<i32>} : memref<4x512xf32, #tpu.memory_space<vmem>>, vector<4x256xf32>,
    %cst_7 = arith.constant 0.000000e+00 : f32
    %7 = vector.broadcast %cst_7 : f32 to vector<4x128xf32>
    %c0_8 = arith.constant 0 : index
    %c0_9 = arith.constant 0 : index
    %8 = vector.load %arg14[%c0_8, %c0_9] : memref<4x1280xf32, #tpu.memory_space<vmem>>, vector<4x128xf32>
    tpu.vector_store %arg14[%c0_8, %c0_9], %7 {strides = array<i32>} : memref<4x1280xf32, #tpu.memory_space<vmem>>, vector<4x128xf32>,
    %cst_10 = arith.constant 0.000000e+00 : f32
    %9 = vector.broadcast %cst_10 : f32 to vector<4x128xf32>
    %c0_11 = arith.constant 0 : index
    %c1152 = arith.constant 1152 : index
    %10 = vector.load %arg14[%c0_11, %c1152] : memref<4x1280xf32, #tpu.memory_space<vmem>>, vector<4x128xf32>
    tpu.vector_store %arg14[%c0_11, %c1152], %9 {strides = array<i32>} : memref<4x1280xf32, #tpu.memory_space<vmem>>, vector<4x128xf32>,
    %c0_12 = arith.constant 0 : index
    %c0_13 = arith.constant 0 : index
    %c0_14 = arith.constant 0 : index
    %11 = vector.load %arg2[%c0_12, %c0_13, %c0_14] : memref<1x4x1024xf32, #tpu.memory_space<vmem>>, vector<1x4x1024xf32>
    %12 = vector.shape_cast %11 : vector<1x4x1024xf32> to vector<4x1024xf32>
    %c0_15 = arith.constant 0 : index
    %c128_16 = arith.constant 128 : index
    %13 = vector.load %arg14[%c0_15, %c128_16] : memref<4x1280xf32, #tpu.memory_space<vmem>>, vector<4x1024xf32>
    tpu.vector_store %arg14[%c0_15, %c128_16], %12 {strides = array<i32>} : memref<4x1280xf32, #tpu.memory_space<vmem>>, vector<4x1024xf32>,
    %c0_17 = arith.constant 0 : index
    %c0_18 = arith.constant 0 : index
    %c0_19 = arith.constant 0 : index
    %14 = vector.load %arg3[%c0_17, %c0_18, %c0_19] : memref<9x4x4xf32, #tpu.memory_space<vmem>>, vector<9x4x4xf32>
    %c0_20 = arith.constant 0 : index
    %c0_21 = arith.constant 0 : index
    %15 = vector.load %arg8[%c0_20, %c0_21] : memref<2x256xf32, #tpu.memory_space<vmem>>, vector<2x256xf32>
    %cst_22 = arith.constant 0.000000e+00 : f32
    %16 = vector.broadcast %cst_22 : f32 to vector<4x256xf32>
    %c0_23 = arith.constant 0 : index
    %c111 = arith.constant 111 : index
    %17 = vector.load %arg12[%c0_23, %c111] : memref<4x512xf32, #tpu.memory_space<vmem>>, vector<4x256xf32>
    %18 = vector.extract_strided_slice %15 {offsets = [0, 0], sizes = [1, 256], strides = [1, 1]} : vector<2x256xf32> to vector<1x256xf32>
    %19 = vector.broadcast %18 : vector<1x256xf32> to vector<4x256xf32>
    %20 = arith.mulf %17, %19 : vector<4x256xf32>
    %21 = vector.extract_strided_slice %14 {offsets = [0, 0, 0], sizes = [1, 4, 4], strides = [1, 1, 1]} : vector<9x4x4xf32> to vector<1x4x4xf32>
    %22 = vector.shape_cast %21 : vector<1x4x4xf32> to vector<4x4xf32>
    %cst_24 = arith.constant dense<0.000000e+00> : vector<4x256xf32>
    %23 = tpu.matmul %22, %20, %cst_24 {dimension_numbers = #tpu.dot_dimension_numbers<[1], [0], [0], [1], [0, 0, 1, 1], [], []>} : vector<4x4xf32>, vector<4x256xf32>, vector<4x256xf32> -> vector<4x256xf32>
    %24 = arith.addf %16, %23 : vector<4x256xf32>
    %c0_25 = arith.constant 0 : index
    %c112 = arith.constant 112 : index
    %25 = vector.load %arg12[%c0_25, %c112] : memref<4x512xf32, #tpu.memory_space<vmem>>, vector<4x256xf32>
    %26 = vector.extract_strided_slice %14 {offsets = [1, 0, 0], sizes = [1, 4, 4], strides = [1, 1, 1]} : vector<9x4x4xf32> to vector<1x4x4xf32>
    %27 = vector.shape_cast %26 : vector<1x4x4xf32> to vector<4x4xf32>
    %cst_26 = arith.constant dense<0.000000e+00> : vector<4x256xf32>
    %28 = tpu.matmul %27, %25, %cst_26 {dimension_numbers = #tpu.dot_dimension_numbers<[1], [0], [0], [1], [0, 0, 1, 1], [], []>} : vector<4x4xf32>, vector<4x256xf32>, vector<4x256xf32> -> vector<4x256xf32>
    %29 = arith.addf %24, %28 : vector<4x256xf32>
    %c0_27 = arith.constant 0 : index
    %c113 = arith.constant 113 : index
    %30 = vector.load %arg12[%c0_27, %c113] : memref<4x512xf32, #tpu.memory_space<vmem>>, vector<4x256xf32>
    %31 = vector.extract_strided_slice %15 {offsets = [1, 0], sizes = [1, 256], strides = [1, 1]} : vector<2x256xf32> to vector<1x256xf32>
    %32 = vector.broadcast %31 : vector<1x256xf32> to vector<4x256xf32>
    %33 = arith.mulf %30, %32 : vector<4x256xf32>
    %34 = vector.extract_strided_slice %14 {offsets = [2, 0, 0], sizes = [1, 4, 4], strides = [1, 1, 1]} : vector<9x4x4xf32> to vector<1x4x4xf32>
    %35 = vector.shape_cast %34 : vector<1x4x4xf32> to vector<4x4xf32>
    %cst_28 = arith.constant dense<0.000000e+00> : vector<4x256xf32>
    %36 = tpu.matmul %35, %33, %cst_28 {dimension_numbers = #tpu.dot_dimension_numbers<[1], [0], [0], [1], [0, 0, 1, 1], [], []>} : vector<4x4xf32>, vector<4x256xf32>, vector<4x256xf32> -> vector<4x256xf32>
    %37 = arith.addf %29, %36 : vector<4x256xf32>
    %c0_29 = arith.constant 0 : index
    %c127 = arith.constant 127 : index
    %38 = vector.load %arg12[%c0_29, %c127] : memref<4x512xf32, #tpu.memory_space<vmem>>, vector<4x256xf32>
    %39 = vector.extract_strided_slice %15 {offsets = [0, 0], sizes = [1, 256], strides = [1, 1]} : vector<2x256xf32> to vector<1x256xf32>
    %40 = vector.broadcast %39 : vector<1x256xf32> to vector<4x256xf32>
    %41 = arith.mulf %38, %40 : vector<4x256xf32>
    %42 = vector.extract_strided_slice %14 {offsets = [3, 0, 0], sizes = [1, 4, 4], strides = [1, 1, 1]} : vector<9x4x4xf32> to vector<1x4x4xf32>
    %43 = vector.shape_cast %42 : vector<1x4x4xf32> to vector<4x4xf32>
    %cst_30 = arith.constant dense<0.000000e+00> : vector<4x256xf32>
    %44 = tpu.matmul %43, %41, %cst_30 {dimension_numbers = #tpu.dot_dimension_numbers<[1], [0], [0], [1], [0, 0, 1, 1], [], []>} : vector<4x4xf32>, vector<4x256xf32>, vector<4x256xf32> -> vector<4x256xf32>
    %45 = arith.addf %37, %44 : vector<4x256xf32>
    %c0_31 = arith.constant 0 : index
    %c128_32 = arith.constant 128 : index
    %46 = vector.load %arg12[%c0_31, %c128_32] : memref<4x512xf32, #tpu.memory_space<vmem>>, vector<4x256xf32>
    %47 = vector.extract_strided_slice %14 {offsets = [4, 0, 0], sizes = [1, 4, 4], strides = [1, 1, 1]} : vector<9x4x4xf32> to vector<1x4x4xf32>
    %48 = vector.shape_cast %47 : vector<1x4x4xf32> to vector<4x4xf32>
    %cst_33 = arith.constant dense<0.000000e+00> : vector<4x256xf32>
    %49 = tpu.matmul %48, %46, %cst_33 {dimension_numbers = #tpu.dot_dimension_numbers<[1], [0], [0], [1], [0, 0, 1, 1], [], []>} : vector<4x4xf32>, vector<4x256xf32>, vector<4x256xf32> -> vector<4x256xf32>
    %50 = arith.addf %45, %49 : vector<4x256xf32>
    %c0_34 = arith.constant 0 : index
    %c129 = arith.constant 129 : index
    %51 = vector.load %arg12[%c0_34, %c129] : memref<4x512xf32, #tpu.memory_space<vmem>>, vector<4x256xf32>
    %52 = vector.extract_strided_slice %15 {offsets = [1, 0], sizes = [1, 256], strides = [1, 1]} : vector<2x256xf32> to vector<1x256xf32>
    %53 = vector.broadcast %52 : vector<1x256xf32> to vector<4x256xf32>
    %54 = arith.mulf %51, %53 : vector<4x256xf32>
    %55 = vector.extract_strided_slice %14 {offsets = [5, 0, 0], sizes = [1, 4, 4], strides = [1, 1, 1]} : vector<9x4x4xf32> to vector<1x4x4xf32>
    %56 = vector.shape_cast %55 : vector<1x4x4xf32> to vector<4x4xf32>
    %cst_35 = arith.constant dense<0.000000e+00> : vector<4x256xf32>
    %57 = tpu.matmul %56, %54, %cst_35 {dimension_numbers = #tpu.dot_dimension_numbers<[1], [0], [0], [1], [0, 0, 1, 1], [], []>} : vector<4x4xf32>, vector<4x256xf32>, vector<4x256xf32> -> vector<4x256xf32>
    %58 = arith.addf %50, %57 : vector<4x256xf32>
    %c0_36 = arith.constant 0 : index
    %c143 = arith.constant 143 : index
    %59 = vector.load %arg12[%c0_36, %c143] : memref<4x512xf32, #tpu.memory_space<vmem>>, vector<4x256xf32>
    %60 = vector.extract_strided_slice %15 {offsets = [0, 0], sizes = [1, 256], strides = [1, 1]} : vector<2x256xf32> to vector<1x256xf32>
    %61 = vector.broadcast %60 : vector<1x256xf32> to vector<4x256xf32>
    %62 = arith.mulf %59, %61 : vector<4x256xf32>
    %63 = vector.extract_strided_slice %14 {offsets = [6, 0, 0], sizes = [1, 4, 4], strides = [1, 1, 1]} : vector<9x4x4xf32> to vector<1x4x4xf32>
    %64 = vector.shape_cast %63 : vector<1x4x4xf32> to vector<4x4xf32>
    %cst_37 = arith.constant dense<0.000000e+00> : vector<4x256xf32>
    %65 = tpu.matmul %64, %62, %cst_37 {dimension_numbers = #tpu.dot_dimension_numbers<[1], [0], [0], [1], [0, 0, 1, 1], [], []>} : vector<4x4xf32>, vector<4x256xf32>, vector<4x256xf32> -> vector<4x256xf32>
    %66 = arith.addf %58, %65 : vector<4x256xf32>
    %c0_38 = arith.constant 0 : index
    %c144 = arith.constant 144 : index
    %67 = vector.load %arg12[%c0_38, %c144] : memref<4x512xf32, #tpu.memory_space<vmem>>, vector<4x256xf32>
    %68 = vector.extract_strided_slice %14 {offsets = [7, 0, 0], sizes = [1, 4, 4], strides = [1, 1, 1]} : vector<9x4x4xf32> to vector<1x4x4xf32>
    %69 = vector.shape_cast %68 : vector<1x4x4xf32> to vector<4x4xf32>
    %cst_39 = arith.constant dense<0.000000e+00> : vector<4x256xf32>
    %70 = tpu.matmul %69, %67, %cst_39 {dimension_numbers = #tpu.dot_dimension_numbers<[1], [0], [0], [1], [0, 0, 1, 1], [], []>} : vector<4x4xf32>, vector<4x256xf32>, vector<4x256xf32> -> vector<4x256xf32>
    %71 = arith.addf %66, %70 : vector<4x256xf32>
    %c0_40 = arith.constant 0 : index
    %c145 = arith.constant 145 : index
    %72 = vector.load %arg12[%c0_40, %c145] : memref<4x512xf32, #tpu.memory_space<vmem>>, vector<4x256xf32>
    %73 = vector.extract_strided_slice %15 {offsets = [1, 0], sizes = [1, 256], strides = [1, 1]} : vector<2x256xf32> to vector<1x256xf32>
    %74 = vector.broadcast %73 : vector<1x256xf32> to vector<4x256xf32>
    %75 = arith.mulf %72, %74 : vector<4x256xf32>
    %76 = vector.extract_strided_slice %14 {offsets = [8, 0, 0], sizes = [1, 4, 4], strides = [1, 1, 1]} : vector<9x4x4xf32> to vector<1x4x4xf32>
    %77 = vector.shape_cast %76 : vector<1x4x4xf32> to vector<4x4xf32>
    %cst_41 = arith.constant dense<0.000000e+00> : vector<4x256xf32>
    %78 = tpu.matmul %77, %75, %cst_41 {dimension_numbers = #tpu.dot_dimension_numbers<[1], [0], [0], [1], [0, 0, 1, 1], [], []>} : vector<4x4xf32>, vector<4x256xf32>, vector<4x256xf32> -> vector<4x256xf32>
    %79 = arith.addf %71, %78 : vector<4x256xf32>
    %c0_42 = arith.constant 0 : index
    %c0_43 = arith.constant 0 : index
    %80 = vector.load %arg6[%c0_42, %c0_43] : memref<4x1xf32, #tpu.memory_space<vmem>>, vector<4x1xf32>
    %81 = vector.broadcast %80 : vector<4x1xf32> to vector<4x256xf32>
    %82 = arith.addf %79, %81 : vector<4x256xf32>
    %cst_44 = arith.constant 0.000000e+00 : f32
    %83 = vector.broadcast %cst_44 : f32 to vector<4x256xf32>
    %84 = arith.cmpf ogt, %82, %83 : vector<4x256xf32>
    %cst_45 = arith.constant 1.000000e-01 : f32
    %85 = vector.broadcast %cst_45 : f32 to vector<4x256xf32>
    %86 = arith.mulf %85, %82 : vector<4x256xf32>
    %87 = arith.select %84, %82, %86 : vector<4x256xi1>, vector<4x256xf32>
    %c0_46 = arith.constant 0 : index
    %c0_47 = arith.constant 0 : index
    %88 = vector.load %arg10[%c0_46, %c0_47] : memref<256x1024xf32, #tpu.memory_space<vmem>>, vector<256x1024xf32>
    %cst_48 = arith.constant dense<0.000000e+00> : vector<4x1024xf32>
    %89 = tpu.matmul %87, %88, %cst_48 {dimension_numbers = #tpu.dot_dimension_numbers<[1], [0], [0], [1], [0, 0, 1, 1], [], []>} : vector<4x256xf32>, vector<256x1024xf32>, vector<4x1024xf32> -> vector<4x1024xf32>
    %cst_49 = arith.constant 0.000000e+00 : f32
    %90 = vector.broadcast %cst_49 : f32 to vector<4x128xf32>
    %c0_50 = arith.constant 0 : index
    %c0_51 = arith.constant 0 : index
    %91 = vector.load %arg13[%c0_50, %c0_51] : memref<4x1280xf32, #tpu.memory_space<vmem>>, vector<4x128xf32>
    tpu.vector_store %arg13[%c0_50, %c0_51], %90 {strides = array<i32>} : memref<4x1280xf32, #tpu.memory_space<vmem>>, vector<4x128xf32>,
    %cst_52 = arith.constant 0.000000e+00 : f32
    %92 = vector.broadcast %cst_52 : f32 to vector<4x128xf32>
    %c0_53 = arith.constant 0 : index
    %c1152_54 = arith.constant 1152 : index
    %93 = vector.load %arg13[%c0_53, %c1152_54] : memref<4x1280xf32, #tpu.memory_space<vmem>>, vector<4x128xf32>
    tpu.vector_store %arg13[%c0_53, %c1152_54], %92 {strides = array<i32>} : memref<4x1280xf32, #tpu.memory_space<vmem>>, vector<4x128xf32>,
    %c0_55 = arith.constant 0 : index
    %c128_56 = arith.constant 128 : index
    %94 = vector.load %arg13[%c0_55, %c128_56] : memref<4x1280xf32, #tpu.memory_space<vmem>>, vector<4x1024xf32>
    tpu.vector_store %arg13[%c0_55, %c128_56], %89 {strides = array<i32>} : memref<4x1280xf32, #tpu.memory_space<vmem>>, vector<4x1024xf32>,
    %c0_57 = arith.constant 0 : index
    %c0_58 = arith.constant 0 : index
    %c0_59 = arith.constant 0 : index
    %95 = vector.load %arg4[%c0_57, %c0_58, %c0_59] : memref<9x4x4xf32, #tpu.memory_space<vmem>>, vector<9x4x4xf32>
    %c0_60 = arith.constant 0 : index
    %c0_61 = arith.constant 0 : index
    %c0_62 = arith.constant 0 : index
    %96 = vector.load %arg5[%c0_60, %c0_61, %c0_62] : memref<9x4x4xf32, #tpu.memory_space<vmem>>, vector<9x4x4xf32>
    %c0_63 = arith.constant 0 : index
    %c0_64 = arith.constant 0 : index
    %97 = vector.load %arg9[%c0_63, %c0_64] : memref<2x1024xf32, #tpu.memory_space<vmem>>, vector<2x1024xf32>
    %cst_65 = arith.constant 0.000000e+00 : f32
    %98 = vector.broadcast %cst_65 : f32 to vector<4x1024xf32>
    %c0_66 = arith.constant 0 : index
    %c95 = arith.constant 95 : index
    %99 = vector.load %arg13[%c0_66, %c95] : memref<4x1280xf32, #tpu.memory_space<vmem>>, vector<4x1024xf32>
    %c0_67 = arith.constant 0 : index
    %c95_68 = arith.constant 95 : index
    %100 = vector.load %arg14[%c0_67, %c95_68] : memref<4x1280xf32, #tpu.memory_space<vmem>>, vector<4x1024xf32>
    %101 = vector.extract_strided_slice %97 {offsets = [0, 0], sizes = [1, 1024], strides = [1, 1]} : vector<2x1024xf32> to vector<1x1024xf32>
    %102 = vector.broadcast %101 : vector<1x1024xf32> to vector<4x1024xf32>
    %103 = arith.mulf %99, %102 : vector<4x1024xf32>
    %104 = vector.extract_strided_slice %97 {offsets = [0, 0], sizes = [1, 1024], strides = [1, 1]} : vector<2x1024xf32> to vector<1x1024xf32>
    %105 = vector.broadcast %104 : vector<1x1024xf32> to vector<4x1024xf32>
    %106 = arith.mulf %100, %105 : vector<4x1024xf32>
    %107 = vector.extract_strided_slice %95 {offsets = [0, 0, 0], sizes = [1, 4, 4], strides = [1, 1, 1]} : vector<9x4x4xf32> to vector<1x4x4xf32>
    %108 = vector.shape_cast %107 : vector<1x4x4xf32> to vector<4x4xf32>
    %cst_69 = arith.constant dense<0.000000e+00> : vector<4x1024xf32>
    %109 = tpu.matmul %108, %103, %cst_69 {dimension_numbers = #tpu.dot_dimension_numbers<[1], [0], [0], [1], [0, 0, 1, 1], [], []>} : vector<4x4xf32>, vector<4x1024xf32>, vector<4x1024xf32> -> vector<4x1024xf32>
    %110 = arith.addf %98, %109 : vector<4x1024xf32>
    %111 = vector.extract_strided_slice %96 {offsets = [0, 0, 0], sizes = [1, 4, 4], strides = [1, 1, 1]} : vector<9x4x4xf32> to vector<1x4x4xf32>
    %112 = vector.shape_cast %111 : vector<1x4x4xf32> to vector<4x4xf32>
    %cst_70 = arith.constant dense<0.000000e+00> : vector<4x1024xf32>
    %113 = tpu.matmul %112, %106, %cst_70 {dimension_numbers = #tpu.dot_dimension_numbers<[1], [0], [0], [1], [0, 0, 1, 1], [], []>} : vector<4x4xf32>, vector<4x1024xf32>, vector<4x1024xf32> -> vector<4x1024xf32>
    %114 = arith.addf %110, %113 : vector<4x1024xf32>
    %c0_71 = arith.constant 0 : index
    %c96 = arith.constant 96 : index
    %115 = vector.load %arg13[%c0_71, %c96] : memref<4x1280xf32, #tpu.memory_space<vmem>>, vector<4x1024xf32>
    %c0_72 = arith.constant 0 : index
    %c96_73 = arith.constant 96 : index
    %116 = vector.load %arg14[%c0_72, %c96_73] : memref<4x1280xf32, #tpu.memory_space<vmem>>, vector<4x1024xf32>
    %117 = vector.extract_strided_slice %95 {offsets = [1, 0, 0], sizes = [1, 4, 4], strides = [1, 1, 1]} : vector<9x4x4xf32> to vector<1x4x4xf32>
    %118 = vector.shape_cast %117 : vector<1x4x4xf32> to vector<4x4xf32>
    %cst_74 = arith.constant dense<0.000000e+00> : vector<4x1024xf32>
    %119 = tpu.matmul %118, %115, %cst_74 {dimension_numbers = #tpu.dot_dimension_numbers<[1], [0], [0], [1], [0, 0, 1, 1], [], []>} : vector<4x4xf32>, vector<4x1024xf32>, vector<4x1024xf32> -> vector<4x1024xf32>
    %120 = arith.addf %114, %119 : vector<4x1024xf32>
    %121 = vector.extract_strided_slice %96 {offsets = [1, 0, 0], sizes = [1, 4, 4], strides = [1, 1, 1]} : vector<9x4x4xf32> to vector<1x4x4xf32>
    %122 = vector.shape_cast %121 : vector<1x4x4xf32> to vector<4x4xf32>
    %cst_75 = arith.constant dense<0.000000e+00> : vector<4x1024xf32>
    %123 = tpu.matmul %122, %116, %cst_75 {dimension_numbers = #tpu.dot_dimension_numbers<[1], [0], [0], [1], [0, 0, 1, 1], [], []>} : vector<4x4xf32>, vector<4x1024xf32>, vector<4x1024xf32> -> vector<4x1024xf32>
    %124 = arith.addf %120, %123 : vector<4x1024xf32>
    %c0_76 = arith.constant 0 : index
    %c97 = arith.constant 97 : index
    %125 = vector.load %arg13[%c0_76, %c97] : memref<4x1280xf32, #tpu.memory_space<vmem>>, vector<4x1024xf32>
    %c0_77 = arith.constant 0 : index
    %c97_78 = arith.constant 97 : index
    %126 = vector.load %arg14[%c0_77, %c97_78] : memref<4x1280xf32, #tpu.memory_space<vmem>>, vector<4x1024xf32>
    %127 = vector.extract_strided_slice %97 {offsets = [1, 0], sizes = [1, 1024], strides = [1, 1]} : vector<2x1024xf32> to vector<1x1024xf32>
    %128 = vector.broadcast %127 : vector<1x1024xf32> to vector<4x1024xf32>
    %129 = arith.mulf %125, %128 : vector<4x1024xf32>
    %130 = vector.extract_strided_slice %97 {offsets = [1, 0], sizes = [1, 1024], strides = [1, 1]} : vector<2x1024xf32> to vector<1x1024xf32>
    %131 = vector.broadcast %130 : vector<1x1024xf32> to vector<4x1024xf32>
    %132 = arith.mulf %126, %131 : vector<4x1024xf32>
    %133 = vector.extract_strided_slice %95 {offsets = [2, 0, 0], sizes = [1, 4, 4], strides = [1, 1, 1]} : vector<9x4x4xf32> to vector<1x4x4xf32>
    %134 = vector.shape_cast %133 : vector<1x4x4xf32> to vector<4x4xf32>
    %cst_79 = arith.constant dense<0.000000e+00> : vector<4x1024xf32>
    %135 = tpu.matmul %134, %129, %cst_79 {dimension_numbers = #tpu.dot_dimension_numbers<[1], [0], [0], [1], [0, 0, 1, 1], [], []>} : vector<4x4xf32>, vector<4x1024xf32>, vector<4x1024xf32> -> vector<4x1024xf32>
    %136 = arith.addf %124, %135 : vector<4x1024xf32>
    %137 = vector.extract_strided_slice %96 {offsets = [2, 0, 0], sizes = [1, 4, 4], strides = [1, 1, 1]} : vector<9x4x4xf32> to vector<1x4x4xf32>
    %138 = vector.shape_cast %137 : vector<1x4x4xf32> to vector<4x4xf32>
    %cst_80 = arith.constant dense<0.000000e+00> : vector<4x1024xf32>
    %139 = tpu.matmul %138, %132, %cst_80 {dimension_numbers = #tpu.dot_dimension_numbers<[1], [0], [0], [1], [0, 0, 1, 1], [], []>} : vector<4x4xf32>, vector<4x1024xf32>, vector<4x1024xf32> -> vector<4x1024xf32>
    %140 = arith.addf %136, %139 : vector<4x1024xf32>
    %c0_81 = arith.constant 0 : index
    %c127_82 = arith.constant 127 : index
    %141 = vector.load %arg13[%c0_81, %c127_82] : memref<4x1280xf32, #tpu.memory_space<vmem>>, vector<4x1024xf32>
    %c0_83 = arith.constant 0 : index
    %c127_84 = arith.constant 127 : index
    %142 = vector.load %arg14[%c0_83, %c127_84] : memref<4x1280xf32, #tpu.memory_space<vmem>>, vector<4x1024xf32>
    %143 = vector.extract_strided_slice %97 {offsets = [0, 0], sizes = [1, 1024], strides = [1, 1]} : vector<2x1024xf32> to vector<1x1024xf32>
    %144 = vector.broadcast %143 : vector<1x1024xf32> to vector<4x1024xf32>
    %145 = arith.mulf %141, %144 : vector<4x1024xf32>
    %146 = vector.extract_strided_slice %97 {offsets = [0, 0], sizes = [1, 1024], strides = [1, 1]} : vector<2x1024xf32> to vector<1x1024xf32>
    %147 = vector.broadcast %146 : vector<1x1024xf32> to vector<4x1024xf32>
    %148 = arith.mulf %142, %147 : vector<4x1024xf32>
    %149 = vector.extract_strided_slice %95 {offsets = [3, 0, 0], sizes = [1, 4, 4], strides = [1, 1, 1]} : vector<9x4x4xf32> to vector<1x4x4xf32>
    %150 = vector.shape_cast %149 : vector<1x4x4xf32> to vector<4x4xf32>
    %cst_85 = arith.constant dense<0.000000e+00> : vector<4x1024xf32>
    %151 = tpu.matmul %150, %145, %cst_85 {dimension_numbers = #tpu.dot_dimension_numbers<[1], [0], [0], [1], [0, 0, 1, 1], [], []>} : vector<4x4xf32>, vector<4x1024xf32>, vector<4x1024xf32> -> vector<4x1024xf32>
    %152 = arith.addf %140, %151 : vector<4x1024xf32>
    %153 = vector.extract_strided_slice %96 {offsets = [3, 0, 0], sizes = [1, 4, 4], strides = [1, 1, 1]} : vector<9x4x4xf32> to vector<1x4x4xf32>
    %154 = vector.shape_cast %153 : vector<1x4x4xf32> to vector<4x4xf32>
    %cst_86 = arith.constant dense<0.000000e+00> : vector<4x1024xf32>
    %155 = tpu.matmul %154, %148, %cst_86 {dimension_numbers = #tpu.dot_dimension_numbers<[1], [0], [0], [1], [0, 0, 1, 1], [], []>} : vector<4x4xf32>, vector<4x1024xf32>, vector<4x1024xf32> -> vector<4x1024xf32>
    %156 = arith.addf %152, %155 : vector<4x1024xf32>
    %c0_87 = arith.constant 0 : index
    %c128_88 = arith.constant 128 : index
    %157 = vector.load %arg13[%c0_87, %c128_88] : memref<4x1280xf32, #tpu.memory_space<vmem>>, vector<4x1024xf32>
    %c0_89 = arith.constant 0 : index
    %c128_90 = arith.constant 128 : index
    %158 = vector.load %arg14[%c0_89, %c128_90] : memref<4x1280xf32, #tpu.memory_space<vmem>>, vector<4x1024xf32>
    %159 = vector.extract_strided_slice %95 {offsets = [4, 0, 0], sizes = [1, 4, 4], strides = [1, 1, 1]} : vector<9x4x4xf32> to vector<1x4x4xf32>
    %160 = vector.shape_cast %159 : vector<1x4x4xf32> to vector<4x4xf32>
    %cst_91 = arith.constant dense<0.000000e+00> : vector<4x1024xf32>
    %161 = tpu.matmul %160, %157, %cst_91 {dimension_numbers = #tpu.dot_dimension_numbers<[1], [0], [0], [1], [0, 0, 1, 1], [], []>} : vector<4x4xf32>, vector<4x1024xf32>, vector<4x1024xf32> -> vector<4x1024xf32>
    %162 = arith.addf %156, %161 : vector<4x1024xf32>
    %163 = vector.extract_strided_slice %96 {offsets = [4, 0, 0], sizes = [1, 4, 4], strides = [1, 1, 1]} : vector<9x4x4xf32> to vector<1x4x4xf32>
    %164 = vector.shape_cast %163 : vector<1x4x4xf32> to vector<4x4xf32>
    %cst_92 = arith.constant dense<0.000000e+00> : vector<4x1024xf32>
    %165 = tpu.matmul %164, %158, %cst_92 {dimension_numbers = #tpu.dot_dimension_numbers<[1], [0], [0], [1], [0, 0, 1, 1], [], []>} : vector<4x4xf32>, vector<4x1024xf32>, vector<4x1024xf32> -> vector<4x1024xf32>
    %166 = arith.addf %162, %165 : vector<4x1024xf32>
    %c0_93 = arith.constant 0 : index
    %c129_94 = arith.constant 129 : index
    %167 = vector.load %arg13[%c0_93, %c129_94] : memref<4x1280xf32, #tpu.memory_space<vmem>>, vector<4x1024xf32>
    %c0_95 = arith.constant 0 : index
    %c129_96 = arith.constant 129 : index
    %168 = vector.load %arg14[%c0_95, %c129_96] : memref<4x1280xf32, #tpu.memory_space<vmem>>, vector<4x1024xf32>
    %169 = vector.extract_strided_slice %97 {offsets = [1, 0], sizes = [1, 1024], strides = [1, 1]} : vector<2x1024xf32> to vector<1x1024xf32>
    %170 = vector.broadcast %169 : vector<1x1024xf32> to vector<4x1024xf32>
    %171 = arith.mulf %167, %170 : vector<4x1024xf32>
    %172 = vector.extract_strided_slice %97 {offsets = [1, 0], sizes = [1, 1024], strides = [1, 1]} : vector<2x1024xf32> to vector<1x1024xf32>
    %173 = vector.broadcast %172 : vector<1x1024xf32> to vector<4x1024xf32>
    %174 = arith.mulf %168, %173 : vector<4x1024xf32>
    %175 = vector.extract_strided_slice %95 {offsets = [5, 0, 0], sizes = [1, 4, 4], strides = [1, 1, 1]} : vector<9x4x4xf32> to vector<1x4x4xf32>
    %176 = vector.shape_cast %175 : vector<1x4x4xf32> to vector<4x4xf32>
    %cst_97 = arith.constant dense<0.000000e+00> : vector<4x1024xf32>
    %177 = tpu.matmul %176, %171, %cst_97 {dimension_numbers = #tpu.dot_dimension_numbers<[1], [0], [0], [1], [0, 0, 1, 1], [], []>} : vector<4x4xf32>, vector<4x1024xf32>, vector<4x1024xf32> -> vector<4x1024xf32>
    %178 = arith.addf %166, %177 : vector<4x1024xf32>
    %179 = vector.extract_strided_slice %96 {offsets = [5, 0, 0], sizes = [1, 4, 4], strides = [1, 1, 1]} : vector<9x4x4xf32> to vector<1x4x4xf32>
    %180 = vector.shape_cast %179 : vector<1x4x4xf32> to vector<4x4xf32>
    %cst_98 = arith.constant dense<0.000000e+00> : vector<4x1024xf32>
    %181 = tpu.matmul %180, %174, %cst_98 {dimension_numbers = #tpu.dot_dimension_numbers<[1], [0], [0], [1], [0, 0, 1, 1], [], []>} : vector<4x4xf32>, vector<4x1024xf32>, vector<4x1024xf32> -> vector<4x1024xf32>
    %182 = arith.addf %178, %181 : vector<4x1024xf32>
    %c0_99 = arith.constant 0 : index
    %c159 = arith.constant 159 : index
    %183 = vector.load %arg13[%c0_99, %c159] : memref<4x1280xf32, #tpu.memory_space<vmem>>, vector<4x1024xf32>
    %c0_100 = arith.constant 0 : index
    %c159_101 = arith.constant 159 : index
    %184 = vector.load %arg14[%c0_100, %c159_101] : memref<4x1280xf32, #tpu.memory_space<vmem>>, vector<4x1024xf32>
    %185 = vector.extract_strided_slice %97 {offsets = [0, 0], sizes = [1, 1024], strides = [1, 1]} : vector<2x1024xf32> to vector<1x1024xf32>
    %186 = vector.broadcast %185 : vector<1x1024xf32> to vector<4x1024xf32>
    %187 = arith.mulf %183, %186 : vector<4x1024xf32>
    %188 = vector.extract_strided_slice %97 {offsets = [0, 0], sizes = [1, 1024], strides = [1, 1]} : vector<2x1024xf32> to vector<1x1024xf32>
    %189 = vector.broadcast %188 : vector<1x1024xf32> to vector<4x1024xf32>
    %190 = arith.mulf %184, %189 : vector<4x1024xf32>
    %191 = vector.extract_strided_slice %95 {offsets = [6, 0, 0], sizes = [1, 4, 4], strides = [1, 1, 1]} : vector<9x4x4xf32> to vector<1x4x4xf32>
    %192 = vector.shape_cast %191 : vector<1x4x4xf32> to vector<4x4xf32>
    %cst_102 = arith.constant dense<0.000000e+00> : vector<4x1024xf32>
    %193 = tpu.matmul %192, %187, %cst_102 {dimension_numbers = #tpu.dot_dimension_numbers<[1], [0], [0], [1], [0, 0, 1, 1], [], []>} : vector<4x4xf32>, vector<4x1024xf32>, vector<4x1024xf32> -> vector<4x1024xf32>
    %194 = arith.addf %182, %193 : vector<4x1024xf32>
    %195 = vector.extract_strided_slice %96 {offsets = [6, 0, 0], sizes = [1, 4, 4], strides = [1, 1, 1]} : vector<9x4x4xf32> to vector<1x4x4xf32>
    %196 = vector.shape_cast %195 : vector<1x4x4xf32> to vector<4x4xf32>
    %cst_103 = arith.constant dense<0.000000e+00> : vector<4x1024xf32>
    %197 = tpu.matmul %196, %190, %cst_103 {dimension_numbers = #tpu.dot_dimension_numbers<[1], [0], [0], [1], [0, 0, 1, 1], [], []>} : vector<4x4xf32>, vector<4x1024xf32>, vector<4x1024xf32> -> vector<4x1024xf32>
    %198 = arith.addf %194, %197 : vector<4x1024xf32>
    %c0_104 = arith.constant 0 : index
    %c160 = arith.constant 160 : index
    %199 = vector.load %arg13[%c0_104, %c160] : memref<4x1280xf32, #tpu.memory_space<vmem>>, vector<4x1024xf32>
    %c0_105 = arith.constant 0 : index
    %c160_106 = arith.constant 160 : index
    %200 = vector.load %arg14[%c0_105, %c160_106] : memref<4x1280xf32, #tpu.memory_space<vmem>>, vector<4x1024xf32>
    %201 = vector.extract_strided_slice %95 {offsets = [7, 0, 0], sizes = [1, 4, 4], strides = [1, 1, 1]} : vector<9x4x4xf32> to vector<1x4x4xf32>
    %202 = vector.shape_cast %201 : vector<1x4x4xf32> to vector<4x4xf32>
    %cst_107 = arith.constant dense<0.000000e+00> : vector<4x1024xf32>
    %203 = tpu.matmul %202, %199, %cst_107 {dimension_numbers = #tpu.dot_dimension_numbers<[1], [0], [0], [1], [0, 0, 1, 1], [], []>} : vector<4x4xf32>, vector<4x1024xf32>, vector<4x1024xf32> -> vector<4x1024xf32>
    %204 = arith.addf %198, %203 : vector<4x1024xf32>
    %205 = vector.extract_strided_slice %96 {offsets = [7, 0, 0], sizes = [1, 4, 4], strides = [1, 1, 1]} : vector<9x4x4xf32> to vector<1x4x4xf32>
    %206 = vector.shape_cast %205 : vector<1x4x4xf32> to vector<4x4xf32>
    %cst_108 = arith.constant dense<0.000000e+00> : vector<4x1024xf32>
    %207 = tpu.matmul %206, %200, %cst_108 {dimension_numbers = #tpu.dot_dimension_numbers<[1], [0], [0], [1], [0, 0, 1, 1], [], []>} : vector<4x4xf32>, vector<4x1024xf32>, vector<4x1024xf32> -> vector<4x1024xf32>
    %208 = arith.addf %204, %207 : vector<4x1024xf32>
    %c0_109 = arith.constant 0 : index
    %c161 = arith.constant 161 : index
    %209 = vector.load %arg13[%c0_109, %c161] : memref<4x1280xf32, #tpu.memory_space<vmem>>, vector<4x1024xf32>
    %c0_110 = arith.constant 0 : index
    %c161_111 = arith.constant 161 : index
    %210 = vector.load %arg14[%c0_110, %c161_111] : memref<4x1280xf32, #tpu.memory_space<vmem>>, vector<4x1024xf32>
    %211 = vector.extract_strided_slice %97 {offsets = [1, 0], sizes = [1, 1024], strides = [1, 1]} : vector<2x1024xf32> to vector<1x1024xf32>
    %212 = vector.broadcast %211 : vector<1x1024xf32> to vector<4x1024xf32>
    %213 = arith.mulf %209, %212 : vector<4x1024xf32>
    %214 = vector.extract_strided_slice %97 {offsets = [1, 0], sizes = [1, 1024], strides = [1, 1]} : vector<2x1024xf32> to vector<1x1024xf32>
    %215 = vector.broadcast %214 : vector<1x1024xf32> to vector<4x1024xf32>
    %216 = arith.mulf %210, %215 : vector<4x1024xf32>
    %217 = vector.extract_strided_slice %95 {offsets = [8, 0, 0], sizes = [1, 4, 4], strides = [1, 1, 1]} : vector<9x4x4xf32> to vector<1x4x4xf32>
    %218 = vector.shape_cast %217 : vector<1x4x4xf32> to vector<4x4xf32>
    %cst_112 = arith.constant dense<0.000000e+00> : vector<4x1024xf32>
    %219 = tpu.matmul %218, %213, %cst_112 {dimension_numbers = #tpu.dot_dimension_numbers<[1], [0], [0], [1], [0, 0, 1, 1], [], []>} : vector<4x4xf32>, vector<4x1024xf32>, vector<4x1024xf32> -> vector<4x1024xf32>
    %220 = arith.addf %208, %219 : vector<4x1024xf32>
    %221 = vector.extract_strided_slice %96 {offsets = [8, 0, 0], sizes = [1, 4, 4], strides = [1, 1, 1]} : vector<9x4x4xf32> to vector<1x4x4xf32>
    %222 = vector.shape_cast %221 : vector<1x4x4xf32> to vector<4x4xf32>
    %cst_113 = arith.constant dense<0.000000e+00> : vector<4x1024xf32>
    %223 = tpu.matmul %222, %216, %cst_113 {dimension_numbers = #tpu.dot_dimension_numbers<[1], [0], [0], [1], [0, 0, 1, 1], [], []>} : vector<4x4xf32>, vector<4x1024xf32>, vector<4x1024xf32> -> vector<4x1024xf32>
    %224 = arith.addf %220, %223 : vector<4x1024xf32>
    %c0_114 = arith.constant 0 : index
    %c0_115 = arith.constant 0 : index
    %225 = vector.load %arg7[%c0_114, %c0_115] : memref<4x1xf32, #tpu.memory_space<vmem>>, vector<4x1xf32>
    %226 = vector.broadcast %225 : vector<4x1xf32> to vector<4x1024xf32>
    %227 = arith.addf %224, %226 : vector<4x1024xf32>
    %cst_116 = arith.constant 0.000000e+00 : f32
    %228 = vector.broadcast %cst_116 : f32 to vector<4x1024xf32>
    %229 = arith.cmpf ogt, %227, %228 : vector<4x1024xf32>
    %cst_117 = arith.constant 1.000000e-01 : f32
    %230 = vector.broadcast %cst_117 : f32 to vector<4x1024xf32>
    %231 = arith.mulf %230, %227 : vector<4x1024xf32>
    %232 = arith.select %229, %227, %231 : vector<4x1024xi1>, vector<4x1024xf32>
    %c0_118 = arith.constant 0 : index
    %c0_119 = arith.constant 0 : index
    %c0_120 = arith.constant 0 : index
    %233 = vector.load %arg11[%c0_118, %c0_119, %c0_120] : memref<1x4x1024xf32, #tpu.memory_space<vmem>>, vector<1x4x1024xf32>
    %234 = vector.shape_cast %233 : vector<1x4x1024xf32> to vector<4x1024xf32>
    %235 = vector.shape_cast %232 : vector<4x1024xf32> to vector<1x4x1024xf32>
    tpu.vector_store %arg11[%c0_118, %c0_119, %c0_120], %235 {strides = array<i32>} : memref<1x4x1024xf32, #tpu.memory_space<vmem>>, vector<1x4x1024xf32>,
    return
  }
  func.func @transform_0(%arg0: i32) -> (i32, i32, i32) {
    %c0_i32 = arith.constant 0 : i32
    %c0_i32_0 = arith.constant 0 : i32
    %c0_i32_1 = arith.constant 0 : i32
    return %arg0, %c0_i32, %c0_i32_0 : i32, i32, i32
  }
  func.func @transform_1(%arg0: i32) -> (i32, i32, i32) {
    %c0_i32 = arith.constant 0 : i32
    %c0_i32_0 = arith.constant 0 : i32
    %c0_i32_1 = arith.constant 0 : i32
    return %arg0, %c0_i32, %c0_i32_0 : i32, i32, i32
  }
  func.func @transform_2(%arg0: i32) -> (i32, i32, i32) {
    %c0_i32 = arith.constant 0 : i32
    %c0_i32_0 = arith.constant 0 : i32
    %c0_i32_1 = arith.constant 0 : i32
    %c0_i32_2 = arith.constant 0 : i32
    return %c0_i32, %c0_i32_0, %c0_i32_1 : i32, i32, i32
  }
  func.func @transform_3(%arg0: i32) -> (i32, i32, i32) {
    %c0_i32 = arith.constant 0 : i32
    %c0_i32_0 = arith.constant 0 : i32
    %c0_i32_1 = arith.constant 0 : i32
    %c0_i32_2 = arith.constant 0 : i32
    return %c0_i32, %c0_i32_0, %c0_i32_1 : i32, i32, i32
  }
  func.func @transform_4(%arg0: i32) -> (i32, i32, i32) {
    %c0_i32 = arith.constant 0 : i32
    %c0_i32_0 = arith.constant 0 : i32
    %c0_i32_1 = arith.constant 0 : i32
    %c0_i32_2 = arith.constant 0 : i32
    return %c0_i32, %c0_i32_0, %c0_i32_1 : i32, i32, i32
  }
  func.func @transform_5(%arg0: i32) -> (i32, i32) {
    %c0_i32 = arith.constant 0 : i32
    %c0_i32_0 = arith.constant 0 : i32
    %c0_i32_1 = arith.constant 0 : i32
    return %c0_i32, %c0_i32_0 : i32, i32
  }
  func.func @transform_6(%arg0: i32) -> (i32, i32) {
    %c0_i32 = arith.constant 0 : i32
    %c0_i32_0 = arith.constant 0 : i32
    %c0_i32_1 = arith.constant 0 : i32
    return %c0_i32, %c0_i32_0 : i32, i32
  }
  func.func @transform_7(%arg0: i32) -> (i32, i32) {
    %c0_i32 = arith.constant 0 : i32
    %c0_i32_0 = arith.constant 0 : i32
    %c0_i32_1 = arith.constant 0 : i32
    return %c0_i32, %c0_i32_0 : i32, i32
  }
  func.func @transform_8(%arg0: i32) -> (i32, i32) {
    %c0_i32 = arith.constant 0 : i32
    %c0_i32_0 = arith.constant 0 : i32
    %c0_i32_1 = arith.constant 0 : i32
    return %c0_i32, %c0_i32_0 : i32, i32
  }
  func.func @transform_9(%arg0: i32) -> (i32, i32) {
    %c0_i32 = arith.constant 0 : i32
    %c0_i32_0 = arith.constant 0 : i32
    %c0_i32_1 = arith.constant 0 : i32
    return %c0_i32, %c0_i32_0 : i32, i32
  }
  func.func @transform_10(%arg0: i32) -> (i32, i32, i32) {
    %c0_i32 = arith.constant 0 : i32
    %c0_i32_0 = arith.constant 0 : i32
    %c0_i32_1 = arith.constant 0 : i32
    return %arg0, %c0_i32, %c0_i32_0 : i32, i32, i32
  }
}

</mosaic_0001>

<bundles_post_ra>
// kernel: up_forward.1
= control target key start
LH: loop header
LB: loop body
LE: loop exit
PB: predicated region body
PF: predicated region fallthrough
CT: control target
= control target key end

     0   :  { %15 = vsyncpa [#allocation6], 0  ;;  %s9545_s13 = smov 0   ;;  %s10896_s0 = inlined_call_operand.vmem [shape: f32[2,4,256], index: 0, kind: input, shape index: {}]   ;;  %s10897_s1 = inlined_call_operand.vmem [shape: f32[2,4,1024], index: 1, kind: input, shape index: {}]   ;;  %s10898_s2 = inlined_call_operand.vmem [shape: f32[9,4,4], index: 2, kind: input, shape index: {}]   ;;  %s10899_s3 = inlined_call_operand.vmem [shape: f32[9,4,4], index: 3, kind: input, shape index: {}]   ;;  %s10900_s4 = inlined_call_operand.vmem [shape: f32[9,4,4], index: 4, kind: input, shape index: {}]   ;;  %s10901_s5 = inlined_call_operand.vmem [shape: f32[4,1], index: 5, kind: input, shape index: {}]   ;;  %s10902_s6 = inlined_call_operand.vmem [shape: f32[4,1], index: 6, kind: input, shape index: {}]   ;;  %s10903_s7 = inlined_call_operand.vmem [shape: f32[2,256], index: 7, kind: input, shape index: {}]   ;;  %s10904_s8 = inlined_call_operand.vmem [shape: f32[2,1024], index: 8, kind: input, shape index: {}]   ;;  %s10905_s9 = inlined_call_operand.hbm [shape: f32[256,1024], index: 9, kind: input, shape index: {}]   ;;  %s10906_s10 = inlined_call_operand.vmem [shape: f32[2,4,1024], index: 10, kind: output, shape index: {}]  }
   0x1 LB: > { %s9551_s14 = sadd.s32 4294967295, %s9469_s13   ;;  %p8702_p0 = scmp.ge.s32.totalorder %s9469_s13, 1  ;;  %s9469_s13 = sphi %s9545_s13, %s21_s13  }
   0x2   : > { %p272_p1 = scmp.lt.s32.totalorder %s9469_s13, 3  ;;  %s9471_s15 = smov [#allocation5]  }
   0x3   : > { %s305_s16 = sshll.u32 %s9471_s15, 4  ;;  %p10907_p3 = scmp.eq.s32.totalorder %s9551_s14, 0  ;;  %s306_s16 = int_to_ptr.vmem [resolvable:$true] %s305_s16 }
   0x4   : > { %p9555_p2 = pnand %p8702_p0, %p272_p1  ;;  %s9431_s21 = scalar_lea.hbm %s10905_s9, 32768 }
   0x5   : > { %p9432_p6 = scmp.ne.s32.totalorder %s10905_s9, %s9431_s21  ;;  %p9438_p10 = scmp.lt.u32.totalorder %s9431_s21, %s10905_s9 }
   0x6   : > { %s10909_s17 = scalar_select %p9555_p2, 1, 0 }
   0x7   : > { %p9373_p4 = pneg %p9555_p2 }
   0x9   : > { %p9564_p5 = pnand %p10907_p3, %p9373_p4 }
   0xb   : > { %p9433_p7 = pneg %p9564_p5 }
   0xd   : > { %p9434_p8 = pnand %p9433_p7, %p9432_p6 }
   0xf   : > { %p9435_p9 = pneg %p9434_p8 }
  0x11   : > { %p9440_p11 = pnand %p9438_p10, %p9435_p9 }
  0x13   : > { %9443 = shalt.err (!%p9440_p11)
}
  0x14   : > { %s9444_s26 = scalar_lea.vmem %s306_s16, 32768  ;;  %p9452_p1 = scmp.lt.s32.totalorder %s306_s16, %s306_s16 }
  0x15   : > { %p9445_p12 = scmp.ne.s32.totalorder %s306_s16, %s9444_s26  ;;  %p9453_p4 = scmp.lt.s32.totalorder %s9444_s26, %s9444_s26 }
  0x17   : > { %p9447_p13 = pnand %p9445_p12, %p9433_p7  ;;  %p9454_p3 = por %p9453_p4, %p9452_p1 }
  0x19   : > { %p9448_p0 = pneg %p9447_p13 }
  0x1b   : > { %p9455_p2 = pnand %p9454_p3, %p9448_p0 }
  0x1d   : > { %9458 = shalt.err (!%p9455_p2)
}
  0x1e   : > { %s9472_s27 = smov 1024   ;;  %s9473_s28 = smov 64  }
  0x1f   : > { %9376 = dma.hbm_to_vmem [thread:$0]  (!%p9564_p5), %s10905_s9, 32768, %s306_s16, [#allocation6], %s9472_s27, %s9472_s27, %s9473_s28  }
  0x20   : > { %p10911_p6 = scmp.ne.s32.totalorder %s10909_s17, 0 }
  0x21   : > { %p10912_p8 = scmp.eq.s32.totalorder (!%p10911_p6), %s9551_s14, 0 }
  0x22   : > { %337 = sbr.rel (%p10911_p6) target bundleno = 1717 (0x6b5), region = 60 }
  0x29   : > { %9464 = dma.done.wait (%p10912_p8), [#allocation6], 32768   ;;  %p10913_p7 = pmov %p10912_p8 }
  0x2a   : > { %v422_v0 = vlaneseq  ;;  %v9474_v1 = vmov 0.0   ;;  %p380_p2 = scmp.lt.s32.totalorder %s9551_s14, 1  ;;  %v418_v7 = vld [vmem:[%s10903_s7] sm:$0xf]  ;;  %s9475_s19 = smov 111   ;;  %vm446_vm0 = vcmask 908288  }
  0x2b   : > { %9466 = vsyncadd (%p10913_p7), [#allocation6], 4294934528  ;;  %395 = vst [vmem:[#allocation2] sm:$0xf] %v9474_v1  ;;  %537 = vmatprep.mubr.f32.mxu0 %v9474_v1  ;;  %2187 = vmatprep.mubr.f32.mxu1 %v9474_v1  ;;  %s9476_s20 = smov 127   ;;  %s9477_s21 = smov 113  }
  0x2c   : > { %396 = vst [vmem:[#allocation2 + $0xc] sm:$0xf] %v9474_v1  ;;  %399 = vst [vmem:[#allocation4] sm:$0xf] %v9474_v1  ;;  %v9598_v2 = vshrl.u32 %v422_v0, 7  ;;  %s10915_s14 = smov (!%p380_p2, %s9551_s14), 1 }
  0x2d   : > { %400 = vst [vmem:[#allocation4 + $0x24] sm:$0xf] %v9474_v1  ;;  %1895 = vst [vmem:[#allocation3] sm:$0xf] %v9474_v1  ;;  %s8958_s15 = sshll.u32 %s10915_s14, 3  ;;  %s9478_s22 = smov 1  }
  0x2e   : > { %1896 = vst [vmem:[#allocation3 + $0x24] sm:$0xf] %v9474_v1  ;;  %v9602_v3 = vsub.s32 0, %v9598_v2  ;;  %v9605_v4 = vsub.s32 2, %v9598_v2  ;;  %v9608_v5 = vsub.s32 1, %v9598_v2  ;;  %v9611_v6 = vsub.s32 3, %v9598_v2  ;;  %s384_s18 = scalar_lea.vmem %s10896_s0, %s8958_s15 }
  0x2f   : > { %v9627_v12 = vld [vmem:[%s384_s18] sm:$0xff]  ;;  %s9479_s23 = smov 15   ;;  %s9480_s24 = smov 17   ;;  %vm660_vm1 = vcmask 924672   ;;  %vm763_vm2 = vcmask 1039360   ;;  %vm778_vm3 = vcmask 7168  }
  0x30   : > { %v425_v8 = vrot.slane %v418_v7, %v9602_v3  ;;  %v429_v9 = vrot.slane %v418_v7, %v9605_v4  ;;  %v639_v10 = vrot.slane %v418_v7, %v9608_v5  ;;  %v643_v11 = vrot.slane %v418_v7, %v9611_v6  ;;  %398 = vst [vmem:[#allocation2 + $0x4] sm:$0xff] %v9627_v12  ;;  %s9481_s25 = smov 16   ;;  %v410_v52 = vld [vmem:[%s10898_s2 + $0x4] sm:$0xf]  ;;  %s9482_s28 = smov 112  }
  0x31   : > { %vm461_vm4 = vcmask 130048   ;;  %vm468_vm5 = vcmask 1043456   ;;  %vm464_vm6 = vcmask 31744   ;;  %vm675_vm7 = vcmask 121856   ;;  %s9484_s15 = smov 95   ;;  %s9486_s26 = smov 33  }
  0x32   : > { %v435_v13 = vrot.slane %v425_v8, %v9602_v3  ;;  %v439_v14 = vrot.slane %v429_v9, %v9602_v3  ;;  %v649_v15 = vrot.slane %v639_v10, %v9608_v5  ;;  %v653_v16 = vrot.slane %v643_v11, %v9608_v5  ;;  %s9487_s27 = smov 32   ;;  %s9488_s12 = smov 31  }
  0x33   : > { %v945_v57 = vld [vmem:[#allocation2 + $0xc] sm:$0xf]  ;;  %vm553_vm8 = vcmask 138240   ;;  %v9672_v0 = vcombine.high %v9627_v12, %v9627_v12  ;;  %vm1157_vm9 = vcmask 916480   ;;  %vm2045_vm10 = vcmask 777216  }
  0x34   : > { %v442_v17 = vcombine.low %v435_v13, %v439_v14  ;;  %v656_v18 = vcombine.low %v649_v15, %v653_v16  ;;  %v1046_v60 = vld [vmem:[#allocation2 + $0xc] sm:$0xf]  ;;  %v1341_v14 = vld [vmem:[%s10901_s5] sm:$0xf]  ;;  %v9483_v15 = vmov 0   ;;  %vm2095_vm13 = vcmask 269312  }
  0x35   : > { %v1147_v9 = vld [vmem:[#allocation2 + $0xc] sm:$0xf]  ;;  %9406 = vset.pattern.permute.xlu0 %v9483_v15  ;;  %v9688_v16 = vld [vmem:[%s10904_s8] sm:$0xff]  ;;  %v415_v15 = vld [vmem:[%s10898_s2 + $0x18] sm:$0xf]  ;;  %vm3554_vm14 = vcmask 793600  }
  0x36   : > { %443 = vrot.lane.b32.xlu0 %v442_v17, %s9475_s19  ;;  %760 = vrot.lane.b32.xlu1 %v442_v17, %s9476_s20  ;;  %v1241_v10 = vld [vmem:[#allocation2 + $0xc] sm:$0xf]  ;;  %vm2782_vm15 = vcmask 261120  }
  0x37   : > { %v419_v19 = vld [vmem:[#allocation2] sm:$0xff]  ;;  %v420_v21 = vld [vmem:[#allocation2 + $0x8] sm:$0xf] }
  0x38   : > { %v454_v20 = vcombine.high %v419_v19, %v419_v19  ;;  %v635_v40 = vld [vmem:[#allocation2 + $0x8] sm:$0xf] }
  0x39   : > { %v759_v44 = vld [vmem:[#allocation2 + $0x8] sm:$0xf] }
  0x3a   : > { %657 = vrot.lane.b32.xlu0 %v656_v18, %s9477_s21  ;;  %946 = vrot.lane.b32.xlu1 %v656_v18, %s9478_s22 }
  0x3e   : > { %1047 = vrot.lane.b32.xlu0 %v442_v17, %s9479_s23  ;;  %1242 = vrot.lane.b32.xlu1 %v656_v18, %s9480_s24  ;;  %v1952_v17 = vrot.slane %v9688_v16, %v9602_v3  ;;  %v1956_v18 = vrot.slane %v9688_v16, %v9605_v4 }
  0x42   : > { %457 = vrot.lane.b32.xlu0 %v454_v20, %s9481_s25  ;;  %459 = vrot.lane.b32.xlu1 %v420_v21, %s9481_s25  ;;  %v1996_v20 = vrot.slane %v1956_v18, %v9602_v3 }
  0x46   : > { %455 = vrot.lane.b32.xlu0 %v419_v19, %s9481_s25  ;;  %s9485_s25 = smov 97  }
  0xa8   : > { %v444_v22 = vpop.permute.xlu0 %443  ;;  %v761_v23 = vpop.permute.xlu1 %760 }
  0xa9   : > { %v445_v24 = vrot.slane %v444_v22, 4  ;;  %v762_v31 = vrot.slane %v761_v23, 4 }
  0xab   : > { %v447_v25 = vsel %vm446_vm0, %v445_v24, %v444_v22  ;;  %v451_v26 = vmul.f32 %v445_v24, %v420_v21  ;;  %v764_v37 = vsel %vm763_vm2, %v762_v31, %v761_v23  ;;  %v768_v49 = vmul.f32 %v762_v31, %v759_v44  ;;  %v409_v44 = vld [vmem:[%s10898_s2] sm:$0xf] }
  0xac   : > { %v450_v27 = vmul.f32 %v447_v25, %v419_v19  ;;  %v658_v28 = vpop.permute.xlu0 %657  ;;  %v947_v29 = vpop.permute.xlu1 %946  ;;  %v767_v41 = vmul.f32 %v764_v37, %v419_v19  ;;  %v1959_v21 = vsub.s32 4, %v9598_v2  ;;  %v1963_v22 = vsub.s32 6, %v9598_v2 }
  0xad   : > { %v659_v30 = vrot.slane %v658_v28, 4  ;;  %551 = vrot.lane.b32.xlu0 %v451_v26, %s9480_s24  ;;  %v948_v38 = vrot.slane %v947_v29, 4 }
  0xae   : > { %v546_v32 = vcombine.high %v450_v27, %v450_v27  ;;  %v771_v48 = vcombine.high %v767_v41, %v767_v41  ;;  %v1960_v24 = vrot.slane %v9688_v16, %v1959_v21  ;;  %v1964_v25 = vrot.slane %v9688_v16, %v1963_v22 }
  0xaf   : > { %v661_v33 = vsel %vm660_vm1, %v659_v30, %v658_v28  ;;  %v949_v45 = vsel %vm778_vm3, %v948_v38, %v947_v29  ;;  %v665_v47 = vmul.f32 %v659_v30, %v635_v40  ;;  %v953_v59 = vmul.f32 %v948_v38, %v945_v57  ;;  %v9713_v29 = vld [vmem:[%s10904_s8 + $0x8] sm:$0xff] }
  0xb0   : > { %v664_v34 = vmul.f32 %v661_v33, %v419_v19  ;;  %549 = vrot.lane.b32.xlu1 %v546_v32, %s9480_s24  ;;  %v1048_v35 = vpop.permute.xlu0 %1047  ;;  %v1243_v36 = vpop.permute.xlu1 %1242  ;;  %v952_v50 = vmul.f32 %v949_v45, %v9627_v12  ;;  %v1992_v19 = vrot.slane %v1952_v17, %v9602_v3  ;;  %v2000_v26 = vrot.slane %v1960_v24, %v9602_v3  ;;  %v416_v24 = vld [vmem:[%s10898_s2 + $0x1c] sm:$0xf] }
  0xb1   : > { %v1049_v53 = vrot.slane %v1048_v35, 4  ;;  %v1244_v63 = vrot.slane %v1243_v36, 4  ;;  %v1968_v30 = vrot.slane %v9713_v29, %v9602_v3  ;;  %v1972_v31 = vrot.slane %v9713_v29, %v9605_v4 }
  0xb2   : > { %v668_v39 = vcombine.high %v664_v34, %v664_v34  ;;  %v956_v55 = vcombine.high %v952_v50, %v952_v50  ;;  %v9698_v23 = vcombine.low %v1992_v19, %v1996_v20 }
  0xb3   : > { %v1050_v56 = vsel %vm675_vm7, %v1049_v53, %v1048_v35  ;;  %v1054_v62 = vmul.f32 %v1049_v53, %v1046_v60  ;;  %v1245_v7 = vsel %vm553_vm8, %v1244_v63, %v1243_v36  ;;  %v1249_v13 = vmul.f32 %v1244_v63, %v1241_v10 }
  0xb4   : > { %671 = vrot.lane.b32.xlu0 %v668_v39, %s9479_s23  ;;  %547 = vrot.lane.b32.xlu1 %v450_v27, %s9480_s24  ;;  %v458_v42 = vpop.permute.xlu0 %457  ;;  %v460_v43 = vpop.permute.xlu1 %459  ;;  %v1053_v58 = vmul.f32 %v1050_v56, %v9627_v12  ;;  %v1248_v8 = vmul.f32 %v1245_v7, %v9627_v12  ;;  %v2004_v27 = vrot.slane %v1964_v25, %v9602_v3  ;;  %v412_v56 = vld [vmem:[%s10898_s2 + $0xc] sm:$0xf] }
  0xb5   : > { %v463_v46 = vsel %vm461_vm4, %v458_v42, %v460_v43  ;;  %v2008_v32 = vrot.slane %v1968_v30, %v9602_v3  ;;  %v2012_v33 = vrot.slane %v1972_v31, %v9602_v3  ;;  %v1976_v35 = vrot.slane %v9713_v29, %v1959_v21  ;;  %v1356_v21 = vld [vmem:[#allocation5 + $0x8] sm:$0xff]  ;;  %v1363_v30 = vld [vmem:[#allocation5 + $0x40] sm:$0xff] }
  0xb6   : > { %8713 = vmatprep.subr.msk.mxu0 %vm468_vm5, %v463_v46  ;;  %v1057_v61 = vcombine.high %v1053_v58, %v1053_v58  ;;  %v1252_v11 = vcombine.high %v1248_v8, %v1248_v8  ;;  %v9706_v28 = vcombine.low %v2000_v26, %v2004_v27  ;;  %v1980_v36 = vrot.slane %v9713_v29, %v1963_v22  ;;  %v1364_v22 = vld [vmem:[#allocation5 + $0x48] sm:$0xff]  ;;  %v1355_v27 = vld [vmem:[#allocation5] sm:$0xff] }
  0xb7   : > { %v2016_v37 = vrot.slane %v1976_v35, %v9602_v3  ;;  %v8961_v26 = vpack.c.bf16 %v1364_v22, %v1356_v21  ;;  %v1372_v31 = vld [vmem:[#allocation5 + $0x88] sm:$0xff]  ;;  %v8963_v35 = vpack.c.bf16 %v1363_v30, %v1355_v27  ;;  %v1483_v21 = vld [vmem:[#allocation5 + $0x400] sm:$0xff] }
  0xb8   : > { %669 = vrot.lane.b32.xlu0 %v664_v34, %s9479_s23  ;;  %673 = vrot.lane.b32.xlu1 %v665_v47, %s9479_s23  ;;  %v456_v51 = vpop.permute.xlu0 %455  ;;  %v9721_v34 = vcombine.low %v2008_v32, %v2012_v33  ;;  %v2020_v38 = vrot.slane %v1980_v36, %v9602_v3  ;;  %v1380_v32 = vld [vmem:[#allocation5 + $0xc8] sm:$0xff]  ;;  %v417_v33 = vld [vmem:[%s10898_s2 + $0x20] sm:$0xf] }
  0xb9   : > { %v462_v54 = vsel %vm461_vm4, %v456_v51, %v458_v42  ;;  %v411_v51 = vld [vmem:[%s10898_s2 + $0x8] sm:$0xf]  ;;  %v8965_v36 = vpack.c.bf16 %v1380_v32, %v1372_v31  ;;  %v1491_v22 = vld [vmem:[#allocation5 + $0x440] sm:$0xff] }
  0xba   : > { %8714 = vmatpush1.msk.msra.mxu0 %vm468_vm5, %v462_v54  ;;  %v9729_v39 = vcombine.low %v2016_v37, %v2020_v38  ;;  %v1371_v37 = vld [vmem:[#allocation5 + $0x80] sm:$0xff]  ;;  %v1516_v32 = vld [vmem:[#allocation5 + $0x508] sm:$0xff] }
  0xbb   : > { %8715 = vmatmul.mubr.msk.f32.vlgmr.msra.gmra.mrb[0].mxu0 %vm464_vm6, %v410_v52  ;;  %v1379_v38 = vld [vmem:[#allocation5 + $0xc0] sm:$0xff] }
  0xbc   : > { %774 = vrot.lane.b32.xlu1 %v771_v48, %s9478_s22  ;;  %776 = vrot.lane.b32.xlu0 %v768_v49, %s9478_s22  ;;  %v1499_v30 = vld [vmem:[#allocation5 + $0x480] sm:$0xff] }
  0xbd   : > { %627 = vmatprep.mubr.f32.mxu0 %v9474_v1  ;;  %v1507_v31 = vld [vmem:[#allocation5 + $0x4c0] sm:$0xff] }
  0xc0   : > { %772 = vrot.lane.b32.xlu1 %v767_v41, %s9478_s22  ;;  %959 = vrot.lane.b32.xlu0 %v956_v55, %s9476_s20 }
  0xc4   : > { %957 = vrot.lane.b32.xlu0 %v952_v50, %s9476_s20  ;;  %961 = vrot.lane.b32.xlu1 %v953_v59, %s9476_s20 }
  0xc8   : > { %1060 = vrot.lane.b32.xlu1 %v1057_v61, %s9477_s21  ;;  %1062 = vrot.lane.b32.xlu0 %v1054_v62, %s9477_s21  ;;  %v413_v62 = vld [vmem:[%s10898_s2 + $0x10] sm:$0xf] }
  0xcc   : > { %1058 = vrot.lane.b32.xlu1 %v1053_v58, %s9477_s21  ;;  %1153 = vrot.lane.b32.xlu0 %v9672_v0, %s9482_s28 }
  0xd0   : > { %1155 = vrot.lane.b32.xlu1 %v1147_v9, %s9482_s28  ;;  %1151 = vrot.lane.b32.xlu0 %v9627_v12, %s9482_s28 }
  0xd4   : > { %1255 = vrot.lane.b32.xlu1 %v1252_v11, %s9475_s19  ;;  %1257 = vrot.lane.b32.xlu0 %v1249_v13, %s9475_s19 }
  0xd8   : > { %1253 = vrot.lane.b32.xlu1 %v1248_v8, %s9475_s19  ;;  %1344 = vperm.xlu0 %9406, %v1341_v14   ;;  %v414_v8 = vld [vmem:[%s10898_s2 + $0x14] sm:$0xf]  ;;  %s8959_s19 = sshll.u32 %s10915_s14, 5 }
  0xd9   : > { %s9808_s24 = scalar_lea.vmem %s10897_s1, %s8959_s19  ;;  %s10887_s21 = scalar_lea.vmem %s10906_s10, %s8959_s19 }
  0xdc   : > { %2033 = vrot.lane.b32.xlu1 %v9698_v23, %s9484_s15  ;;  %2037 = vrot.lane.b32.xlu0 %v9721_v34, %s9484_s15 }
  0xe0   : > { %2035 = vrot.lane.b32.xlu1 %v9706_v28, %s9484_s15 }
  0xe4   : > { %2039 = vrot.lane.b32.xlu1 %v9729_v39, %s9484_s15 }
 0x11f   : > { %v552_v4 = vpop.permute.xlu0 %551 }
 0x122   : > { %v550_v40 = vpop.permute.xlu1 %549 }
 0x123   : > { %v555_v41 = vsel %vm553_vm8, %v550_v40, %v552_v4  ;;  %v1388_v4 = vld [vmem:[#allocation5 + $0x108] sm:$0xff] }
 0x124   : > { %8716 = vmatprep.subr.msk.mxu0 %vm468_vm5, %v555_v41  ;;  %v8967_v41 = vpack.c.bf16 %v1379_v38, %v1371_v37  ;;  %v1515_v37 = vld [vmem:[#allocation5 + $0x500] sm:$0xff] }
 0x125   : > { %v1523_v38 = vld [vmem:[#allocation5 + $0x540] sm:$0xff] }
 0x126   : > { %v672_v42 = vpop.permute.xlu0 %671  ;;  %v548_v43 = vpop.permute.xlu1 %547 }
 0x127   : > { %v554_v45 = vsel %vm553_vm8, %v548_v43, %v550_v40  ;;  %v1396_v40 = vld [vmem:[#allocation5 + $0x148] sm:$0xff]  ;;  %v1387_v43 = vld [vmem:[#allocation5 + $0x100] sm:$0xff] }
 0x128   : > { %8717 = vmatpush1.msk.msra.mxu0 %vm468_vm5, %v554_v45  ;;  %v1404_v45 = vld [vmem:[#allocation5 + $0x188] sm:$0xff] }
 0x129   : > { %8718 = vmatmul.mubr.msk.f32.vlgmr.msra.gmra.mrb[0].mxu0 %vm464_vm6, %v409_v44  ;;  %v1395_v44 = vld [vmem:[#allocation5 + $0x140] sm:$0xff] }
 0x12a   : > { %v670_v3 = vpop.permute.xlu0 %669  ;;  %v674_v46 = vpop.permute.xlu1 %673  ;;  %749 = vmatprep.mubr.f32.mxu0 %v9474_v1 }
 0x12b   : > { %v676_v47 = vsel %vm675_vm7, %v670_v3, %v672_v42  ;;  %v677_v48 = vsel %vm675_vm7, %v672_v42, %v674_v46  ;;  %v8969_v42 = vpack.c.bf16 %v1396_v40, %v1388_v4  ;;  %v1412_v3 = vld [vmem:[#allocation5 + $0x1c8] sm:$0xff]  ;;  %v8971_v46 = vpack.c.bf16 %v1395_v44, %v1387_v43  ;;  %v1531_v43 = vld [vmem:[#allocation5 + $0x580] sm:$0xff] }
 0x12c   : > { %8719 = vmatprep.subr.msk.mxu0 %vm468_vm5, %v677_v48  ;;  %v1403_v48 = vld [vmem:[#allocation5 + $0x180] sm:$0xff]  ;;  %v1532_v4 = vld [vmem:[#allocation5 + $0x588] sm:$0xff] }
 0x12d   : > { %8720 = vmatpush1.msk.msra.mxu0 %vm468_vm5, %v676_v47  ;;  %v8973_v47 = vpack.c.bf16 %v1412_v3, %v1404_v45  ;;  %v1540_v40 = vld [vmem:[#allocation5 + $0x5c8] sm:$0xff]  ;;  %v1539_v44 = vld [vmem:[#allocation5 + $0x5c0] sm:$0xff] }
 0x12e   : > { %v775_v49 = vpop.permute.xlu1 %774  ;;  %v777_v50 = vpop.permute.xlu0 %776  ;;  %v1548_v45 = vld [vmem:[#allocation5 + $0x608] sm:$0xff] }
 0x12f   : > { %v780_v52 = vsel %vm778_vm3, %v775_v49, %v777_v50  ;;  %v1420_v50 = vld [vmem:[#allocation5 + $0x208] sm:$0xff] }
 0x130   : > { %8722 = vmatprep.subr.msk.mxu0 %vm468_vm5, %v780_v52  ;;  %v1556_v3 = vld [vmem:[#allocation5 + $0x648] sm:$0xff] }
 0x131   : > { %8721 = vmatmul.mubr.msk.f32.vlgmr.msra.gmra.mrb[0].mxu0 %vm464_vm6, %v411_v51  ;;  %v1428_v51 = vld [vmem:[#allocation5 + $0x248] sm:$0xff] }
 0x132   : > { %v773_v53 = vpop.permute.xlu1 %772  ;;  %852 = vmatprep.mubr.f32.mxu0 %v9474_v1  ;;  %v960_v55 = vpop.permute.xlu0 %959 }
 0x133   : > { %v779_v54 = vsel %vm778_vm3, %v773_v53, %v775_v49  ;;  %v1411_v49 = vld [vmem:[#allocation5 + $0x1c0] sm:$0xff]  ;;  %v8977_v53 = vpack.c.bf16 %v1428_v51, %v1420_v50  ;;  %v1564_v50 = vld [vmem:[#allocation5 + $0x688] sm:$0xff] }
 0x134   : > { %8723 = vmatpush1.msk.msra.mxu0 %vm468_vm5, %v779_v54  ;;  %v8975_v52 = vpack.c.bf16 %v1411_v49, %v1403_v48  ;;  %v1419_v54 = vld [vmem:[#allocation5 + $0x200] sm:$0xff]  ;;  %v1572_v51 = vld [vmem:[#allocation5 + $0x6c8] sm:$0xff] }
 0x135   : > { %8725 = vmatprep.subr.msk.mxu0 %vm468_vm5, %v9672_v0  ;;  %v1547_v48 = vld [vmem:[#allocation5 + $0x600] sm:$0xff] }
 0x136   : > { %v962_v57 = vpop.permute.xlu1 %961  ;;  %v958_v59 = vpop.permute.xlu0 %957  ;;  %v1555_v49 = vld [vmem:[#allocation5 + $0x640] sm:$0xff] }
 0x137   : > { %v964_v58 = vsel %vm763_vm2, %v960_v55, %v962_v57  ;;  %v963_v63 = vsel %vm763_vm2, %v958_v59, %v960_v55  ;;  %v1427_v55 = vld [vmem:[#allocation5 + $0x240] sm:$0xff]  ;;  %v1444_v57 = vld [vmem:[#allocation5 + $0x2c8] sm:$0xff] }
 0x139   : > { %8724 = vmatmul.mubr.msk.f32.vlgmr.msra.gmra.mrb[0].mxu0 %vm464_vm6, %v412_v56  ;;  %v1436_v56 = vld [vmem:[#allocation5 + $0x288] sm:$0xff] }
 0x13a   : > { %8726 = vmatpush1.msk.msra.mxu0 %vm468_vm5, %v9627_v12  ;;  %935 = vmatprep.mubr.f32.mxu0 %v9474_v1  ;;  %v1061_v60 = vpop.permute.xlu1 %1060  ;;  %v1063_v61 = vpop.permute.xlu0 %1062  ;;  %v8981_v59 = vpack.c.bf16 %v1444_v57, %v1436_v56  ;;  %v1580_v56 = vld [vmem:[#allocation5 + $0x708] sm:$0xff] }
 0x13b   : > { %8728 = vmatprep.subr.msk.mxu0 %vm468_vm5, %v964_v58  ;;  %v1065_v0 = vsel %vm660_vm1, %v1061_v60, %v1063_v61  ;;  %v8979_v58 = vpack.c.bf16 %v1427_v55, %v1419_v54  ;;  %v1443_v61 = vld [vmem:[#allocation5 + $0x2c0] sm:$0xff]  ;;  %v1588_v57 = vld [vmem:[#allocation5 + $0x748] sm:$0xff] }
 0x13c   : > { %v1563_v54 = vld [vmem:[#allocation5 + $0x680] sm:$0xff] }
 0x13d   : > { %v1571_v55 = vld [vmem:[#allocation5 + $0x6c0] sm:$0xff] }
 0x13e   : > { %v1154_v7 = vpop.permute.xlu0 %1153  ;;  %v1059_v12 = vpop.permute.xlu1 %1058 }
 0x13f   : > { %v1064_v9 = vsel %vm660_vm1, %v1059_v12, %v1061_v60  ;;  %v1435_v60 = vld [vmem:[#allocation5 + $0x280] sm:$0xff]  ;;  %vm7161_vm1 = vcmask 785408  }
 0x140   : > { %v1451_v12 = vld [vmem:[#allocation5 + $0x300] sm:$0xff] }
 0x141   : > { %8727 = vmatmul.mubr.msk.f32.vlgmr.msra.gmra.mrb[0].mxu0 %vm464_vm6, %v413_v62  ;;  %v1452_v62 = vld [vmem:[#allocation5 + $0x308] sm:$0xff] }
 0x142   : > { %8729 = vmatpush1.msk.msra.mxu0 %vm468_vm5, %v963_v63  ;;  %1036 = vmatprep.mubr.f32.mxu0 %v9474_v1  ;;  %v1156_v10 = vpop.permute.xlu1 %1155  ;;  %v1152_v11 = vpop.permute.xlu0 %1151  ;;  %v1460_v63 = vld [vmem:[#allocation5 + $0x348] sm:$0xff] }
 0x143   : > { %8731 = vmatprep.subr.msk.mxu0 %vm468_vm5, %v1065_v0  ;;  %v1159_v13 = vsel %vm1157_vm9, %v1154_v7, %v1156_v10  ;;  %v1158_v18 = vsel %vm1157_vm9, %v1152_v11, %v1154_v7  ;;  %v8983_v0 = vpack.c.bf16 %v1443_v61, %v1435_v60  ;;  %v8985_v7 = vpack.c.bf16 %v1460_v63, %v1452_v62  ;;  %v1476_v10 = vld [vmem:[#allocation5 + $0x3c8] sm:$0xff]  ;;  %v1579_v60 = vld [vmem:[#allocation5 + $0x700] sm:$0xff] }
 0x144   : > { %v1587_v61 = vld [vmem:[#allocation5 + $0x740] sm:$0xff]  ;;  %v1596_v63 = vld [vmem:[#allocation5 + $0x788] sm:$0xff] }
 0x145   : > { %v9019_v62 = vpack.c.bf16 %v1587_v61, %v1579_v60  ;;  %v1357_v60 = vld [vmem:[#allocation5 + $0x10] sm:$0xff] }
 0x146   : > { %v1258_v14 = vpop.permute.xlu0 %1257  ;;  %v1256_v17 = vpop.permute.xlu1 %1255  ;;  %v1365_v61 = vld [vmem:[#allocation5 + $0x50] sm:$0xff] }
 0x147   : > { %v1260_v19 = vsel %vm446_vm0, %v1256_v17, %v1258_v14  ;;  %v1467_v14 = vld [vmem:[#allocation5 + $0x380] sm:$0xff] }
 0x149   : > { %8730 = vmatmul.mubr.msk.f32.vlgmr.msra.gmra.mrb[0].mxu0 %vm464_vm6, %v414_v8  ;;  %v1459_v8 = vld [vmem:[#allocation5 + $0x340] sm:$0xff] }
 0x14a   : > { %8732 = vmatpush1.msk.msra.mxu0 %vm468_vm5, %v1064_v9  ;;  %1137 = vmatprep.mubr.f32.mxu0 %v9474_v1  ;;  %v1254_v20 = vpop.permute.xlu1 %1253  ;;  %v1468_v9 = vld [vmem:[#allocation5 + $0x388] sm:$0xff]  ;;  %v8987_v11 = vpack.c.bf16 %v1459_v8, %v1451_v12  ;;  %v1595_v12 = vld [vmem:[#allocation5 + $0x780] sm:$0xff] }
 0x14b   : > { %8734 = vmatprep.subr.msk.mxu0 %vm468_vm5, %v1159_v13  ;;  %v1259_v25 = vsel %vm446_vm0, %v1254_v20, %v1256_v17  ;;  %v8989_v13 = vpack.c.bf16 %v1476_v10, %v1468_v9  ;;  %v1484_v17 = vld [vmem:[#allocation5 + $0x408] sm:$0xff]  ;;  %v1603_v8 = vld [vmem:[#allocation5 + $0x7c0] sm:$0xff]  ;;  %v1358_v10 = vld [vmem:[#allocation5 + $0x18] sm:$0xff]  ;;  %vm3604_vm0 = vcmask 252928  }
 0x14c   : > { %v9023_v9 = vpack.c.bf16 %v1603_v8, %v1595_v12  ;;  %v9027_v12 = vpack.c.bf16 %v1365_v61, %v1357_v60  ;;  %v1453_v61 = vld [vmem:[#allocation5 + $0x310] sm:$0xff] }
 0x151   : > { %8733 = vmatmul.mubr.msk.f32.vlgmr.msra.gmra.mrb[0].mxu0 %vm464_vm6, %v415_v15  ;;  %v1475_v15 = vld [vmem:[#allocation5 + $0x3c0] sm:$0xff] }
 0x152   : > { %8735 = vmatpush1.msk.msra.mxu0 %vm468_vm5, %v1158_v18  ;;  %1231 = vmatprep.mubr.f32.mxu0 %v9474_v1  ;;  %v1492_v18 = vld [vmem:[#allocation5 + $0x448] sm:$0xff] }
 0x153   : > { %8737 = vmatprep.subr.msk.mxu0 %vm468_vm5, %v1260_v19  ;;  %v8991_v19 = vpack.c.bf16 %v1475_v15, %v1467_v14  ;;  %v8993_v20 = vpack.c.bf16 %v1492_v18, %v1484_v17  ;;  %v2034_v14 = vpop.permute.xlu1 %2033  ;;  %v401_v15 = vld [vmem:[%s9808_s24] sm:$0xff]  ;;  %v402_v17 = vld [vmem:[%s9808_s24 + $0x8] sm:$0xff] }
 0x154   : > { %v2041_v18 = vrot.slane %v2034_v14, 4  ;;  %405 = vst [vmem:[#allocation4 + $0x4] sm:$0xff] %v401_v15  ;;  %406 = vst [vmem:[#allocation4 + $0xc] sm:$0xff] %v402_v17  ;;  %v1398_v15 = vld [vmem:[#allocation5 + $0x158] sm:$0xff] }
 0x159   : > { %8736 = vmatmul.mubr.msk.f32.vlgmr.msra.gmra.mrb[0].mxu0 %vm464_vm6, %v416_v24  ;;  %v1500_v24 = vld [vmem:[#allocation5 + $0x488] sm:$0xff] }
 0x15a   : > { %8738 = vmatpush1.msk.msra.mxu0 %vm468_vm5, %v1259_v25  ;;  %1332 = vmatprep.mubr.f32.mxu0 %v9474_v1  ;;  %v1508_v25 = vld [vmem:[#allocation5 + $0x4c8] sm:$0xff] }
 0x15b   : > { %8962 = vmatprep.subr.bf16.mxu0 %v8961_v26  ;;  %v8995_v26 = vpack.c.bf16 %v1491_v22, %v1483_v21  ;;  %v8997_v27 = vpack.c.bf16 %v1508_v25, %v1500_v24  ;;  %v2036_v21 = vpop.permute.xlu1 %2035 }
 0x15c   : > { %v2042_v22 = vrot.slane %v2036_v21, 4 }
 0x161   : > { %8739 = vmatmul.mubr.msk.f32.vlgmr.msra.gmra.mrb[0].mxu0 %vm464_vm6, %v417_v33  ;;  %v1524_v33 = vld [vmem:[#allocation5 + $0x548] sm:$0xff] }
 0x162   : > { %8964 = vmatpush1.bf16.msra.mxu0 %v8963_v35  ;;  %v8999_v35 = vpack.c.bf16 %v1507_v31, %v1499_v30  ;;  %v1345_v30 = vpop.permute.xlu0 %1344 }
 0x163   : > { %8966 = vmatprep.subr.bf16.mxu0 %v8965_v36  ;;  %v9001_v36 = vpack.c.bf16 %v1524_v33, %v1516_v32  ;;  %v1943_v32 = vld [vmem:[#allocation4 + $0x8] sm:$0xff]  ;;  %v403_v33 = vld [vmem:[%s9808_s24 + $0x10] sm:$0xff] }
 0x164   : > { %407 = vst [vmem:[#allocation4 + $0x14] sm:$0xff] %v403_v33  ;;  %v1430_v33 = vld [vmem:[#allocation5 + $0x258] sm:$0xff] }
 0x166   : > { %8968 = vmatpush1.bf16.msra.mxu0 %v8967_v41  ;;  %v9003_v41 = vpack.c.bf16 %v1523_v38, %v1515_v37  ;;  %v9833_v37 = vpop.permute.xlu0 %2037 }
 0x167   : > { %8970 = vmatprep.subr.bf16.mxu0 %v8969_v42  ;;  %v9005_v42 = vpack.c.bf16 %v1540_v40, %v1532_v4  ;;  %v2043_v38 = vrot.slane %v9833_v37, 4  ;;  %v9838_v4 = vld [vmem:[#allocation4] sm:$0xff] }
 0x169   : > { %v2049_v40 = vsel %vm468_vm5, %v2042_v22, %v2043_v38 }
 0x16a   : > { %8972 = vmatpush1.bf16.msra.mxu0 %v8971_v46  ;;  %v9007_v46 = vpack.c.bf16 %v1539_v44, %v1531_v43  ;;  %v3468_v43 = vsub.s32 5, %v9598_v2  ;;  %v3472_v44 = vsub.s32 7, %v9598_v2  ;;  %v3481_v2 = vrot.slane %v9713_v29, %v9611_v6 }
 0x16b   : > { %8974 = vmatprep.subr.bf16.mxu0 %v8973_v47  ;;  %v9009_v47 = vpack.c.bf16 %v1556_v3, %v1548_v45  ;;  %v1944_v45 = vld [vmem:[#allocation4 + $0x10] sm:$0xff]  ;;  %v404_v3 = vld [vmem:[%s9808_s24 + $0x18] sm:$0xff] }
 0x16c   : > { %408 = vst [vmem:[#allocation4 + $0x1c] sm:$0xff] %v404_v3  ;;  %v1421_v3 = vld [vmem:[#allocation5 + $0x210] sm:$0xff] }
 0x16e   : > { %8976 = vmatpush1.bf16.msra.mxu0 %v8975_v52  ;;  %v9011_v52 = vpack.c.bf16 %v1555_v49, %v1547_v48  ;;  %v3489_v48 = vrot.slane %v9713_v29, %v3472_v44 }
 0x16f   : > { %8978 = vmatprep.subr.bf16.mxu0 %v8977_v53  ;;  %v9013_v53 = vpack.c.bf16 %v1572_v51, %v1564_v50 }
 0x170   : > { %v3529_v50 = vrot.slane %v3489_v48, %v9608_v5  ;;  %v1438_v48 = vld [vmem:[#allocation5 + $0x298] sm:$0xff] }
 0x172   : > { %8980 = vmatpush1.bf16.msra.mxu0 %v8979_v58  ;;  %v9015_v58 = vpack.c.bf16 %v1571_v55, %v1563_v54 }
 0x173   : > { %8982 = vmatprep.subr.bf16.mxu0 %v8981_v59  ;;  %v9017_v59 = vpack.c.bf16 %v1588_v57, %v1580_v56  ;;  %v1946_v54 = vld [vmem:[#allocation4 + $0x20] sm:$0xf] }
 0x176   : > { %8984 = vmatpush1.bf16.msra.mxu0 %v8983_v0  ;;  %v1604_v0 = vld [vmem:[#allocation5 + $0x7c8] sm:$0xff] }
 0x177   : > { %8986 = vmatprep.subr.bf16.mxu0 %v8985_v7  ;;  %v9021_v7 = vpack.c.bf16 %v1604_v0, %v1596_v63  ;;  %v1374_v63 = vld [vmem:[#allocation5 + $0x98] sm:$0xff] }
 0x178   : > { %v1382_v0 = vld [vmem:[#allocation5 + $0xd8] sm:$0xff] }
 0x17a   : > { %8988 = vmatpush1.bf16.msra.mxu0 %v8987_v11  ;;  %v1366_v11 = vld [vmem:[#allocation5 + $0x58] sm:$0xff] }
 0x17b   : > { %8990 = vmatprep.subr.bf16.mxu0 %v8989_v13  ;;  %v9025_v13 = vpack.c.bf16 %v1366_v11, %v1358_v10  ;;  %v1373_v10 = vld [vmem:[#allocation5 + $0x90] sm:$0xff] }
 0x17c   : > { %v1381_v11 = vld [vmem:[#allocation5 + $0xd0] sm:$0xff] }
 0x17d   : > { %v9031_v17 = vpack.c.bf16 %v1381_v11, %v1373_v10  ;;  %v1477_v10 = vld [vmem:[#allocation5 + $0x3d0] sm:$0xff]  ;;  %v3469_v11 = vrot.slane %v9688_v16, %v3468_v43 }
 0x17e   : > { %8992 = vmatpush1.bf16.msra.mxu0 %v8991_v19  ;;  %v3461_v19 = vrot.slane %v9688_v16, %v9608_v5 }
 0x17f   : > { %8994 = vmatprep.subr.bf16.mxu0 %v8993_v20  ;;  %v3465_v20 = vrot.slane %v9688_v16, %v9611_v6  ;;  %v1509_v6 = vld [vmem:[#allocation5 + $0x4d0] sm:$0xff] }
 0x180   : > { %v3501_v24 = vrot.slane %v3461_v19, %v9608_v5  ;;  %v1389_v19 = vld [vmem:[#allocation5 + $0x110] sm:$0xff] }
 0x181   : > { %v3505_v25 = vrot.slane %v3465_v20, %v9608_v5  ;;  %v1397_v20 = vld [vmem:[#allocation5 + $0x150] sm:$0xff] }
 0x182   : > { %8996 = vmatpush1.bf16.msra.mxu0 %v8995_v26  ;;  %v2047_v26 = vsel %vm468_vm5, %v2041_v18, %v2042_v22  ;;  %v1414_v22 = vld [vmem:[#allocation5 + $0x1d8] sm:$0xff] }
 0x183   : > { %8998 = vmatprep.subr.bf16.mxu0 %v8997_v27  ;;  %v9819_v27 = vcombine.low %v3501_v24, %v3505_v25  ;;  %v9822_v31 = vsel %vm2045_vm10, %v2047_v26, %v2036_v21  ;;  %v1406_v21 = vld [vmem:[#allocation5 + $0x198] sm:$0xff]  ;;  %v9035_v24 = vpack.c.bf16 %v1397_v20, %v1389_v19  ;;  %v1405_v26 = vld [vmem:[#allocation5 + $0x190] sm:$0xff] }
 0x184   : > { %v9037_v25 = vpack.c.bf16 %v1414_v22, %v1406_v21  ;;  %v1485_v22 = vld [vmem:[#allocation5 + $0x410] sm:$0xff] }
 0x185   : > { %3542 = vrot.lane.b32.xlu0 %v9819_v27, %s9485_s25 }
 0x186   : > { %9000 = vmatpush1.bf16.msra.mxu0 %v8999_v35  ;;  %v9828_v35 = vmul.f32 %v9822_v31, %v1943_v32  ;;  %v1422_v32 = vld [vmem:[#allocation5 + $0x218] sm:$0xff] }
 0x187   : > { %9002 = vmatprep.subr.bf16.mxu0 %v9001_v36  ;;  %v9831_v36 = vsel %vm2045_vm10, %v2041_v18, %v2034_v14  ;;  %v1390_v14 = vld [vmem:[#allocation5 + $0x118] sm:$0xff] }
 0x188   : > { %v9033_v18 = vpack.c.bf16 %v1398_v15, %v1390_v14  ;;  %v3473_v14 = vrot.slane %v9688_v16, %v3472_v44  ;;  %v1486_v15 = vld [vmem:[#allocation5 + $0x418] sm:$0xff] }
 0x189   : > { %2081 = vrot.lane.b32.xlu0 %v9828_v35, %s9486_s26  ;;  %v1502_v16 = vld [vmem:[#allocation5 + $0x498] sm:$0xff] }
 0x18a   : > { %9004 = vmatpush1.bf16.msra.mxu0 %v9003_v41  ;;  %v9845_v41 = vmul.f32 %v9831_v36, %v9838_v4  ;;  %v3513_v19 = vrot.slane %v3473_v14, %v9608_v5  ;;  %v1510_v44 = vld [vmem:[#allocation5 + $0x4d8] sm:$0xff]  ;;  %v1565_v14 = vld [vmem:[#allocation5 + $0x690] sm:$0xff] }
 0x18b   : > { %9006 = vmatprep.subr.bf16.mxu0 %v9005_v42  ;;  %v9849_v42 = vsel %vm2045_vm10, %v2049_v40, %v9833_v37 }
 0x18d   : > { %2077 = vrot.lane.b32.xlu0 %v9845_v41, %s9486_s26 }
 0x18e   : > { %9008 = vmatpush1.bf16.msra.mxu0 %v9007_v46  ;;  %v9857_v46 = vmul.f32 %v9849_v42, %v1944_v45  ;;  %v9041_v45 = vpack.c.bf16 %v1430_v33, %v1422_v32  ;;  %v3521_v32 = vrot.slane %v3481_v2, %v9608_v5 }
 0x18f   : > { %9010 = vmatprep.subr.bf16.mxu0 %v9009_v47  ;;  %v3485_v47 = vrot.slane %v9713_v29, %v3468_v43  ;;  %v3477_v43 = vrot.slane %v9713_v29, %v9608_v5 }
 0x191   : > { %2085 = vrot.lane.b32.xlu0 %v9857_v46, %s9486_s26  ;;  %v3525_v49 = vrot.slane %v3485_v47, %v9608_v5  ;;  %v1429_v47 = vld [vmem:[#allocation5 + $0x250] sm:$0xff] }
 0x192   : > { %9012 = vmatpush1.bf16.msra.mxu0 %v9011_v52  ;;  %v9871_v52 = vpop.permute.xlu1 %2039 }
 0x193   : > { %9014 = vmatprep.subr.bf16.mxu0 %v9013_v53  ;;  %v9869_v51 = vcombine.low %v3525_v49, %v3529_v50  ;;  %v9874_v53 = vrot.slane %v9871_v52, 4  ;;  %v1446_v49 = vld [vmem:[#allocation5 + $0x2d8] sm:$0xff]  ;;  %v9043_v50 = vpack.c.bf16 %v1429_v47, %v1421_v3 }
 0x194   : > { %v1518_v3 = vld [vmem:[#allocation5 + $0x518] sm:$0xff] }
 0x195   : > { %3548 = vrot.lane.b32.xlu0 %v9869_v51, %s9485_s25  ;;  %v2067_v55 = vmul.f32 %v9874_v53, %v1946_v54  ;;  %v9045_v54 = vpack.c.bf16 %v1446_v49, %v1438_v48  ;;  %v1526_v47 = vld [vmem:[#allocation5 + $0x558] sm:$0xff]  ;;  %v1517_v49 = vld [vmem:[#allocation5 + $0x510] sm:$0xff] }
 0x196   : > { %9016 = vmatpush1.bf16.msra.mxu0 %v9015_v58  ;;  %v9065_v48 = vpack.c.bf16 %v1526_v47, %v1518_v3  ;;  %v1376_v3 = vld [vmem:[#allocation5 + $0xa8] sm:$0xff] }
 0x197   : > { %9018 = vmatprep.subr.bf16.mxu0 %v9017_v59  ;;  %v1384_v47 = vld [vmem:[#allocation5 + $0xe8] sm:$0xff] }
 0x199   : > { %2093 = vrot.lane.b32.xlu0 %v2067_v55, %s9486_s26  ;;  %v1437_v55 = vld [vmem:[#allocation5 + $0x290] sm:$0xff] }
 0x19a   : > { %9020 = vmatpush1.bf16.msra.mxu0 %v9019_v62 }
 0x19b   : > { %9022 = vmatprep.subr.bf16.mxu0 %v9021_v7 }
 0x19d   : > { %4280 = vrot.lane.b32.xlu0 %v9698_v23, %s9476_s20 }
 0x19e   : > { %9024 = vmatpush1.bf16.msra.mxu0 %v9023_v9  ;;  %v9029_v9 = vpack.c.bf16 %v1382_v0, %v1374_v63  ;;  %v1470_v63 = vld [vmem:[#allocation5 + $0x398] sm:$0xff] }
 0x19f   : > { %9026 = vmatprep.subr.bf16.mxu0 %v9025_v13  ;;  %v1478_v0 = vld [vmem:[#allocation5 + $0x3d8] sm:$0xff] }
 0x1a1   : > { %4286 = vrot.lane.b32.xlu0 %v9729_v39, %s9476_s20 }
 0x234   : > { %v1334_v56 = vpop.f32.mrb[0].mxu0 }
 0x235   : > { %v1347_v57 = vadd.f32 %v1345_v30, %v1334_v56  ;;  %v1336_v58 = vpop.f32.mrb[1].mxu0  ;;  %v1445_v56 = vld [vmem:[#allocation5 + $0x2d0] sm:$0xff] }
 0x236   : > { %v1348_v59 = vadd.f32 %v1345_v30, %v1336_v58  ;;  %v1413_v30 = vld [vmem:[#allocation5 + $0x1d0] sm:$0xff]  ;;  %v1462_v58 = vld [vmem:[#allocation5 + $0x358] sm:$0xff] }
 0x237   : > { %v1351_v62 = vmul.f32 0.1, %v1347_v57  ;;  %vm1349_vm11 = vcmp.gt.f32.partialorder %v1347_v57, 0.0  ;;  %v9039_v40 = vpack.c.bf16 %v1413_v30, %v1405_v26  ;;  %v2051_v26 = vsel %vm468_vm5, %v2043_v38, %v9874_v53 }
 0x238   : > { %vm1350_vm12 = vcmp.gt.f32.partialorder %v1348_v59, 0.0  ;;  %v1352_v7 = vmul.f32 0.1, %v1348_v59  ;;  %v3517_v30 = vrot.slane %v3477_v43, %v9608_v5  ;;  %v9917_v37 = vsel %vm2045_vm10, %v2051_v26, %v9871_v52  ;;  %v1606_v43 = vld [vmem:[#allocation5 + $0x7d8] sm:$0xff]  ;;  %v1605_v26 = vld [vmem:[#allocation5 + $0x7d0] sm:$0xff] }
 0x239   : > { %v9887_v13 = vsel %vm1349_vm11, %v1347_v57, %v1351_v62  ;;  %v1454_v57 = vld [vmem:[#allocation5 + $0x318] sm:$0xff]  ;;  %v1461_v62 = vld [vmem:[#allocation5 + $0x350] sm:$0xff] }
 0x23a   : > { %v9884_v8 = vsel %vm1350_vm12, %v1348_v59, %v1352_v7  ;;  %v9047_v59 = vpack.c.bf16 %v1445_v56, %v1437_v55  ;;  %v9049_v60 = vpack.c.bf16 %v1462_v58, %v1454_v57  ;;  %v9051_v7 = vpack.c.bf16 %v1461_v62, %v1453_v61  ;;  %v1534_v55 = vld [vmem:[#allocation5 + $0x598] sm:$0xff]  ;;  %v1533_v58 = vld [vmem:[#allocation5 + $0x590] sm:$0xff] }
 0x23b   : > { %1675 = vmatprep.mubr.f32.mxu0 %v9884_v8  ;;  %v9913_v29 = vcombine.low %v3517_v30, %v3521_v32  ;;  %v1542_v56 = vld [vmem:[#allocation5 + $0x5d8] sm:$0xff]  ;;  %v1360_v30 = vld [vmem:[#allocation5 + $0x28] sm:$0xff] }
 0x23c   : > { %1676 = vmatmul.mubr.f32.vlgmr.msra.gmra.mrb[2].mxu0 %v9887_v13  ;;  %v9069_v57 = vpack.c.bf16 %v1542_v56, %v1534_v55  ;;  %v1558_v61 = vld [vmem:[#allocation5 + $0x658] sm:$0xff]  ;;  %v1368_v32 = vld [vmem:[#allocation5 + $0x68] sm:$0xff] }
 0x23d   : > { %9028 = vmatpush1.bf16.msra.mxu0 %v9027_v12  ;;  %1746 = vmatprep.mubr.f32.mxu0 %v9884_v8  ;;  %v9053_v12 = vpack.c.bf16 %v1478_v0, %v1470_v63  ;;  %v1549_v0 = vld [vmem:[#allocation5 + $0x610] sm:$0xff]  ;;  %v1392_v55 = vld [vmem:[#allocation5 + $0x128] sm:$0xff] }
 0x23e   : > { %9030 = vmatprep.subr.bf16.mxu0 %v9029_v9  ;;  %v1469_v9 = vld [vmem:[#allocation5 + $0x390] sm:$0xff]  ;;  %v1400_v56 = vld [vmem:[#allocation5 + $0x168] sm:$0xff] }
 0x23f   : > { %v9055_v20 = vpack.c.bf16 %v1477_v10, %v1469_v9  ;;  %v1574_v9 = vld [vmem:[#allocation5 + $0x6d8] sm:$0xff] }
 0x241   : > { %9032 = vmatpush1.bf16.msra.mxu0 %v9031_v17  ;;  %v1494_v17 = vld [vmem:[#allocation5 + $0x458] sm:$0xff] }
 0x242   : > { %9034 = vmatprep.subr.bf16.mxu0 %v9033_v18  ;;  %v3509_v18 = vrot.slane %v3469_v11, %v9608_v5  ;;  %v9057_v21 = vpack.c.bf16 %v1494_v17, %v1486_v15  ;;  %v9921_v5 = vld [vmem:[#allocation4 + $0x18] sm:$0xff]  ;;  %v1582_v17 = vld [vmem:[#allocation5 + $0x718] sm:$0xff] }
 0x243   : > { %v1573_v15 = vld [vmem:[#allocation5 + $0x6d0] sm:$0xff] }
 0x245   : > { %9036 = vmatpush1.bf16.msra.mxu0 %v9035_v24  ;;  %v1493_v24 = vld [vmem:[#allocation5 + $0x450] sm:$0xff] }
 0x246   : > { %9038 = vmatprep.subr.bf16.mxu0 %v9037_v25  ;;  %v9899_v25 = vcombine.low %v3509_v18, %v3513_v19  ;;  %v9059_v33 = vpack.c.bf16 %v1493_v24, %v1485_v22  ;;  %v1590_v18 = vld [vmem:[#allocation5 + $0x758] sm:$0xff]  ;;  %v9079_v19 = vpack.c.bf16 %v1573_v15, %v1565_v14  ;;  %v1589_v22 = vld [vmem:[#allocation5 + $0x750] sm:$0xff]  ;;  %v1423_v14 = vld [vmem:[#allocation5 + $0x220] sm:$0xff] }
 0x247   : > { %v1598_v24 = vld [vmem:[#allocation5 + $0x798] sm:$0xff]  ;;  %v1431_v15 = vld [vmem:[#allocation5 + $0x260] sm:$0xff] }
 0x248   : > { %3544 = vrot.lane.b32.xlu1 %v9899_v25, %s9485_s25 }
 0x249   : > { %9040 = vmatpush1.bf16.msra.mxu0 %v9039_v40  ;;  %v9061_v40 = vpack.c.bf16 %v1510_v44, %v1502_v16  ;;  %v9085_v16 = vpack.c.bf16 %v1606_v43, %v1598_v24  ;;  %v1597_v44 = vld [vmem:[#allocation5 + $0x790] sm:$0xff]  ;;  %v1456_v24 = vld [vmem:[#allocation5 + $0x328] sm:$0xff] }
 0x24a   : > { %9042 = vmatprep.subr.bf16.mxu0 %v9041_v45  ;;  %v1501_v45 = vld [vmem:[#allocation5 + $0x490] sm:$0xff]  ;;  %v1464_v43 = vld [vmem:[#allocation5 + $0x368] sm:$0xff] }
 0x24b   : > { %v9063_v38 = vpack.c.bf16 %v1509_v6, %v1501_v45  ;;  %v1359_v45 = vld [vmem:[#allocation5 + $0x20] sm:$0xff] }
 0x24c   : > { %3546 = vrot.lane.b32.xlu1 %v9913_v29, %s9485_s25  ;;  %v1367_v6 = vld [vmem:[#allocation5 + $0x60] sm:$0xff] }
 0x24d   : > { %9044 = vmatpush1.bf16.msra.mxu0 %v9043_v50  ;;  %v1525_v50 = vld [vmem:[#allocation5 + $0x550] sm:$0xff] }
 0x24e   : > { %9046 = vmatprep.subr.bf16.mxu0 %v9045_v54  ;;  %v9925_v54 = vmul.f32 %v9917_v37, %v9921_v5  ;;  %v9067_v52 = vpack.c.bf16 %v1525_v50, %v1517_v49  ;;  %v1375_v49 = vld [vmem:[#allocation5 + $0xa0] sm:$0xff] }
 0x24f   : > { %v1383_v50 = vld [vmem:[#allocation5 + $0xe0] sm:$0xff] }
 0x250   : > { %2089 = vrot.lane.b32.xlu1 %v9925_v54, %s9486_s26 }
 0x251   : > { %9048 = vmatpush1.bf16.msra.mxu0 %v9047_v59  ;;  %v1541_v59 = vld [vmem:[#allocation5 + $0x5d0] sm:$0xff] }
 0x252   : > { %9050 = vmatprep.subr.bf16.mxu0 %v9049_v60  ;;  %v1550_v60 = vld [vmem:[#allocation5 + $0x618] sm:$0xff]  ;;  %v9071_v62 = vpack.c.bf16 %v1541_v59, %v1533_v58  ;;  %v9097_v58 = vpack.c.bf16 %v1400_v56, %v1392_v55  ;;  %v1391_v59 = vld [vmem:[#allocation5 + $0x120] sm:$0xff] }
 0x253   : > { %v9073_v63 = vpack.c.bf16 %v1558_v61, %v1550_v60  ;;  %v1399_v60 = vld [vmem:[#allocation5 + $0x160] sm:$0xff]  ;;  %v1408_v61 = vld [vmem:[#allocation5 + $0x1a8] sm:$0xff] }
 0x254   : > { %4282 = vrot.lane.b32.xlu1 %v9706_v28, %s9476_s20  ;;  %v1487_v55 = vld [vmem:[#allocation5 + $0x420] sm:$0xff] }
 0x255   : > { %9052 = vmatpush1.bf16.msra.mxu0 %v9051_v7  ;;  %v1557_v7 = vld [vmem:[#allocation5 + $0x650] sm:$0xff]  ;;  %v1495_v56 = vld [vmem:[#allocation5 + $0x460] sm:$0xff] }
 0x256   : > { %9054 = vmatprep.subr.bf16.mxu0 %v9053_v12  ;;  %v1566_v12 = vld [vmem:[#allocation5 + $0x698] sm:$0xff]  ;;  %v9075_v10 = vpack.c.bf16 %v1557_v7, %v1549_v0  ;;  %v1407_v7 = vld [vmem:[#allocation5 + $0x1a0] sm:$0xff] }
 0x257   : > { %v9077_v11 = vpack.c.bf16 %v1574_v9, %v1566_v12  ;;  %v1415_v12 = vld [vmem:[#allocation5 + $0x1e0] sm:$0xff]  ;;  %v1432_v9 = vld [vmem:[#allocation5 + $0x268] sm:$0xff] }
 0x258   : > { %4284 = vrot.lane.b32.xlu1 %v9721_v34, %s9476_s20 }
 0x259   : > { %9056 = vmatpush1.bf16.msra.mxu0 %v9055_v20  ;;  %v9081_v20 = vpack.c.bf16 %v1590_v18, %v1582_v17  ;;  %v1440_v17 = vld [vmem:[#allocation5 + $0x2a8] sm:$0xff] }
 0x25a   : > { %9058 = vmatprep.subr.bf16.mxu0 %v9057_v21  ;;  %v1581_v21 = vld [vmem:[#allocation5 + $0x710] sm:$0xff]  ;;  %v1448_v18 = vld [vmem:[#allocation5 + $0x2e8] sm:$0xff] }
 0x25b   : > { %v9083_v2 = vpack.c.bf16 %v1589_v22, %v1581_v21  ;;  %v1439_v21 = vld [vmem:[#allocation5 + $0x2a0] sm:$0xff] }
 0x25c   : > { %v1447_v22 = vld [vmem:[#allocation5 + $0x2e0] sm:$0xff] }
 0x25d   : > { %9060 = vmatpush1.bf16.msra.mxu0 %v9059_v33  ;;  %v9087_v33 = vpack.c.bf16 %v1605_v26, %v1597_v44  ;;  %v1455_v44 = vld [vmem:[#allocation5 + $0x320] sm:$0xff] }
 0x25e   : > { %9062 = vmatprep.subr.bf16.mxu0 %v9061_v40  ;;  %v9089_v40 = vpack.c.bf16 %v1368_v32, %v1360_v30  ;;  %v1463_v26 = vld [vmem:[#allocation5 + $0x360] sm:$0xff]  ;;  %v1472_v30 = vld [vmem:[#allocation5 + $0x3a8] sm:$0xff] }
 0x25f   : > { %v1480_v32 = vld [vmem:[#allocation5 + $0x3e8] sm:$0xff] }
 0x261   : > { %9064 = vmatpush1.bf16.msra.mxu0 %v9063_v38  ;;  %v9091_v38 = vpack.c.bf16 %v1367_v6, %v1359_v45  ;;  %v9117_v45 = vpack.c.bf16 %v1480_v32, %v1472_v30  ;;  %v1471_v6 = vld [vmem:[#allocation5 + $0x3a0] sm:$0xff]  ;;  %v1592_v30 = vld [vmem:[#allocation5 + $0x768] sm:$0xff] }
 0x262   : > { %9066 = vmatprep.subr.bf16.mxu0 %v9065_v48  ;;  %v9093_v48 = vpack.c.bf16 %v1384_v47, %v1376_v3  ;;  %v1479_v3 = vld [vmem:[#allocation5 + $0x3e0] sm:$0xff]  ;;  %v1488_v47 = vld [vmem:[#allocation5 + $0x428] sm:$0xff] }
 0x265   : > { %9068 = vmatpush1.bf16.msra.mxu0 %v9067_v52  ;;  %v3107_v52 = vcombine.high %v9838_v4, %v9838_v4  ;;  %v1424_v4 = vld [vmem:[#allocation5 + $0x228] sm:$0xff] }
 0x266   : > { %9070 = vmatprep.subr.bf16.mxu0 %v9069_v57  ;;  %v9095_v57 = vpack.c.bf16 %v1383_v50, %v1375_v49  ;;  %v2075_v49 = vcombine.high %v9857_v46, %v9857_v46  ;;  %v9119_v50 = vpack.c.bf16 %v1479_v3, %v1471_v6  ;;  %v1503_v46 = vld [vmem:[#allocation5 + $0x4a0] sm:$0xff]  ;;  %v1600_v6 = vld [vmem:[#allocation5 + $0x7a8] sm:$0xff] }
 0x267   : > { %3113 = vrot.lane.b32.xlu1 %v3107_v52, %s9487_s27  ;;  %v1504_v52 = vld [vmem:[#allocation5 + $0x4a8] sm:$0xff] }
 0x268   : > { %2087 = vrot.lane.b32.xlu0 %v2075_v49, %s9486_s26  ;;  %v1608_v3 = vld [vmem:[#allocation5 + $0x7e8] sm:$0xff]  ;;  %v1607_v49 = vld [vmem:[#allocation5 + $0x7e0] sm:$0xff] }
 0x269   : > { %9072 = vmatpush1.bf16.msra.mxu0 %v9071_v62  ;;  %v1416_v62 = vld [vmem:[#allocation5 + $0x1e8] sm:$0xff] }
 0x26a   : > { %9074 = vmatprep.subr.bf16.mxu0 %v9073_v63  ;;  %v9099_v63 = vpack.c.bf16 %v1399_v60, %v1391_v59  ;;  %v9101_v0 = vpack.c.bf16 %v1416_v62, %v1408_v61  ;;  %v1511_v60 = vld [vmem:[#allocation5 + $0x4e0] sm:$0xff]  ;;  %v1520_v61 = vld [vmem:[#allocation5 + $0x528] sm:$0xff] }
 0x26b   : > { %v1528_v62 = vld [vmem:[#allocation5 + $0x568] sm:$0xff] }
 0x26d   : > { %9076 = vmatpush1.bf16.msra.mxu0 %v9075_v10  ;;  %v9103_v10 = vpack.c.bf16 %v1415_v12, %v1407_v7  ;;  %v1519_v7 = vld [vmem:[#allocation5 + $0x520] sm:$0xff] }
 0x26e   : > { %9078 = vmatprep.subr.bf16.mxu0 %v9077_v11  ;;  %v9105_v11 = vpack.c.bf16 %v1432_v9, %v1424_v4  ;;  %v1527_v12 = vld [vmem:[#allocation5 + $0x560] sm:$0xff]  ;;  %v1536_v4 = vld [vmem:[#allocation5 + $0x5a8] sm:$0xff] }
 0x26f   : > { %v1544_v9 = vld [vmem:[#allocation5 + $0x5e8] sm:$0xff] }
 0x271   : > { %9080 = vmatpush1.bf16.msra.mxu0 %v9079_v19  ;;  %v9107_v19 = vpack.c.bf16 %v1431_v15, %v1423_v14  ;;  %v1543_v14 = vld [vmem:[#allocation5 + $0x5e0] sm:$0xff]  ;;  %v1552_v15 = vld [vmem:[#allocation5 + $0x628] sm:$0xff] }
 0x272   : > { %9082 = vmatprep.subr.bf16.mxu0 %v9081_v20  ;;  %v9109_v20 = vpack.c.bf16 %v1448_v18, %v1440_v17  ;;  %v1560_v17 = vld [vmem:[#allocation5 + $0x668] sm:$0xff] }
 0x275   : > { %9084 = vmatpush1.bf16.msra.mxu0 %v9083_v2  ;;  %v9111_v2 = vpack.c.bf16 %v1447_v22, %v1439_v21  ;;  %v1559_v21 = vld [vmem:[#allocation5 + $0x660] sm:$0xff]  ;;  %v1568_v22 = vld [vmem:[#allocation5 + $0x6a8] sm:$0xff] }
 0x276   : > { %9086 = vmatprep.subr.bf16.mxu0 %v9085_v16  ;;  %v9113_v16 = vpack.c.bf16 %v1464_v43, %v1456_v24  ;;  %v1576_v24 = vld [vmem:[#allocation5 + $0x6e8] sm:$0xff] }
 0x279   : > { %9088 = vmatpush1.bf16.msra.mxu0 %v9087_v33  ;;  %v2073_v33 = vcombine.high %v9845_v41, %v9845_v41 }
 0x27a   : > { %9090 = vmatprep.subr.bf16.mxu0 %v9089_v40  ;;  %v9115_v40 = vpack.c.bf16 %v1463_v26, %v1455_v44  ;;  %v1575_v44 = vld [vmem:[#allocation5 + $0x6e0] sm:$0xff]  ;;  %v1584_v26 = vld [vmem:[#allocation5 + $0x728] sm:$0xff] }
 0x27b   : > { %2079 = vrot.lane.b32.xlu1 %v2073_v33, %s9486_s26  ;;  %v9145_v33 = vpack.c.bf16 %v1592_v30, %v1584_v26  ;;  %v1458_v26 = vld [vmem:[#allocation5 + $0x338] sm:$0xff] }
 0x27c   : > { %1747 = vmatmul.mubr.f32.vlgmr.msra.gmra.mrb[4].mxu0 %v9887_v13  ;;  %v1466_v30 = vld [vmem:[#allocation5 + $0x378] sm:$0xff] }
 0x27d   : > { %9092 = vmatpush1.bf16.msra.mxu0 %v9091_v38  ;;  %1817 = vmatprep.mubr.f32.mxu0 %v9884_v8  ;;  %v1496_v38 = vld [vmem:[#allocation5 + $0x468] sm:$0xff] }
 0x27e   : > { %9094 = vmatprep.subr.bf16.mxu0 %v9093_v48  ;;  %v2074_v48 = vcombine.high %v9828_v35, %v9828_v35  ;;  %v9121_v41 = vpack.c.bf16 %v1496_v38, %v1488_v47  ;;  %v9123_v35 = vpack.c.bf16 %v1495_v56, %v1487_v55  ;;  %v9149_v38 = vpack.c.bf16 %v1608_v3, %v1600_v6  ;;  %v1474_v6 = vld [vmem:[#allocation5 + $0x3b8] sm:$0xff] }
 0x27f   : > { %v1482_v3 = vld [vmem:[#allocation5 + $0x3f8] sm:$0xff] }
 0x280   : > { %2083 = vrot.lane.b32.xlu1 %v2074_v48, %s9486_s26  ;;  %v1599_v48 = vld [vmem:[#allocation5 + $0x7a0] sm:$0xff] }
 0x281   : > { %9096 = vmatpush1.bf16.msra.mxu0 %v9095_v57  ;;  %v1512_v57 = vld [vmem:[#allocation5 + $0x4e8] sm:$0xff]  ;;  %v9151_v55 = vpack.c.bf16 %v1607_v49, %v1599_v48  ;;  %v1473_v48 = vld [vmem:[#allocation5 + $0x3b0] sm:$0xff] }
 0x282   : > { %9098 = vmatprep.subr.bf16.mxu0 %v9097_v58  ;;  %v2076_v58 = vcombine.high %v9925_v54, %v9925_v54  ;;  %v9125_v59 = vpack.c.bf16 %v1512_v57, %v1504_v52  ;;  %v9131_v54 = vpack.c.bf16 %v1527_v12, %v1519_v7  ;;  %v1361_v52 = vld [vmem:[#allocation5 + $0x30] sm:$0xff] }
 0x283   : > { %v1369_v57 = vld [vmem:[#allocation5 + $0x70] sm:$0xff] }
 0x284   : > { %2091 = vrot.lane.b32.xlu1 %v2076_v58, %s9486_s26  ;;  %v1378_v58 = vld [vmem:[#allocation5 + $0xb8] sm:$0xff]  ;;  %v1393_v12 = vld [vmem:[#allocation5 + $0x130] sm:$0xff] }
 0x285   : > { %9100 = vmatpush1.bf16.msra.mxu0 %v9099_v63  ;;  %v9127_v63 = vpack.c.bf16 %v1511_v60, %v1503_v46  ;;  %v1377_v60 = vld [vmem:[#allocation5 + $0xb0] sm:$0xff] }
 0x286   : > { %9102 = vmatprep.subr.bf16.mxu0 %v9101_v0  ;;  %v9129_v0 = vpack.c.bf16 %v1528_v62, %v1520_v61  ;;  %v1385_v61 = vld [vmem:[#allocation5 + $0xf0] sm:$0xff]  ;;  %v1394_v62 = vld [vmem:[#allocation5 + $0x138] sm:$0xff] }
 0x287   : > { %v1481_v49 = vld [vmem:[#allocation5 + $0x3f0] sm:$0xff] }
 0x289   : > { %9104 = vmatpush1.bf16.msra.mxu0 %v9103_v10  ;;  %v9133_v10 = vpack.c.bf16 %v1544_v9, %v1536_v4  ;;  %v1401_v4 = vld [vmem:[#allocation5 + $0x170] sm:$0xff]  ;;  %v1410_v9 = vld [vmem:[#allocation5 + $0x1b8] sm:$0xff] }
 0x28a   : > { %9106 = vmatprep.subr.bf16.mxu0 %v9105_v11  ;;  %v1535_v11 = vld [vmem:[#allocation5 + $0x5a0] sm:$0xff] }
 0x28b   : > { %v9135_v18 = vpack.c.bf16 %v1543_v14, %v1535_v11  ;;  %v1409_v14 = vld [vmem:[#allocation5 + $0x1b0] sm:$0xff] }
 0x28d   : > { %9108 = vmatpush1.bf16.msra.mxu0 %v9107_v19  ;;  %v9137_v19 = vpack.c.bf16 %v1560_v17, %v1552_v15  ;;  %v1417_v15 = vld [vmem:[#allocation5 + $0x1f0] sm:$0xff]  ;;  %v1426_v17 = vld [vmem:[#allocation5 + $0x238] sm:$0xff] }
 0x28e   : > { %9110 = vmatprep.subr.bf16.mxu0 %v9109_v20  ;;  %v1551_v20 = vld [vmem:[#allocation5 + $0x620] sm:$0xff] }
 0x28f   : > { %v9139_v43 = vpack.c.bf16 %v1559_v21, %v1551_v20  ;;  %v1433_v21 = vld [vmem:[#allocation5 + $0x270] sm:$0xff] }
 0x291   : > { %9112 = vmatpush1.bf16.msra.mxu0 %v9111_v2  ;;  %v9141_v2 = vpack.c.bf16 %v1576_v24, %v1568_v22  ;;  %v1442_v22 = vld [vmem:[#allocation5 + $0x2b8] sm:$0xff] }
 0x292   : > { %9114 = vmatprep.subr.bf16.mxu0 %v9113_v16  ;;  %v1567_v16 = vld [vmem:[#allocation5 + $0x6a0] sm:$0xff]  ;;  %v1450_v24 = vld [vmem:[#allocation5 + $0x2f8] sm:$0xff] }
 0x293   : > { %v9143_v32 = vpack.c.bf16 %v1575_v44, %v1567_v16  ;;  %v1441_v16 = vld [vmem:[#allocation5 + $0x2b0] sm:$0xff] }
 0x294   : > { %v1449_v44 = vld [vmem:[#allocation5 + $0x2f0] sm:$0xff] }
 0x295   : > { %9116 = vmatpush1.bf16.msra.mxu0 %v9115_v40  ;;  %v1583_v40 = vld [vmem:[#allocation5 + $0x720] sm:$0xff] }
 0x296   : > { %9118 = vmatprep.subr.bf16.mxu0 %v9117_v45  ;;  %v1591_v45 = vld [vmem:[#allocation5 + $0x760] sm:$0xff] }
 0x297   : > { %v9147_v47 = vpack.c.bf16 %v1591_v45, %v1583_v40  ;;  %v1457_v40 = vld [vmem:[#allocation5 + $0x330] sm:$0xff] }
 0x298   : > { %v1465_v45 = vld [vmem:[#allocation5 + $0x370] sm:$0xff] }
 0x299   : > { %9120 = vmatpush1.bf16.msra.mxu0 %v9119_v50  ;;  %v1362_v50 = vld [vmem:[#allocation5 + $0x38] sm:$0xff] }
 0x29a   : > { %9122 = vmatprep.subr.bf16.mxu0 %v9121_v41  ;;  %v1370_v41 = vld [vmem:[#allocation5 + $0x78] sm:$0xff] }
 0x29b   : > { %v9153_v56 = vpack.c.bf16 %v1370_v41, %v1362_v50  ;;  %v1490_v50 = vld [vmem:[#allocation5 + $0x438] sm:$0xff] }
 0x29c   : > { %v1498_v41 = vld [vmem:[#allocation5 + $0x478] sm:$0xff] }
 0x29d   : > { %9124 = vmatpush1.bf16.msra.mxu0 %v9123_v35  ;;  %v1386_v35 = vld [vmem:[#allocation5 + $0xf8] sm:$0xff] }
 0x29e   : > { %9126 = vmatprep.subr.bf16.mxu0 %v9125_v59  ;;  %v9155_v59 = vpack.c.bf16 %v1369_v57, %v1361_v52  ;;  %v9157_v46 = vpack.c.bf16 %v1386_v35, %v1378_v58  ;;  %v1489_v52 = vld [vmem:[#allocation5 + $0x430] sm:$0xff]  ;;  %v1506_v58 = vld [vmem:[#allocation5 + $0x4b8] sm:$0xff] }
 0x29f   : > { %v1497_v57 = vld [vmem:[#allocation5 + $0x470] sm:$0xff]  ;;  %v1514_v35 = vld [vmem:[#allocation5 + $0x4f8] sm:$0xff] }
 0x2a1   : > { %9128 = vmatpush1.bf16.msra.mxu0 %v9127_v63  ;;  %v1402_v63 = vld [vmem:[#allocation5 + $0x178] sm:$0xff] }
 0x2a2   : > { %9130 = vmatprep.subr.bf16.mxu0 %v9129_v0  ;;  %v9159_v0 = vpack.c.bf16 %v1385_v61, %v1377_v60  ;;  %v9161_v7 = vpack.c.bf16 %v1402_v63, %v1394_v62  ;;  %v1505_v60 = vld [vmem:[#allocation5 + $0x4b0] sm:$0xff]  ;;  %v1522_v62 = vld [vmem:[#allocation5 + $0x538] sm:$0xff] }
 0x2a3   : > { %v1513_v61 = vld [vmem:[#allocation5 + $0x4f0] sm:$0xff]  ;;  %v1530_v63 = vld [vmem:[#allocation5 + $0x578] sm:$0xff] }
 0x2a5   : > { %9132 = vmatpush1.bf16.msra.mxu0 %v9131_v54  ;;  %v1418_v54 = vld [vmem:[#allocation5 + $0x1f8] sm:$0xff] }
 0x2a6   : > { %9134 = vmatprep.subr.bf16.mxu0 %v9133_v10  ;;  %v9163_v10 = vpack.c.bf16 %v1401_v4, %v1393_v12  ;;  %v9165_v11 = vpack.c.bf16 %v1418_v54, %v1410_v9  ;;  %v1521_v12 = vld [vmem:[#allocation5 + $0x530] sm:$0xff]  ;;  %v1538_v9 = vld [vmem:[#allocation5 + $0x5b8] sm:$0xff] }
 0x2a7   : > { %v1529_v4 = vld [vmem:[#allocation5 + $0x570] sm:$0xff]  ;;  %v1546_v54 = vld [vmem:[#allocation5 + $0x5f8] sm:$0xff] }
 0x2a9   : > { %9136 = vmatpush1.bf16.msra.mxu0 %v9135_v18  ;;  %v1434_v18 = vld [vmem:[#allocation5 + $0x278] sm:$0xff] }
 0x2aa   : > { %9138 = vmatprep.subr.bf16.mxu0 %v9137_v19  ;;  %v9167_v19 = vpack.c.bf16 %v1417_v15, %v1409_v14  ;;  %v9169_v20 = vpack.c.bf16 %v1434_v18, %v1426_v17  ;;  %v1537_v14 = vld [vmem:[#allocation5 + $0x5b0] sm:$0xff]  ;;  %v1554_v17 = vld [vmem:[#allocation5 + $0x638] sm:$0xff] }
 0x2ab   : > { %v1545_v15 = vld [vmem:[#allocation5 + $0x5f0] sm:$0xff]  ;;  %v1562_v18 = vld [vmem:[#allocation5 + $0x678] sm:$0xff] }
 0x2ad   : > { %9140 = vmatpush1.bf16.msra.mxu0 %v9139_v43 }
 0x2ae   : > { %9142 = vmatprep.subr.bf16.mxu0 %v9141_v2  ;;  %v9173_v2 = vpack.c.bf16 %v1450_v24, %v1442_v22  ;;  %v1570_v22 = vld [vmem:[#allocation5 + $0x6b8] sm:$0xff] }
 0x2af   : > { %v1578_v24 = vld [vmem:[#allocation5 + $0x6f8] sm:$0xff] }
 0x2b1   : > { %9144 = vmatpush1.bf16.msra.mxu0 %v9143_v32  ;;  %v9175_v32 = vpack.c.bf16 %v1449_v44, %v1441_v16  ;;  %v1569_v16 = vld [vmem:[#allocation5 + $0x6b0] sm:$0xff] }
 0x2b2   : > { %9146 = vmatprep.subr.bf16.mxu0 %v9145_v33  ;;  %v9177_v33 = vpack.c.bf16 %v1466_v30, %v1458_v26  ;;  %v1577_v44 = vld [vmem:[#allocation5 + $0x6f0] sm:$0xff]  ;;  %v1586_v26 = vld [vmem:[#allocation5 + $0x738] sm:$0xff] }
 0x2b3   : > { %v1594_v30 = vld [vmem:[#allocation5 + $0x778] sm:$0xff] }
 0x2b5   : > { %9148 = vmatpush1.bf16.msra.mxu0 %v9147_v47  ;;  %v9179_v47 = vpack.c.bf16 %v1465_v45, %v1457_v40  ;;  %v1585_v40 = vld [vmem:[#allocation5 + $0x730] sm:$0xff] }
 0x2b6   : > { %9150 = vmatprep.subr.bf16.mxu0 %v9149_v38  ;;  %v9181_v38 = vpack.c.bf16 %v1482_v3, %v1474_v6  ;;  %v1593_v45 = vld [vmem:[#allocation5 + $0x770] sm:$0xff]  ;;  %v1602_v6 = vld [vmem:[#allocation5 + $0x7b8] sm:$0xff] }
 0x2b7   : > { %v1610_v3 = vld [vmem:[#allocation5 + $0x7f8] sm:$0xff] }
 0x2b9   : > { %9152 = vmatpush1.bf16.msra.mxu0 %v9151_v55  ;;  %v9183_v55 = vpack.c.bf16 %v1481_v49, %v1473_v48  ;;  %v1601_v48 = vld [vmem:[#allocation5 + $0x7b0] sm:$0xff] }
 0x2ba   : > { %9154 = vmatprep.subr.bf16.mxu0 %v9153_v56  ;;  %v9185_v56 = vpack.c.bf16 %v1498_v41, %v1490_v50  ;;  %v1609_v49 = vld [vmem:[#allocation5 + $0x7f0] sm:$0xff]  ;;  %v9952_v41 = vpop.permute.xlu1 %3544 }
 0x2bb   : > { %v9215_v50 = vpack.c.bf16 %v1609_v49, %v1601_v48 }
 0x2bc   : > { %1818 = vmatmul.mubr.f32.vlgmr.msra.gmra.mrb[6].mxu0 %v9887_v13 }
 0x2bd   : > { %9156 = vmatpush1.bf16.msra.mxu0 %v9155_v59  ;;  %1888 = vmatprep.mubr.f32.mxu0 %v9884_v8  ;;  %v1425_v8 = vld [vmem:[#allocation5 + $0x230] sm:$0xff]  ;;  %v9187_v59 = vpack.c.bf16 %v1497_v57, %v1489_v52  ;;  %v9959_v57 = vpop.permute.xlu0 %3542 }
 0x2be   : > { %9158 = vmatprep.subr.bf16.mxu0 %v9157_v46  ;;  %v9171_v43 = vpack.c.bf16 %v1433_v21, %v1425_v8  ;;  %v9189_v46 = vpack.c.bf16 %v1514_v35, %v1506_v58  ;;  %v1553_v8 = vld [vmem:[#allocation5 + $0x630] sm:$0xff] }
 0x2bf   : > { %v1561_v21 = vld [vmem:[#allocation5 + $0x670] sm:$0xff] }
 0x2c1   : > { %9160 = vmatpush1.bf16.msra.mxu0 %v9159_v0  ;;  %v9191_v0 = vpack.c.bf16 %v1513_v61, %v1505_v60  ;;  %v2082_v60 = vpop.permute.xlu0 %2081 }
 0x2c2   : > { %9162 = vmatprep.subr.bf16.mxu0 %v9161_v7  ;;  %v9193_v7 = vpack.c.bf16 %v1530_v63, %v1522_v62 }
 0x2c5   : > { %9164 = vmatpush1.bf16.msra.mxu0 %v9163_v10  ;;  %v9195_v10 = vpack.c.bf16 %v1529_v4, %v1521_v12  ;;  %v2078_v63 = vpop.permute.xlu0 %2077 }
 0x2c6   : > { %9166 = vmatprep.subr.bf16.mxu0 %v9165_v11  ;;  %v9197_v11 = vpack.c.bf16 %v1546_v54, %v1538_v9 }
 0x2c9   : > { %9168 = vmatpush1.bf16.msra.mxu0 %v9167_v19  ;;  %v9199_v19 = vpack.c.bf16 %v1545_v15, %v1537_v14  ;;  %v2086_v12 = vpop.permute.xlu0 %2085 }
 0x2ca   : > { %9170 = vmatprep.subr.bf16.mxu0 %v9169_v20  ;;  %v9201_v20 = vpack.c.bf16 %v1562_v18, %v1554_v17 }
 0x2cd   : > { %9172 = vmatpush1.bf16.msra.mxu0 %v9171_v43  ;;  %v9203_v43 = vpack.c.bf16 %v1561_v21, %v1553_v8  ;;  %v9994_v15 = vpop.permute.xlu0 %3548 }
 0x2ce   : > { %9174 = vmatprep.subr.bf16.mxu0 %v9173_v2  ;;  %v9205_v2 = vpack.c.bf16 %v1578_v24, %v1570_v22 }
 0x2d1   : > { %9176 = vmatpush1.bf16.msra.mxu0 %v9175_v32  ;;  %v9207_v32 = vpack.c.bf16 %v1577_v44, %v1569_v16  ;;  %v2094_v17 = vpop.permute.xlu0 %2093 }
 0x2d2   : > { %9178 = vmatprep.subr.bf16.mxu0 %v9177_v33  ;;  %v9209_v33 = vpack.c.bf16 %v1594_v30, %v1586_v26 }
 0x2d5   : > { %9180 = vmatpush1.bf16.msra.mxu0 %v9179_v47  ;;  %v9211_v47 = vpack.c.bf16 %v1593_v45, %v1585_v40  ;;  %v9996_v18 = vpop.permute.xlu0 %4280 }
 0x2d6   : > { %9182 = vmatprep.subr.bf16.mxu0 %v9181_v38  ;;  %v9213_v38 = vpack.c.bf16 %v1610_v3, %v1602_v6 }
 0x2d9   : > { %9184 = vmatpush1.bf16.msra.mxu0 %v9183_v55  ;;  %v9955_v55 = vpop.permute.xlu1 %3546 }
 0x2da   : > { %9186 = vmatprep.subr.bf16.mxu0 %v9185_v56 }
 0x2dd   : > { %9188 = vmatpush1.bf16.msra.mxu0 %v9187_v59  ;;  %v2090_v56 = vpop.permute.xlu1 %2089 }
 0x2de   : > { %9190 = vmatprep.subr.bf16.mxu0 %v9189_v46 }
 0x2e1   : > { %9192 = vmatpush1.bf16.msra.mxu0 %v9191_v0  ;;  %v9957_v52 = vpop.permute.xlu1 %4282 }
 0x2e2   : > { %9194 = vmatprep.subr.bf16.mxu0 %v9193_v7 }
 0x2e5   : > { %9196 = vmatpush1.bf16.msra.mxu0 %v9195_v10  ;;  %v9961_v59 = vpop.permute.xlu1 %4284 }
 0x2e6   : > { %9198 = vmatprep.subr.bf16.mxu0 %v9197_v11 }
 0x2e9   : > { %9200 = vmatpush1.bf16.msra.mxu0 %v9199_v19  ;;  %v9966_v61 = vpop.permute.xlu1 %3113  ;;  %v9998_v19 = vpop.permute.xlu0 %4286 }
 0x2ea   : > { %9202 = vmatprep.subr.bf16.mxu0 %v9201_v20 }
 0x2ed   : > { %9204 = vmatpush1.bf16.msra.mxu0 %v9203_v43  ;;  %v2080_v0 = vpop.permute.xlu1 %2079  ;;  %v2088_v20 = vpop.permute.xlu0 %2087 }
 0x2ee   : > { %9206 = vmatprep.subr.bf16.mxu0 %v9205_v2  ;;  %v2097_v54 = vsel %vm2095_vm13, %v2080_v0, %v2082_v60  ;;  %v2096_v10 = vsel %vm2095_vm13, %v2078_v63, %v2080_v0  ;;  %v2100_v8 = vsel %vm2095_vm13, %v2086_v12, %v2088_v20  ;;  %v2101_v21 = vsel %vm2095_vm13, %v2088_v20, %v2090_v56  ;;  %v10061_v0 = vld [vmem:[%s10899_s3] sm:$0xf] }
 0x2ef   : > { %8740 = vmatprep.subr.msk.mxu1 %vm468_vm5, %v2097_v54 }
 0x2f0   : > { %8741 = vmatpush1.msk.msra.mxu1 %vm468_vm5, %v2096_v10 }
 0x2f1   : > { %9208 = vmatpush1.bf16.msra.mxu0 %v9207_v32 }
 0x2f2   : > { %9210 = vmatprep.subr.bf16.mxu0 %v9209_v33  ;;  %v2084_v4 = vpop.permute.xlu1 %2083 }
 0x2f3   : > { %v2099_v11 = vsel %vm2095_vm13, %v2084_v4, %v2086_v12  ;;  %v2098_v14 = vsel %vm2095_vm13, %v2082_v60, %v2084_v4 }
 0x2f4   : > { %8743 = vmatprep.subr.msk.mxu1 %vm468_vm5, %v2099_v11  ;;  %v10081_v11 = vld [vmem:[#allocation4 + $0x8] sm:$0xff] }
 0x2f5   : > { %9212 = vmatpush1.bf16.msra.mxu0 %v9211_v47 }
 0x2f6   : > { %9214 = vmatprep.subr.bf16.mxu0 %v9213_v38  ;;  %v2092_v22 = vpop.permute.xlu1 %2091 }
 0x2f7   : > { %v2102_v43 = vsel %vm2095_vm13, %v2090_v56, %v2092_v22  ;;  %v2103_v16 = vsel %vm2095_vm13, %v2092_v22, %v2094_v17  ;;  %v3550_v17 = vrot.slane %v9959_v57, 4  ;;  %v3110_v22 = vcombine.high %v9921_v5, %v9921_v5 }
 0x2f9   : > { %9216 = vmatpush1.bf16.msra.mxu0 %v9215_v50 }
 0x2fc   : > { %1889 = vmatmul.mubr.f32.vlgmr.msra.gmra.mrb[8].mxu0 %v9887_v13 }
 0x30f   : > { %v1677_v58 = vpop.f32.mrb[2].mxu0 }
 0x310   : > { %v1679_v35 = vpop.f32.mrb[3].mxu0 }
 0x311   : > { %v9963_v46 = vcombine.low %v1677_v58, %v1679_v35 }
 0x313   : > { %1913 = vst [vmem:[#allocation3 + $0x4] sm:$0xff] %v9963_v46 }
 0x31a   : > { %v9968_v62 = vld [vmem:[#allocation3] sm:$0xff] }
 0x31b   : > { %2764 = vrot.lane.b32.xlu0 %v9968_v62, %s9487_s27  ;;  %v2058_v13 = vmul.f32 %v9968_v62, %v9831_v36  ;;  %v2760_v7 = vcombine.high %v9968_v62, %v9968_v62  ;;  %v1926_v36 = vld [vmem:[%s10900_s4] sm:$0xf] }
 0x31c   : > { %8742 = vmatmul.mubr.msk.f32.vlgmr.msra.gmra.mrb[0].mxu1 %vm464_vm6, %v1926_v36 }
 0x31d   : > { %2416 = vrot.lane.b32.xlu1 %v2058_v13, %s9486_s26  ;;  %v2412_v9 = vcombine.high %v2058_v13, %v2058_v13  ;;  %8744 = vmatpush1.msk.msra.mxu1 %vm468_vm5, %v2098_v14  ;;  %v3108_v14 = vcombine.high %v10081_v11, %v10081_v11 }
 0x31e   : > { %2258 = vmatprep.mubr.f32.mxu1 %v9474_v1  ;;  %8746 = vmatprep.subr.msk.mxu1 %vm468_vm5, %v2101_v21  ;;  %v10098_v21 = vld [vmem:[#allocation4] sm:$0xff] }
 0x320   : > { %8745 = vmatmul.mubr.msk.f32.vlgmr.msra.gmra.mrb[2].mxu1 %vm464_vm6, %v1926_v36 }
 0x321   : > { %2766 = vrot.lane.b32.xlu1 %v2760_v7, %s9487_s27  ;;  %2329 = vmatprep.mubr.f32.mxu1 %v9474_v1 }
 0x322   : > { %8747 = vmatpush1.msk.msra.mxu1 %vm468_vm5, %v2100_v8  ;;  %v3555_v8 = vsel %vm3554_vm14, %v3550_v17, %v9959_v57 }
 0x323   : > { %8749 = vmatprep.subr.msk.mxu1 %vm468_vm5, %v2103_v16  ;;  %v10112_v16 = vrot.slane %v9994_v15, 4 }
 0x324   : > { %8748 = vmatmul.mubr.msk.f32.vlgmr.msra.gmra.mrb[4].mxu1 %vm464_vm6, %v1926_v36 }
 0x325   : > { %2418 = vrot.lane.b32.xlu1 %v2412_v9, %s9486_s26  ;;  %2400 = vmatprep.mubr.f32.mxu1 %v9474_v1 }
 0x326   : > { %8750 = vmatpush1.msk.msra.mxu1 %vm468_vm5, %v2102_v43  ;;  %v3551_v43 = vrot.slane %v9952_v41, 4 }
 0x328   : > { %8751 = vmatmul.mubr.msk.f32.vlgmr.msra.gmra.mrb[6].mxu1 %vm464_vm6, %v1926_v36 }
 0x329   : > { %2525 = vmatprep.mubr.f32.mxu1 %v9474_v1 }
 0x34f   : > { %v1748_v24 = vpop.f32.mrb[4].mxu0 }
 0x350   : > { %v1750_v2 = vpop.f32.mrb[5].mxu0 }
 0x351   : > { %v10007_v44 = vcombine.low %v1748_v24, %v1750_v2  ;;  %v3567_v24 = vmul.f32 %v9968_v62, %v3555_v8  ;;  %v3552_v2 = vrot.slane %v9955_v55, 4 }
 0x353   : > { %1914 = vst [vmem:[#allocation3 + $0xc] sm:$0xff] %v10007_v44  ;;  %v3582_v57 = vcombine.high %v3567_v24, %v3567_v24 }
 0x35a   : > { %v10015_v26 = vld [vmem:[#allocation3 + $0x8] sm:$0xff] }
 0x35b   : > { %v2761_v30 = vcombine.high %v10015_v26, %v10015_v26  ;;  %2768 = vrot.lane.b32.xlu0 %v10015_v26, %s9487_s27  ;;  %v2059_v32 = vmul.f32 %v10015_v26, %v9822_v31 }
 0x35d   : > { %2770 = vrot.lane.b32.xlu1 %v2761_v30, %s9487_s27  ;;  %v2413_v33 = vcombine.high %v2059_v32, %v2059_v32  ;;  %v3556_v30 = vsel %vm468_vm5, %v3550_v17, %v3551_v43 }
 0x35f   : > { %2420 = vrot.lane.b32.xlu0 %v2059_v32, %s9486_s26  ;;  %v3558_v32 = vsel %vm468_vm5, %v3551_v43, %v3552_v2 }
 0x363   : > { %2422 = vrot.lane.b32.xlu0 %v2413_v33, %s9486_s26  ;;  %v2754_v33 = vld [vmem:[#allocation4 + $0x20] sm:$0xf] }
 0x38d   : > { %v10043_v49 = vpop.permute.xlu0 %2764 }
 0x38f   : > { %v1819_v40 = vpop.f32.mrb[6].mxu0  ;;  %v2417_v48 = vpop.permute.xlu1 %2416 }
 0x390   : > { %v10026_v45 = vpop.f32.mrb[7].mxu0 }
 0x391   : > { %v10029_v6 = vcombine.low %v1819_v40, %v10026_v45  ;;  %v3557_v40 = vsel %vm3554_vm14, %v3556_v30, %v9952_v41 }
 0x393   : > { %1915 = vst [vmem:[#allocation3 + $0x14] sm:$0xff] %v10029_v6  ;;  %v10045_v50 = vpop.permute.xlu1 %2766 }
 0x397   : > { %v2419_v35 = vpop.permute.xlu1 %2418 }
 0x398   : > { %v2434_v7 = vsel %vm2095_vm13, %v2417_v48, %v2419_v35 }
 0x39a   : > { %v10032_v3 = vld [vmem:[#allocation3 + $0x10] sm:$0xff] }
 0x39b   : > { %2772 = vrot.lane.b32.xlu0 %v10032_v3, %s9487_s27  ;;  %v2060_v31 = vmul.f32 %v10032_v3, %v9849_v42  ;;  %v2762_v47 = vcombine.high %v10032_v3, %v10032_v3 }
 0x39d   : > { %2424 = vrot.lane.b32.xlu1 %v2060_v31, %s9486_s26  ;;  %v2414_v38 = vcombine.high %v2060_v31, %v2060_v31  ;;  %v3559_v31 = vsel %vm3554_vm14, %v3558_v32, %v9955_v55  ;;  %v3457_v32 = vld [vmem:[#allocation4 + $0x20] sm:$0xf] }
 0x39e   : > { %v3569_v48 = vmul.f32 %v3559_v31, %v10032_v3 }
 0x39f   : > { %2774 = vrot.lane.b32.xlu0 %v2762_v47, %s9487_s27  ;;  %v3560_v47 = vsel %vm468_vm5, %v3552_v2, %v10112_v16 }
 0x3a3   : > { %2426 = vrot.lane.b32.xlu0 %v2414_v38, %s9486_s26  ;;  %v3568_v38 = vmul.f32 %v10015_v26, %v3557_v40 }
 0x3a5   : > { %v3583_v41 = vcombine.high %v3568_v38, %v3568_v38 }
 0x3cd   : > { %v10047_v56 = vpop.permute.xlu0 %2768 }
 0x3cf   : > { %v1890_v58 = vpop.f32.mrb[8].mxu0 }
 0x3d0   : > { %v10049_v42 = vpop.f32.mrb[9].mxu0 }
 0x3d1   : > { %v10052_v60 = vcombine.low %v1890_v58, %v10049_v42  ;;  %v10054_v13 = vpop.permute.xlu0 %2420  ;;  %v3561_v58 = vsel %vm3554_vm14, %v3560_v47, %v9994_v15  ;;  %v3573_v15 = vmul.f32 %v10081_v11, %v3557_v40  ;;  %v3576_v47 = vmul.f32 %v10112_v16, %v3457_v32  ;;  %v1918_v32 = vld [vmem:[%s10899_s3 + $0x4] sm:$0xf] }
 0x3d2   : > { %v2435_v63 = vsel %vm2095_vm13, %v2419_v35, %v10054_v13 }
 0x3d3   : > { %1916 = vst [vmem:[#allocation3 + $0x1c] sm:$0xff] %v10052_v60  ;;  %8752 = vmatprep.subr.msk.mxu1 %vm468_vm5, %v2435_v63  ;;  %v3572_v63 = vmul.f32 %v10098_v21, %v3555_v8 }
 0x3d4   : > { %8753 = vmatpush1.msk.msra.mxu1 %vm468_vm5, %v2434_v7 }
 0x3d5   : > { %8754 = vmatmul.mubr.msk.f32.vlgmr.msra.gmra.mrb[0].mxu1 %vm464_vm6, %v10061_v0  ;;  %v2423_v17 = vpop.permute.xlu0 %2422 }
 0x3d6   : > { %2596 = vmatprep.mubr.f32.mxu1 %v9474_v1  ;;  %v2436_v43 = vsel %vm2095_vm13, %v10054_v13, %v2423_v17 }
 0x3da   : > { %v2749_v12 = vld [vmem:[#allocation3 + $0x20] sm:$0xf]  ;;  %v10070_v4 = vld [vmem:[#allocation3 + $0x18] sm:$0xff] }
 0x3db   : > { %2780 = vrot.lane.b32.xlu0 %v2749_v12, %s9487_s27  ;;  %2776 = vrot.lane.b32.xlu1 %v10070_v4, %s9487_s27  ;;  %v2061_v9 = vmul.f32 %v10070_v4, %v9917_v37  ;;  %v1941_v10 = vld [vmem:[#allocation3 + $0x20] sm:$0xf]  ;;  %v2763_v37 = vcombine.high %v10070_v4, %v10070_v4  ;;  %v3570_v55 = vmul.f32 %v3561_v58, %v10070_v4 }
 0x3dc   : > { %v2062_v36 = vmul.f32 %v9874_v53, %v1941_v10  ;;  %v10092_v53 = vld [vmem:[#allocation4 + $0x10] sm:$0xff]  ;;  %v3452_v35 = vld [vmem:[#allocation3 + $0x20] sm:$0xf]  ;;  %v3584_v12 = vcombine.high %v3569_v48, %v3569_v48  ;;  %v3930_v10 = vcombine.high %v3573_v15, %v3573_v15 }
 0x3dd   : > { %v2415_v54 = vcombine.high %v2061_v9, %v2061_v9  ;;  %v3109_v20 = vcombine.high %v10092_v53, %v10092_v53  ;;  %v3571_v7 = vmul.f32 %v10112_v16, %v3452_v35 }
 0x3df   : > { %2428 = vrot.lane.b32.xlu1 %v2061_v9, %s9486_s26  ;;  %2430 = vrot.lane.b32.xlu0 %v2415_v54, %s9486_s26  ;;  %v3929_v9 = vcombine.high %v3572_v63, %v3572_v63  ;;  %v3574_v54 = vmul.f32 %v10092_v53, %v3559_v31 }
 0x3e3   : > { %2432 = vrot.lane.b32.xlu1 %v2062_v36, %s9486_s26  ;;  %3115 = vrot.lane.b32.xlu0 %v10081_v11, %s9487_s27  ;;  %v10144_v36 = vpop.permute.xlu1 %2770 }
 0x3e7   : > { %2778 = vrot.lane.b32.xlu1 %v2763_v37, %s9487_s27  ;;  %3117 = vrot.lane.b32.xlu0 %v3108_v14, %s9487_s27  ;;  %v3931_v14 = vcombine.high %v3574_v54, %v3574_v54  ;;  %v3575_v37 = vmul.f32 %v3561_v58, %v9921_v5 }
 0x3eb   : > { %3111 = vrot.lane.b32.xlu1 %v10098_v21, %s9487_s27  ;;  %3121 = vrot.lane.b32.xlu0 %v3109_v20, %s9487_s27  ;;  %v4289_v20 = vrot.slane %v9957_v52, 4 }
 0x3ef   : > { %3119 = vrot.lane.b32.xlu1 %v10092_v53, %s9487_s27  ;;  %3125 = vrot.lane.b32.xlu0 %v3110_v22, %s9487_s27 }
 0x3f3   : > { %3123 = vrot.lane.b32.xlu1 %v9921_v5, %s9487_s27  ;;  %3588 = vrot.lane.b32.xlu0 %v3582_v57, %s9488_s12  ;;  %v3932_v5 = vcombine.high %v3575_v37, %v3575_v37  ;;  %v3585_v57 = vcombine.high %v3570_v55, %v3570_v55 }
 0x3f7   : > { %3127 = vrot.lane.b32.xlu1 %v2754_v33, %s9487_s27  ;;  %3586 = vrot.lane.b32.xlu0 %v3567_v24, %s9488_s12  ;;  %v4288_v24 = vrot.slane %v9996_v18, 4  ;;  %v4290_v33 = vrot.slane %v9961_v59, 4 }
 0x3f9   : > { %v4293_v2 = vsel %vm468_vm5, %v4288_v24, %v4289_v20  ;;  %v4292_v13 = vsel %vm763_vm2, %v4288_v24, %v9996_v18 }
 0x3fa   : > { %v4294_v30 = vsel %vm763_vm2, %v4293_v2, %v9957_v52  ;;  %v4304_v40 = vmul.f32 %v4292_v13, %v9968_v62  ;;  %v2783_v2 = vsel %vm2782_vm15, %v10043_v49, %v10045_v50  ;;  %v2785_v49 = vsel %vm2782_vm15, %v10047_v56, %v10144_v36 }
 0x3fb   : > { %3590 = vrot.lane.b32.xlu1 %v3568_v38, %s9488_s12  ;;  %3594 = vrot.lane.b32.xlu0 %v3569_v48, %s9488_s12  ;;  %v4305_v31 = vmul.f32 %v4294_v30, %v10015_v26  ;;  %v4295_v38 = vsel %vm468_vm5, %v4289_v20, %v4290_v33  ;;  %v4291_v26 = vrot.slane %v9998_v19, 4 }
 0x3fc   : > { %v4319_v52 = vcombine.high %v4304_v40, %v4304_v40  ;;  %v4296_v18 = vsel %vm763_vm2, %v4295_v38, %v9961_v59 }
 0x3fd   : > { %v4306_v62 = vmul.f32 %v4296_v18, %v10032_v3  ;;  %v4320_v16 = vcombine.high %v4305_v31, %v4305_v31  ;;  %v4297_v58 = vsel %vm468_vm5, %v4290_v33, %v4291_v26  ;;  %v4309_v3 = vmul.f32 %v10098_v21, %v4292_v13  ;;  %v9427_v21 = vld [vmem:[#allocation4 + $0x18] sm:$0xff] }
 0x3fe   : > { %v4298_v59 = vsel %vm763_vm2, %v4297_v58, %v9998_v19  ;;  %v1927_v58 = vld [vmem:[%s10900_s4 + $0x4] sm:$0xf] }
 0x3ff   : > { %3592 = vrot.lane.b32.xlu1 %v3583_v41, %s9488_s12  ;;  %3598 = vrot.lane.b32.xlu0 %v3570_v55, %s9488_s12  ;;  %v4321_v48 = vcombine.high %v4306_v62, %v4306_v62  ;;  %v4274_v41 = vld [vmem:[#allocation3 + $0x20] sm:$0xf]  ;;  %v4307_v55 = vmul.f32 %v4298_v59, %v10070_v4 }
 0x400   : > { %v4308_v35 = vmul.f32 %v4291_v26, %v4274_v41 }
 0x403   : > { %3602 = vrot.lane.b32.xlu0 %v3571_v7, %s9488_s12  ;;  %3596 = vrot.lane.b32.xlu1 %v3584_v12, %s9488_s12  ;;  %v4310_v7 = vmul.f32 %v10081_v11, %v4294_v30  ;;  %v4311_v12 = vmul.f32 %v10092_v53, %v4296_v18 }
 0x405   : > { %v4666_v19 = vcombine.high %v4310_v7, %v4310_v7  ;;  %v4667_v4 = vcombine.high %v4311_v12, %v4311_v12 }
 0x407   : > { %3937 = vrot.lane.b32.xlu0 %v3573_v15, %s9488_s12  ;;  %3935 = vrot.lane.b32.xlu1 %v3929_v9, %s9488_s12  ;;  %v4322_v15 = vcombine.high %v4307_v55, %v4307_v55  ;;  %v4312_v9 = vmul.f32 %v9427_v21, %v4298_v59 }
 0x409   : > { %v4668_v11 = vcombine.high %v4312_v9, %v4312_v9 }
 0x40b   : > { %3939 = vrot.lane.b32.xlu0 %v3930_v10, %s9488_s12  ;;  %3933 = vrot.lane.b32.xlu1 %v3572_v63, %s9488_s12  ;;  %v4665_v63 = vcombine.high %v4309_v3, %v4309_v3  ;;  %v4279_v10 = vld [vmem:[#allocation4 + $0x20] sm:$0xf] }
 0x40f   : > { %3943 = vrot.lane.b32.xlu0 %v3931_v14, %s9488_s12  ;;  %3941 = vrot.lane.b32.xlu1 %v3574_v54, %s9488_s12  ;;  %v10152_v8 = vpop.permute.xlu1 %2424  ;;  %v2773_v54 = vpop.permute.xlu0 %2772  ;;  %v4313_v14 = vmul.f32 %v4291_v26, %v4279_v10  ;;  %v1919_v10 = vld [vmem:[%s10899_s3 + $0x8] sm:$0xf] }
 0x410   : > { %v2437_v22 = vsel %vm2095_vm13, %v2423_v17, %v10152_v8  ;;  %v2786_v30 = vsel %vm2782_vm15, %v10144_v36, %v2773_v54 }
 0x411   : > { %8755 = vmatprep.subr.msk.mxu1 %vm468_vm5, %v2437_v22 }
 0x412   : > { %8756 = vmatpush1.msk.msra.mxu1 %vm468_vm5, %v2436_v43 }
 0x413   : > { %3947 = vrot.lane.b32.xlu0 %v3932_v5, %s9488_s12  ;;  %3945 = vrot.lane.b32.xlu1 %v3575_v37, %s9488_s12  ;;  %v2775_v53 = vpop.permute.xlu0 %2774 }
 0x414   : > { %8757 = vmatmul.mubr.msk.f32.vlgmr.msra.gmra.mrb[2].mxu1 %vm464_vm6, %v10061_v0 }
 0x415   : > { %2667 = vmatprep.mubr.f32.mxu1 %v9474_v1 }
 0x417   : > { %5662 = vrot.lane.b32.xlu0 %v9819_v27, %s9478_s22  ;;  %3600 = vrot.lane.b32.xlu1 %v3585_v57, %s9488_s12  ;;  %v2427_v37 = vpop.permute.xlu0 %2426 }
 0x41b   : > { %3949 = vrot.lane.b32.xlu1 %v3576_v47, %s9488_s12  ;;  %4327 = vrot.lane.b32.xlu0 %v4305_v31, %s9478_s22 }
 0x41f   : > { %4325 = vrot.lane.b32.xlu1 %v4319_v52, %s9478_s22  ;;  %4323 = vrot.lane.b32.xlu0 %v4304_v40, %s9478_s22  ;;  %v2787_v40 = vsel %vm2782_vm15, %v2773_v54, %v2775_v53 }
 0x423   : > { %5664 = vrot.lane.b32.xlu1 %v9899_v25, %s9478_s22  ;;  %4331 = vrot.lane.b32.xlu0 %v4306_v62, %s9478_s22 }
 0x427   : > { %4329 = vrot.lane.b32.xlu1 %v4320_v16, %s9478_s22  ;;  %4333 = vrot.lane.b32.xlu0 %v4321_v48, %s9478_s22 }
 0x42b   : > { %5666 = vrot.lane.b32.xlu1 %v9913_v29, %s9478_s22  ;;  %5668 = vrot.lane.b32.xlu0 %v9869_v51, %s9478_s22 }
 0x42f   : > { %4335 = vrot.lane.b32.xlu1 %v4307_v55, %s9478_s22  ;;  %4339 = vrot.lane.b32.xlu0 %v4308_v35, %s9478_s22 }
 0x433   : > { %4671 = vrot.lane.b32.xlu1 %v4665_v63, %s9478_s22  ;;  %4673 = vrot.lane.b32.xlu0 %v4310_v7, %s9478_s22 }
 0x437   : > { %4337 = vrot.lane.b32.xlu1 %v4322_v15, %s9478_s22  ;;  %4675 = vrot.lane.b32.xlu0 %v4666_v19, %s9478_s22 }
 0x43b   : > { %4669 = vrot.lane.b32.xlu1 %v4309_v3, %s9478_s22  ;;  %4679 = vrot.lane.b32.xlu0 %v4667_v4, %s9478_s22 }
 0x43f   : > { %4677 = vrot.lane.b32.xlu1 %v4311_v12, %s9478_s22  ;;  %4683 = vrot.lane.b32.xlu0 %v4668_v11, %s9478_s22 }
 0x443   : > { %4681 = vrot.lane.b32.xlu1 %v4312_v9, %s9478_s22  ;;  %6398 = vrot.lane.b32.xlu0 %v9698_v23, %s9488_s12  ;;  %v2438_v23 = vsel %vm2095_vm13, %v10152_v8, %v2427_v37  ;;  %v2784_v8 = vsel %vm2782_vm15, %v10045_v50, %v10047_v56 }
 0x447   : > { %4685 = vrot.lane.b32.xlu1 %v4313_v14, %s9478_s22  ;;  %6402 = vrot.lane.b32.xlu0 %v9721_v34, %s9488_s12 }
 0x44b   : > { %6400 = vrot.lane.b32.xlu1 %v9706_v28, %s9488_s12 }
 0x44d   : > { %v2781_v17 = vpop.permute.xlu0 %2780  ;;  %v2777_v20 = vpop.permute.xlu1 %2776 }
 0x44e   : > { %v2788_v33 = vsel %vm2782_vm15, %v2775_v53, %v2777_v20 }
 0x44f   : > { %6404 = vrot.lane.b32.xlu1 %v9729_v39, %s9488_s12 }
 0x451   : > { %v2431_v22 = vpop.permute.xlu0 %2430  ;;  %v2429_v24 = vpop.permute.xlu1 %2428 }
 0x452   : > { %v2439_v43 = vsel %vm2095_vm13, %v2427_v37, %v2429_v24  ;;  %v2440_v39 = vsel %vm2095_vm13, %v2429_v24, %v2431_v22 }
 0x453   : > { %8758 = vmatprep.subr.msk.mxu1 %vm468_vm5, %v2439_v43 }
 0x454   : > { %8759 = vmatpush1.msk.msra.mxu1 %vm468_vm5, %v2438_v23 }
 0x455   : > { %v3116_v34 = vpop.permute.xlu0 %3115  ;;  %8760 = vmatmul.mubr.msk.f32.vlgmr.msra.gmra.mrb[4].mxu1 %vm464_vm6, %v10061_v0  ;;  %v2433_v28 = vpop.permute.xlu1 %2432 }
 0x456   : > { %v2441_v5 = vsel %vm2095_vm13, %v2431_v22, %v2433_v28  ;;  %2738 = vmatprep.mubr.f32.mxu1 %v9474_v1  ;;  %v3130_v18 = vsel %vm2782_vm15, %v9966_v61, %v3116_v34 }
 0x457   : > { %8761 = vmatprep.subr.msk.mxu1 %vm468_vm5, %v2441_v5 }
 0x458   : > { %8762 = vmatpush1.msk.msra.mxu1 %vm468_vm5, %v2440_v39 }
 0x459   : > { %v3118_v57 = vpop.permute.xlu0 %3117  ;;  %8763 = vmatmul.mubr.msk.f32.vlgmr.msra.gmra.mrb[6].mxu1 %vm464_vm6, %v10061_v0  ;;  %8764 = vmatprep.subr.msk.mxu1 %vm468_vm5, %v2784_v8  ;;  %v2779_v13 = vpop.permute.xlu1 %2778 }
 0x45a   : > { %8765 = vmatpush1.msk.msra.mxu1 %vm468_vm5, %v2783_v2  ;;  %2874 = vmatprep.mubr.f32.mxu1 %v9474_v1  ;;  %v2790_v56 = vsel %vm2782_vm15, %v2779_v13, %v2781_v17  ;;  %v2789_v36 = vsel %vm2782_vm15, %v2777_v20, %v2779_v13  ;;  %v3131_v59 = vsel %vm2782_vm15, %v3116_v34, %v3118_v57 }
 0x45b   : > { %8767 = vmatprep.subr.msk.mxu1 %vm468_vm5, %v2786_v30 }
 0x45d   : > { %v3122_v50 = vpop.permute.xlu0 %3121  ;;  %8766 = vmatmul.mubr.msk.f32.vlgmr.msra.gmra.mrb[0].mxu1 %vm464_vm6, %v1918_v32  ;;  %v3112_v0 = vpop.permute.xlu1 %3111 }
 0x45e   : > { %8768 = vmatpush1.msk.msra.mxu1 %vm468_vm5, %v2785_v49  ;;  %2945 = vmatprep.mubr.f32.mxu1 %v9474_v1  ;;  %v3129_v62 = vsel %vm2782_vm15, %v3112_v0, %v9966_v61  ;;  %v1928_v0 = vld [vmem:[%s10900_s4 + $0x8] sm:$0xf] }
 0x45f   : > { %8770 = vmatprep.subr.msk.mxu1 %vm468_vm5, %v2788_v33 }
 0x461   : > { %v3126_v31 = vpop.permute.xlu0 %3125  ;;  %8769 = vmatmul.mubr.msk.f32.vlgmr.msra.gmra.mrb[2].mxu1 %vm464_vm6, %v1918_v32  ;;  %v3120_v47 = vpop.permute.xlu1 %3119 }
 0x462   : > { %8771 = vmatpush1.msk.msra.mxu1 %vm468_vm5, %v2787_v40  ;;  %3016 = vmatprep.mubr.f32.mxu1 %v9474_v1  ;;  %v3132_v48 = vsel %vm2782_vm15, %v3118_v57, %v3120_v47  ;;  %v3133_v55 = vsel %vm2782_vm15, %v3120_v47, %v3122_v50 }
 0x463   : > { %8773 = vmatprep.subr.msk.mxu1 %vm468_vm5, %v2790_v56 }
 0x465   : > { %v3589_v38 = vpop.permute.xlu0 %3588  ;;  %8772 = vmatmul.mubr.msk.f32.vlgmr.msra.gmra.mrb[4].mxu1 %vm464_vm6, %v1918_v32  ;;  %v3124_v52 = vpop.permute.xlu1 %3123 }
 0x466   : > { %8774 = vmatpush1.msk.msra.mxu1 %vm468_vm5, %v2789_v36  ;;  %3087 = vmatprep.mubr.f32.mxu1 %v9474_v1  ;;  %v3134_v3 = vsel %vm2782_vm15, %v3122_v50, %v3124_v52  ;;  %v3135_v19 = vsel %vm2782_vm15, %v3124_v52, %v3126_v31 }
 0x467   : > { %8776 = vmatprep.subr.msk.mxu1 %vm468_vm5, %v3130_v18 }
 0x469   : > { %v3587_v26 = vpop.permute.xlu0 %3586  ;;  %8775 = vmatmul.mubr.msk.f32.vlgmr.msra.gmra.mrb[6].mxu1 %vm464_vm6, %v1918_v32  ;;  %v3128_v16 = vpop.permute.xlu1 %3127 }
 0x46a   : > { %8777 = vmatpush1.msk.msra.mxu1 %vm468_vm5, %v3129_v62  ;;  %3220 = vmatprep.mubr.f32.mxu1 %v9474_v1  ;;  %v3136_v7 = vsel %vm2782_vm15, %v3126_v31, %v3128_v16  ;;  %v3605_v21 = vsel %vm3604_vm0, %v3587_v26, %v3589_v38 }
 0x46b   : > { %8779 = vmatprep.subr.msk.mxu1 %vm468_vm5, %v3132_v48 }
 0x46d   : > { %v3595_v41 = vpop.permute.xlu0 %3594  ;;  %8778 = vmatmul.mubr.msk.f32.vlgmr.msra.gmra.mrb[0].mxu1 %vm464_vm6, %v1927_v58  ;;  %v3591_v61 = vpop.permute.xlu1 %3590 }
 0x46e   : > { %8780 = vmatpush1.msk.msra.mxu1 %vm468_vm5, %v3131_v59  ;;  %3291 = vmatprep.mubr.f32.mxu1 %v9474_v1  ;;  %v3606_v4 = vsel %vm3604_vm0, %v3589_v38, %v3591_v61 }
 0x46f   : > { %8782 = vmatprep.subr.msk.mxu1 %vm468_vm5, %v3134_v3 }
 0x471   : > { %v3599_v35 = vpop.permute.xlu0 %3598  ;;  %8781 = vmatmul.mubr.msk.f32.vlgmr.msra.gmra.mrb[2].mxu1 %vm464_vm6, %v1927_v58  ;;  %v3593_v63 = vpop.permute.xlu1 %3592 }
 0x472   : > { %8783 = vmatpush1.msk.msra.mxu1 %vm468_vm5, %v3133_v55  ;;  %3362 = vmatprep.mubr.f32.mxu1 %v9474_v1  ;;  %v3608_v54 = vsel %vm3604_vm0, %v3593_v63, %v3595_v41  ;;  %v3607_v53 = vsel %vm3604_vm0, %v3591_v61, %v3593_v63 }
 0x473   : > { %8785 = vmatprep.subr.msk.mxu1 %vm468_vm5, %v3136_v7 }
 0x475   : > { %v3603_v12 = vpop.permute.xlu0 %3602  ;;  %8784 = vmatmul.mubr.msk.f32.vlgmr.msra.gmra.mrb[4].mxu1 %vm464_vm6, %v1927_v58  ;;  %v3597_v15 = vpop.permute.xlu1 %3596 }
 0x476   : > { %8786 = vmatpush1.msk.msra.mxu1 %vm468_vm5, %v3135_v19  ;;  %3433 = vmatprep.mubr.f32.mxu1 %v9474_v1  ;;  %v3610_v17 = vsel %vm3604_vm0, %v3597_v15, %v3599_v35  ;;  %v3609_v20 = vsel %vm3604_vm0, %v3595_v41, %v3597_v15  ;;  %v1920_v15 = vld [vmem:[%s10899_s3 + $0xc] sm:$0xf] }
 0x477   : > { %8788 = vmatprep.subr.msk.mxu1 %vm468_vm5, %v3606_v4 }
 0x479   : > { %v3938_v9 = vpop.permute.xlu0 %3937  ;;  %8787 = vmatmul.mubr.msk.f32.vlgmr.msra.gmra.mrb[6].mxu1 %vm464_vm6, %v1927_v58  ;;  %v3936_v11 = vpop.permute.xlu1 %3935 }
 0x47a   : > { %8789 = vmatpush1.msk.msra.mxu1 %vm468_vm5, %v3605_v21  ;;  %3696 = vmatprep.mubr.f32.mxu1 %v9474_v1  ;;  %v3952_v57 = vsel %vm3604_vm0, %v3936_v11, %v3938_v9 }
 0x47b   : > { %8791 = vmatprep.subr.msk.mxu1 %vm468_vm5, %v3608_v54 }
 0x47d   : > { %v3940_v14 = vpop.permute.xlu0 %3939  ;;  %8790 = vmatmul.mubr.msk.f32.vlgmr.msra.gmra.mrb[0].mxu1 %vm464_vm6, %v1919_v10  ;;  %v3934_v37 = vpop.permute.xlu1 %3933 }
 0x47e   : > { %8792 = vmatpush1.msk.msra.mxu1 %vm468_vm5, %v3607_v53  ;;  %3767 = vmatprep.mubr.f32.mxu1 %v9474_v1  ;;  %v3951_v13 = vsel %vm3604_vm0, %v3934_v37, %v3936_v11  ;;  %v3953_v40 = vsel %vm3604_vm0, %v3938_v9, %v3940_v14  ;;  %v10384_v9 = vld [vmem:[#allocation4 + $0x4] sm:$0xff] }
 0x47f   : > { %8794 = vmatprep.subr.msk.mxu1 %vm468_vm5, %v3610_v17 }
 0x481   : > { %v3944_v22 = vpop.permute.xlu0 %3943  ;;  %8793 = vmatmul.mubr.msk.f32.vlgmr.msra.gmra.mrb[2].mxu1 %vm464_vm6, %v1919_v10  ;;  %v3942_v24 = vpop.permute.xlu1 %3941 }
 0x482   : > { %8795 = vmatpush1.msk.msra.mxu1 %vm468_vm5, %v3609_v20  ;;  %3838 = vmatprep.mubr.f32.mxu1 %v9474_v1  ;;  %v3954_v50 = vsel %vm3604_vm0, %v3940_v14, %v3942_v24  ;;  %v3955_v36 = vsel %vm3604_vm0, %v3942_v24, %v3944_v22 }
 0x485   : > { %v3948_v43 = vpop.permute.xlu0 %3947  ;;  %v3946_v23 = vpop.permute.xlu1 %3945  ;;  %8796 = vmatmul.mubr.msk.f32.vlgmr.msra.gmra.mrb[4].mxu1 %vm464_vm6, %v1919_v10 }
 0x486   : > { %3909 = vmatprep.mubr.f32.mxu1 %v9474_v1  ;;  %v3956_v56 = vsel %vm3604_vm0, %v3944_v22, %v3946_v23  ;;  %v3957_v16 = vsel %vm3604_vm0, %v3946_v23, %v3948_v43 }
 0x489   : > { %v5663_v34 = vpop.permute.xlu0 %5662  ;;  %v3601_v28 = vpop.permute.xlu1 %3600 }
 0x48a   : > { %v5670_v5 = vrot.slane %v5663_v34, 4  ;;  %v3611_v39 = vsel %vm3604_vm0, %v3599_v35, %v3601_v28  ;;  %v3612_v8 = vsel %vm3604_vm0, %v3601_v28, %v3603_v12  ;;  %v5656_v28 = vld [vmem:[#allocation3 + $0x24] sm:$0xf] }
 0x48b   : > { %8797 = vmatprep.subr.msk.mxu1 %vm468_vm5, %v3612_v8 }
 0x48c   : > { %v10326_v2 = vsel %vm778_vm3, %v5670_v5, %v5663_v34  ;;  %8798 = vmatpush1.msk.msra.mxu1 %vm468_vm5, %v3611_v39 }
 0x48d   : > { %v5686_v30 = vmul.f32 %v10326_v2, %v9963_v46  ;;  %v4328_v32 = vpop.permute.xlu0 %4327  ;;  %8799 = vmatmul.mubr.msk.f32.vlgmr.msra.gmra.mrb[6].mxu1 %vm464_vm6, %v1919_v10  ;;  %8800 = vmatprep.subr.msk.mxu1 %vm468_vm5, %v3952_v57  ;;  %v3950_v49 = vpop.permute.xlu1 %3949  ;;  %v5691_v20 = vmul.f32 %v10326_v2, %v10384_v9 }
 0x48e   : > { %8801 = vmatpush1.msk.msra.mxu1 %vm468_vm5, %v3951_v13  ;;  %4042 = vmatprep.mubr.f32.mxu1 %v9474_v1  ;;  %v3958_v18 = vsel %vm3604_vm0, %v3948_v43, %v3950_v49  ;;  %v10420_v49 = vld [vmem:[#allocation4 + $0x14] sm:$0xff] }
 0x48f   : > { %v5701_v33 = vcombine.high %v5686_v30, %v5686_v30  ;;  %8803 = vmatprep.subr.msk.mxu1 %vm468_vm5, %v3954_v50 }
 0x491   : > { %v4324_v31 = vpop.permute.xlu0 %4323  ;;  %5707 = vrot.lane.b32.xlu0 %v5701_v33, %s9476_s20  ;;  %8802 = vmatmul.mubr.msk.f32.vlgmr.msra.gmra.mrb[0].mxu1 %vm464_vm6, %v1928_v0  ;;  %v4326_v47 = vpop.permute.xlu1 %4325 }
 0x492   : > { %8804 = vmatpush1.msk.msra.mxu1 %vm468_vm5, %v3953_v40  ;;  %4113 = vmatprep.mubr.f32.mxu1 %v9474_v1  ;;  %v4342_v61 = vsel %vm778_vm3, %v4326_v47, %v4328_v32  ;;  %v4341_v3 = vsel %vm778_vm3, %v4324_v31, %v4326_v47  ;;  %v1929_v31 = vld [vmem:[%s10900_s4 + $0xc] sm:$0xf] }
 0x493   : > { %8806 = vmatprep.subr.msk.mxu1 %vm468_vm5, %v3956_v56 }
 0x495   : > { %v4332_v38 = vpop.permute.xlu0 %4331  ;;  %5705 = vrot.lane.b32.xlu0 %v5686_v30, %s9476_s20  ;;  %8805 = vmatmul.mubr.msk.f32.vlgmr.msra.gmra.mrb[2].mxu1 %vm464_vm6, %v1928_v0  ;;  %v5665_v52 = vpop.permute.xlu1 %5664  ;;  %v10414_v30 = vld [vmem:[#allocation4 + $0xc] sm:$0xff] }
 0x496   : > { %8807 = vmatpush1.msk.msra.mxu1 %vm468_vm5, %v3955_v36  ;;  %v5671_v62 = vrot.slane %v5665_v52, 4  ;;  %4184 = vmatprep.mubr.f32.mxu1 %v9474_v1 }
 0x497   : > { %8809 = vmatprep.subr.msk.mxu1 %vm468_vm5, %v3958_v18 }
 0x498   : > { %v5675_v26 = vsel %vm468_vm5, %v5670_v5, %v5671_v62  ;;  %v6047_v5 = vcombine.high %v5691_v20, %v5691_v20 }
 0x499   : > { %v10359_v48 = vsel %vm778_vm3, %v5675_v26, %v5665_v52  ;;  %v4334_v58 = vpop.permute.xlu0 %4333  ;;  %8808 = vmatmul.mubr.msk.f32.vlgmr.msra.gmra.mrb[4].mxu1 %vm464_vm6, %v1928_v0  ;;  %v4330_v59 = vpop.permute.xlu1 %4329 }
 0x49a   : > { %v5687_v41 = vmul.f32 %v10359_v48, %v10007_v44  ;;  %8810 = vmatpush1.msk.msra.mxu1 %vm468_vm5, %v3957_v16  ;;  %4255 = vmatprep.mubr.f32.mxu1 %v9474_v1  ;;  %v4344_v7 = vsel %vm778_vm3, %v4330_v59, %v4332_v38  ;;  %v4343_v11 = vsel %vm778_vm3, %v4328_v32, %v4330_v59  ;;  %v5661_v16 = vld [vmem:[#allocation4 + $0x24] sm:$0xf] }
 0x49b   : > { %8812 = vmatprep.subr.msk.mxu1 %vm468_vm5, %v4342_v61  ;;  %v4345_v24 = vsel %vm778_vm3, %v4332_v38, %v4334_v58  ;;  %v5692_v33 = vmul.f32 %v10359_v48, %v10414_v30  ;;  %v10436_v38 = vld [vmem:[#allocation4 + $0x1c] sm:$0xff] }
 0x49c   : > { %5709 = vrot.lane.b32.xlu1 %v5687_v41, %s9476_s20  ;;  %v5702_v63 = vcombine.high %v5687_v41, %v5687_v41 }
 0x49d   : > { %v5669_v55 = vpop.permute.xlu0 %5668  ;;  %8811 = vmatmul.mubr.msk.f32.vlgmr.msra.gmra.mrb[6].mxu1 %vm464_vm6, %v1928_v0  ;;  %v5667_v35 = vpop.permute.xlu1 %5666  ;;  %v6048_v52 = vcombine.high %v5692_v33, %v5692_v33 }
 0x49e   : > { %v10372_v19 = vrot.slane %v5669_v55, 4  ;;  %8813 = vmatpush1.msk.msra.mxu1 %vm468_vm5, %v4341_v3  ;;  %v5672_v12 = vrot.slane %v5667_v35, 4  ;;  %4432 = vmatprep.mubr.f32.mxu1 %v9474_v1 }
 0x49f   : > { %8815 = vmatprep.subr.msk.mxu1 %vm468_vm5, %v4344_v7 }
 0x4a0   : > { %v5677_v4 = vsel %vm468_vm5, %v5671_v62, %v5672_v12  ;;  %v5679_v21 = vsel %vm468_vm5, %v5672_v12, %v10372_v19  ;;  %5711 = vrot.lane.b32.xlu1 %v5702_v63, %s9476_s20  ;;  %v5690_v2 = vmul.f32 %v10372_v19, %v5656_v28  ;;  %v10458_v63 = vld [vmem:[#allocation3 + $0x4] sm:$0xff] }
 0x4a1   : > { %v5678_v54 = vsel %vm778_vm3, %v5677_v4, %v5667_v35  ;;  %v4340_v10 = vpop.permute.xlu0 %4339  ;;  %8814 = vmatmul.mubr.msk.f32.vlgmr.msra.gmra.mrb[0].mxu1 %vm464_vm6, %v1920_v15  ;;  %v4336_v53 = vpop.permute.xlu1 %4335  ;;  %v5680_v17 = vsel %vm778_vm3, %v5679_v21, %v5669_v55  ;;  %v5695_v55 = vmul.f32 %v10372_v19, %v5661_v16  ;;  %v10466_v4 = vld [vmem:[#allocation3 + $0xc] sm:$0xff] }
 0x4a2   : > { %v5688_v14 = vmul.f32 %v5678_v54, %v10029_v6  ;;  %8816 = vmatpush1.msk.msra.mxu1 %vm468_vm5, %v4343_v11  ;;  %v4346_v37 = vsel %vm778_vm3, %v4334_v58, %v4336_v53  ;;  %4503 = vmatprep.mubr.f32.mxu1 %v9474_v1  ;;  %v10403_v34 = vmul.f32 %v5680_v17, %v10052_v60 }
 0x4a3   : > { %8818 = vmatprep.subr.msk.mxu1 %vm468_vm5, %v4346_v37  ;;  %v5693_v47 = vmul.f32 %v5678_v54, %v10420_v49  ;;  %v5694_v26 = vmul.f32 %v5680_v17, %v10436_v38  ;;  %v1921_v37 = vld [vmem:[%s10899_s3 + $0x10] sm:$0xf] }
 0x4a4   : > { %v5703_v22 = vcombine.high %v5688_v14, %v5688_v14  ;;  %5713 = vrot.lane.b32.xlu0 %v5688_v14, %s9476_s20 }
 0x4a5   : > { %v4674_v43 = vpop.permute.xlu0 %4673  ;;  %8817 = vmatmul.mubr.msk.f32.vlgmr.msra.gmra.mrb[2].mxu1 %vm464_vm6, %v1920_v15  ;;  %v4672_v23 = vpop.permute.xlu1 %4671  ;;  %v6049_v59 = vcombine.high %v5693_v47, %v5693_v47  ;;  %v6050_v19 = vcombine.high %v5694_v26, %v5694_v26 }
 0x4a6   : > { %8819 = vmatpush1.msk.msra.mxu1 %vm468_vm5, %v4345_v24  ;;  %5715 = vrot.lane.b32.xlu1 %v5703_v22, %s9476_s20  ;;  %v4688_v32 = vsel %vm778_vm3, %v4672_v23, %v4674_v43  ;;  %v5704_v22 = vcombine.high %v10403_v34, %v10403_v34 }
 0x4a7   : > { %4574 = vmatprep.mubr.f32.mxu1 %v9474_v1 }
 0x4a8   : > { %5717 = vrot.lane.b32.xlu0 %v10403_v34, %s9476_s20 }
 0x4a9   : > { %v4676_v39 = vpop.permute.xlu0 %4675  ;;  %8820 = vmatmul.mubr.msk.f32.vlgmr.msra.gmra.mrb[4].mxu1 %vm464_vm6, %v1920_v15  ;;  %v4338_v8 = vpop.permute.xlu1 %4337 }
 0x4aa   : > { %v4347_v57 = vsel %vm778_vm3, %v4336_v53, %v4338_v8  ;;  %v4348_v13 = vsel %vm778_vm3, %v4338_v8, %v4340_v10  ;;  %6053 = vrot.lane.b32.xlu1 %v6047_v5, %s9476_s20  ;;  %4645 = vmatprep.mubr.f32.mxu1 %v9474_v1  ;;  %v4689_v62 = vsel %vm778_vm3, %v4674_v43, %v4676_v39 }
 0x4ab   : > { %8821 = vmatprep.subr.msk.mxu1 %vm468_vm5, %v4348_v13  ;;  %v10481_v53 = vcombine.high %v10466_v4, %v10466_v4  ;;  %v9429_v43 = vcombine.low %v10026_v45, %v10026_v45  ;;  %v10512_v45 = vcombine.low %v10049_v42, %v10049_v42  ;;  %v10526_v5 = vcombine.high %v10384_v9, %v10384_v9 }
 0x4ac   : > { %5721 = vrot.lane.b32.xlu0 %v5690_v2, %s9476_s20  ;;  %8822 = vmatpush1.msk.msra.mxu1 %vm468_vm5, %v4347_v57  ;;  %v10541_v8 = vcombine.high %v10414_v30, %v10414_v30  ;;  %v5339_v13 = vcombine.high %v10420_v49, %v10420_v49 }
 0x4ad   : > { %v4680_v50 = vpop.permute.xlu0 %4679  ;;  %8823 = vmatmul.mubr.msk.f32.vlgmr.msra.gmra.mrb[6].mxu1 %vm464_vm6, %v1920_v15  ;;  %8824 = vmatprep.subr.msk.mxu1 %vm468_vm5, %v4688_v32  ;;  %v4670_v0 = vpop.permute.xlu1 %4669 }
 0x4ae   : > { %v4687_v40 = vsel %vm778_vm3, %v4670_v0, %v4672_v23  ;;  %6051 = vrot.lane.b32.xlu1 %v5691_v20, %s9476_s20  ;;  %4778 = vmatprep.mubr.f32.mxu1 %v9474_v1  ;;  %v5340_v0 = vcombine.high %v10436_v38, %v10436_v38 }
 0x4af   : > { %8825 = vmatpush1.msk.msra.mxu1 %vm468_vm5, %v4687_v40 }
 0x4b0   : > { %6055 = vrot.lane.b32.xlu0 %v5692_v33, %s9476_s20 }
 0x4b1   : > { %v4684_v56 = vpop.permute.xlu0 %4683  ;;  %8826 = vmatmul.mubr.msk.f32.vlgmr.msra.gmra.mrb[0].mxu1 %vm464_vm6, %v1929_v31  ;;  %v4678_v36 = vpop.permute.xlu1 %4677 }
 0x4b2   : > { %v4690_v18 = vsel %vm778_vm3, %v4676_v39, %v4678_v36  ;;  %6059 = vrot.lane.b32.xlu1 %v5693_v47, %s9476_s20  ;;  %4849 = vmatprep.mubr.f32.mxu1 %v9474_v1  ;;  %v4691_v3 = vsel %vm778_vm3, %v4678_v36, %v4680_v50 }
 0x4b3   : > { %8827 = vmatprep.subr.msk.mxu1 %vm468_vm5, %v4690_v18 }
 0x4b4   : > { %6057 = vrot.lane.b32.xlu0 %v6048_v52, %s9476_s20  ;;  %8828 = vmatpush1.msk.msra.mxu1 %vm468_vm5, %v4689_v62  ;;  %v6397_v52 = vld [vmem:[#allocation4 + $0x24] sm:$0xf] }
 0x4b5   : > { %v6399_v48 = vpop.permute.xlu0 %6398  ;;  %8829 = vmatmul.mubr.msk.f32.vlgmr.msra.gmra.mrb[2].mxu1 %vm464_vm6, %v1929_v31  ;;  %v4682_v58 = vpop.permute.xlu1 %4681 }
 0x4b6   : > { %v6406_v41 = vrot.slane %v6399_v48, 4  ;;  %v4692_v61 = vsel %vm778_vm3, %v4680_v50, %v4682_v58  ;;  %6063 = vrot.lane.b32.xlu1 %v5694_v26, %s9476_s20  ;;  %4920 = vmatprep.mubr.f32.mxu1 %v9474_v1  ;;  %v4693_v11 = vsel %vm778_vm3, %v4682_v58, %v4684_v56  ;;  %v6392_v50 = vld [vmem:[#allocation3 + $0x24] sm:$0xf]  ;;  %v10602_v26 = vld [vmem:[#allocation3 + $0x14] sm:$0xff] }
 0x4b7   : > { %8830 = vmatprep.subr.msk.mxu1 %vm468_vm5, %v4692_v61  ;;  %v7141_v16 = vcombine.high %v10602_v26, %v10602_v26  ;;  %v7128_v58 = vld [vmem:[#allocation3 + $0x24] sm:$0xf] }
 0x4b8   : > { %v10454_v35 = vsel %vm3604_vm0, %v6406_v41, %v6399_v48  ;;  %6061 = vrot.lane.b32.xlu0 %v6049_v59, %s9476_s20  ;;  %8831 = vmatpush1.msk.msra.mxu1 %vm468_vm5, %v4691_v3  ;;  %v9428_v48 = vld [vmem:[#allocation3 + $0x1c] sm:$0xff] }
 0x4b9   : > { %v6422_v7 = vmul.f32 %v10454_v35, %v9963_v46  ;;  %8832 = vmatmul.mubr.msk.f32.vlgmr.msra.gmra.mrb[4].mxu1 %vm464_vm6, %v1929_v31  ;;  %v4686_v12 = vpop.permute.xlu1 %4685  ;;  %v10472_v46 = vcombine.high %v10458_v63, %v10458_v63  ;;  %v6403_v54 = vpop.permute.xlu0 %6402  ;;  %v6427_v32 = vmul.f32 %v10454_v35, %v10384_v9  ;;  %v1922_v35 = vld [vmem:[%s10899_s3 + $0x14] sm:$0xf] }
 0x4ba   : > { %v4694_v15 = vsel %vm778_vm3, %v4684_v56, %v4686_v12  ;;  %6067 = vrot.lane.b32.xlu1 %v5695_v55, %s9476_s20  ;;  %4991 = vmatprep.mubr.f32.mxu1 %v9474_v1  ;;  %v6408_v17 = vrot.slane %v6403_v54, 4 }
 0x4bb   : > { %v6437_v21 = vcombine.high %v6422_v7, %v6422_v7  ;;  %8833 = vmatprep.subr.msk.mxu1 %vm468_vm5, %v4694_v15  ;;  %v6783_v33 = vcombine.high %v6427_v32, %v6427_v32 }
 0x4bc   : > { %6065 = vrot.lane.b32.xlu0 %v6050_v19, %s9476_s20  ;;  %8834 = vmatpush1.msk.msra.mxu1 %vm468_vm5, %v4693_v11 }
 0x4bd   : > { %8835 = vmatmul.mubr.msk.f32.vlgmr.msra.gmra.mrb[6].mxu1 %vm464_vm6, %v1929_v31  ;;  %8836 = vmatprep.subr.msk.mxu1 %vm468_vm5, %v10472_v46  ;;  %v6401_v10 = vpop.permute.xlu1 %6400 }
 0x4be   : > { %v6407_v14 = vrot.slane %v6401_v10, 4  ;;  %6443 = vrot.lane.b32.xlu1 %v6437_v21, %s9485_s25  ;;  %8837 = vmatpush1.msk.msra.mxu1 %vm468_vm5, %v10458_v63 }
 0x4bf   : > { %8839 = vmatprep.subr.msk.mxu1 %vm468_vm5, %v10481_v53  ;;  %5105 = vmatprep.mubr.f32.mxu1 %v9474_v1 }
 0x4c0   : > { %v6411_v20 = vsel %vm468_vm5, %v6406_v41, %v6407_v14  ;;  %7837 = vrot.lane.b32.xlu0 %v9819_v27, %s9486_s26  ;;  %v6413_v27 = vsel %vm468_vm5, %v6407_v14, %v6408_v17  ;;  %v7133_v41 = vld [vmem:[#allocation4 + $0x24] sm:$0xf] }
 0x4c1   : > { %v6412_v24 = vsel %vm3604_vm0, %v6411_v20, %v6401_v10  ;;  %8838 = vmatmul.mubr.msk.f32.vlgmr.msra.gmra.mrb[0].mxu1 %vm464_vm6, %v1921_v37  ;;  %v6405_v28 = vpop.permute.xlu1 %6404  ;;  %v6414_v34 = vsel %vm3604_vm0, %v6413_v27, %v6403_v54 }
 0x4c2   : > { %v6423_v23 = vmul.f32 %v6412_v24, %v10007_v44  ;;  %8840 = vmatpush1.msk.msra.mxu1 %vm468_vm5, %v10466_v4  ;;  %5719 = vrot.lane.b32.xlu1 %v5704_v22, %s9476_s20  ;;  %v10514_v44 = vrot.slane %v6405_v28, 4  ;;  %v6428_v40 = vmul.f32 %v6412_v24, %v10414_v30 }
 0x4c3   : > { %8842 = vmatprep.subr.msk.mxu1 %vm468_vm5, %v9429_v43  ;;  %5176 = vmatprep.mubr.f32.mxu1 %v9474_v1 }
 0x4c4   : > { %6445 = vrot.lane.b32.xlu0 %v6423_v23, %s9485_s25  ;;  %v6438_v42 = vcombine.high %v6423_v23, %v6423_v23  ;;  %v6415_v39 = vsel %vm468_vm5, %v6408_v17, %v10514_v44  ;;  %v6784_v31 = vcombine.high %v6428_v40, %v6428_v40  ;;  %v6431_v18 = vmul.f32 %v10514_v44, %v6397_v52 }
 0x4c5   : > { %8841 = vmatmul.mubr.msk.f32.vlgmr.msra.gmra.mrb[2].mxu1 %vm464_vm6, %v1921_v37  ;;  %v6416_v2 = vsel %vm3604_vm0, %v6415_v39, %v6405_v28 }
 0x4c6   : > { %8843 = vmatpush1.msk.msra.mxu1 %vm468_vm5, %v10029_v6  ;;  %7839 = vrot.lane.b32.xlu1 %v9899_v25, %s9486_s26  ;;  %v6424_v25 = vmul.f32 %v6414_v34, %v10029_v6  ;;  %v1930_v6 = vld [vmem:[%s10900_s4 + $0x10] sm:$0xf]  ;;  %v6430_v56 = vmul.f32 %v6416_v2, %v10436_v38 }
 0x4c7   : > { %8845 = vmatprep.subr.msk.mxu1 %vm468_vm5, %v10512_v45  ;;  %5247 = vmatprep.mubr.f32.mxu1 %v9474_v1 }
 0x4c8   : > { %6441 = vrot.lane.b32.xlu0 %v6422_v7, %s9485_s25  ;;  %v6439_v57 = vcombine.high %v6424_v25, %v6424_v25  ;;  %v6786_v62 = vcombine.high %v6430_v56, %v6430_v56 }
 0x4c9   : > { %8844 = vmatmul.mubr.msk.f32.vlgmr.msra.gmra.mrb[4].mxu1 %vm464_vm6, %v1921_v37 }
 0x4ca   : > { %8846 = vmatpush1.msk.msra.mxu1 %vm468_vm5, %v10052_v60  ;;  %6447 = vrot.lane.b32.xlu1 %v6438_v42, %s9485_s25 }
 0x4cb   : > { %5318 = vmatprep.mubr.f32.mxu1 %v9474_v1  ;;  %8848 = vmatprep.subr.msk.mxu1 %vm468_vm5, %v10526_v5 }
 0x4cc   : > { %6449 = vrot.lane.b32.xlu0 %v6424_v25, %s9485_s25 }
 0x4cd   : > { %8847 = vmatmul.mubr.msk.f32.vlgmr.msra.gmra.mrb[6].mxu1 %vm464_vm6, %v1921_v37 }
 0x4ce   : > { %7841 = vrot.lane.b32.xlu1 %v9913_v29, %s9486_s26  ;;  %8849 = vmatpush1.msk.msra.mxu1 %vm468_vm5, %v10384_v9  ;;  %v6425_v29 = vmul.f32 %v6416_v2, %v10052_v60  ;;  %v6426_v60 = vmul.f32 %v10514_v44, %v6392_v50 }
 0x4cf   : > { %5424 = vmatprep.mubr.f32.mxu1 %v9474_v1  ;;  %8851 = vmatprep.subr.msk.mxu1 %vm468_vm5, %v10541_v8 }
 0x4d0   : > { %6451 = vrot.lane.b32.xlu0 %v6439_v57, %s9485_s25  ;;  %v6440_v47 = vcombine.high %v6425_v29, %v6425_v29 }
 0x4d1   : > { %8850 = vmatmul.mubr.msk.f32.vlgmr.msra.gmra.mrb[0].mxu1 %vm464_vm6, %v1930_v6 }
 0x4d2   : > { %6453 = vrot.lane.b32.xlu1 %v6425_v29, %s9485_s25  ;;  %8852 = vmatpush1.msk.msra.mxu1 %vm468_vm5, %v10414_v30 }
 0x4d3   : > { %5495 = vmatprep.mubr.f32.mxu1 %v9474_v1  ;;  %8854 = vmatprep.subr.msk.mxu1 %vm468_vm5, %v5339_v13 }
 0x4d4   : > { %7843 = vrot.lane.b32.xlu0 %v9869_v51, %s9486_s26  ;;  %v6429_v51 = vmul.f32 %v6414_v34, %v10420_v49  ;;  %s9489_s26 = smov 96  }
 0x4d5   : > { %8853 = vmatmul.mubr.msk.f32.vlgmr.msra.gmra.mrb[2].mxu1 %vm464_vm6, %v1930_v6 }
 0x4d6   : > { %6789 = vrot.lane.b32.xlu1 %v6783_v33, %s9485_s25  ;;  %8855 = vmatpush1.msk.msra.mxu1 %vm468_vm5, %v10420_v49  ;;  %v6785_v36 = vcombine.high %v6429_v51, %v6429_v51 }
 0x4d7   : > { %5566 = vmatprep.mubr.f32.mxu1 %v9474_v1  ;;  %8857 = vmatprep.subr.msk.mxu1 %vm468_vm5, %v5340_v0 }
 0x4d8   : > { %6457 = vrot.lane.b32.xlu0 %v6426_v60, %s9485_s25 }
 0x4d9   : > { %8856 = vmatmul.mubr.msk.f32.vlgmr.msra.gmra.mrb[4].mxu1 %vm464_vm6, %v1930_v6 }
 0x4da   : > { %6787 = vrot.lane.b32.xlu1 %v6427_v32, %s9485_s25  ;;  %8858 = vmatpush1.msk.msra.mxu1 %vm468_vm5, %v10436_v38 }
 0x4db   : > { %5637 = vmatprep.mubr.f32.mxu1 %v9474_v1 }
 0x4dc   : > { %6791 = vrot.lane.b32.xlu0 %v6428_v40, %s9485_s25 }
 0x4dd   : > { %8859 = vmatmul.mubr.msk.f32.vlgmr.msra.gmra.mrb[6].mxu1 %vm464_vm6, %v1930_v6 }
 0x4de   : > { %6795 = vrot.lane.b32.xlu1 %v6429_v51, %s9485_s25  ;;  %5814 = vmatprep.mubr.f32.mxu1 %v9474_v1 }
 0x4e0   : > { %6793 = vrot.lane.b32.xlu0 %v6784_v31, %s9485_s25 }
 0x4e2   : > { %6455 = vrot.lane.b32.xlu1 %v6440_v47, %s9485_s25 }
 0x4e4   : > { %6797 = vrot.lane.b32.xlu0 %v6785_v36, %s9485_s25 }
 0x4e6   : > { %6799 = vrot.lane.b32.xlu1 %v6430_v56, %s9485_s25 }
 0x4e8   : > { %6801 = vrot.lane.b32.xlu0 %v6786_v62, %s9485_s25 }
 0x4ea   : > { %6803 = vrot.lane.b32.xlu1 %v6431_v18, %s9485_s25 }
 0x4ec   : > { %7145 = vrot.lane.b32.xlu0 %v10472_v46, %s9489_s26 }
 0x4ee   : > { %7147 = vrot.lane.b32.xlu1 %v10466_v4, %s9489_s26 }
 0x4f0   : > { %7143 = vrot.lane.b32.xlu0 %v10458_v63, %s9489_s26 }
 0x4f2   : > { %7149 = vrot.lane.b32.xlu1 %v10481_v53, %s9489_s26 }
 0x4f4   : > { %7151 = vrot.lane.b32.xlu0 %v10602_v26, %s9489_s26 }
 0x4f6   : > { %7153 = vrot.lane.b32.xlu1 %v7141_v16, %s9489_s26 }
 0x4f8   : > { %7155 = vrot.lane.b32.xlu0 %v9428_v48, %s9489_s26 }
 0x4fa   : > { %7157 = vrot.lane.b32.xlu1 %v10512_v45, %s9489_s26 }
 0x4fc   : > { %7159 = vrot.lane.b32.xlu0 %v7128_v58, %s9489_s26 }
 0x4fe   : > { %7492 = vrot.lane.b32.xlu1 %v10526_v5, %s9489_s26 }
 0x500   : > { %7494 = vrot.lane.b32.xlu0 %v10414_v30, %s9489_s26 }
 0x502   : > { %7490 = vrot.lane.b32.xlu1 %v10384_v9, %s9489_s26 }
 0x503   : > { %v5708_v59 = vpop.permute.xlu0 %5707 }
 0x504   : > { %7496 = vrot.lane.b32.xlu0 %v10541_v8, %s9489_s26 }
 0x506   : > { %7498 = vrot.lane.b32.xlu1 %v10420_v49, %s9489_s26 }
 0x507   : > { %v5706_v61 = vpop.permute.xlu0 %5705 }
 0x508   : > { %7500 = vrot.lane.b32.xlu0 %v5339_v13, %s9489_s26  ;;  %v5723_v7 = vsel %vm763_vm2, %v5706_v61, %v5708_v59 }
 0x50a   : > { %7502 = vrot.lane.b32.xlu1 %v10436_v38, %s9489_s26 }
 0x50c   : > { %7504 = vrot.lane.b32.xlu0 %v5340_v0, %s9489_s26 }
 0x50e   : > { %v5710_v3 = vpop.permute.xlu1 %5709  ;;  %7506 = vrot.lane.b32.xlu1 %v7133_v41, %s9489_s26 }
 0x50f   : > { %v5724_v55 = vsel %vm763_vm2, %v5708_v59, %v5710_v3 }
 0x510   : > { %8860 = vmatprep.subr.msk.mxu1 %vm468_vm5, %v5724_v55 }
 0x511   : > { %8861 = vmatpush1.msk.msra.mxu1 %vm468_vm5, %v5723_v7 }
 0x512   : > { %8862 = vmatmul.mubr.msk.f32.vlgmr.msra.gmra.mrb[0].mxu1 %vm464_vm6, %v1922_v35  ;;  %v5712_v12 = vpop.permute.xlu1 %5711 }
 0x513   : > { %5885 = vmatprep.mubr.f32.mxu1 %v9474_v1  ;;  %v5725_v21 = vsel %vm763_vm2, %v5710_v3, %v5712_v12 }
 0x516   : > { %v5714_v15 = vpop.permute.xlu0 %5713 }
 0x517   : > { %v5726_v19 = vsel %vm763_vm2, %v5712_v12, %v5714_v15 }
 0x518   : > { %8863 = vmatprep.subr.msk.mxu1 %vm468_vm5, %v5726_v19  ;;  %v5716_v11 = vpop.permute.xlu1 %5715 }
 0x519   : > { %8864 = vmatpush1.msk.msra.mxu1 %vm468_vm5, %v5725_v21  ;;  %v5727_v10 = vsel %vm763_vm2, %v5714_v15, %v5716_v11  ;;  %v1923_v21 = vld [vmem:[%s10899_s3 + $0x18] sm:$0xf] }
 0x51a   : > { %v5718_v46 = vpop.permute.xlu0 %5717  ;;  %8865 = vmatmul.mubr.msk.f32.vlgmr.msra.gmra.mrb[2].mxu1 %vm464_vm6, %v1922_v35 }
 0x51b   : > { %v5728_v54 = vsel %vm763_vm2, %v5716_v11, %v5718_v46  ;;  %5956 = vmatprep.mubr.f32.mxu1 %v9474_v1 }
 0x51c   : > { %8866 = vmatprep.subr.msk.mxu1 %vm468_vm5, %v5728_v54  ;;  %v6054_v53 = vpop.permute.xlu1 %6053 }
 0x51d   : > { %8867 = vmatpush1.msk.msra.mxu1 %vm468_vm5, %v5727_v10 }
 0x51e   : > { %v5722_v14 = vpop.permute.xlu0 %5721  ;;  %8868 = vmatmul.mubr.msk.f32.vlgmr.msra.gmra.mrb[4].mxu1 %vm464_vm6, %v1922_v35 }
 0x51f   : > { %6027 = vmatprep.mubr.f32.mxu1 %v9474_v1 }
 0x520   : > { %v6052_v37 = vpop.permute.xlu1 %6051 }
 0x521   : > { %v6069_v57 = vsel %vm763_vm2, %v6052_v37, %v6054_v53 }
 0x522   : > { %v6056_v17 = vpop.permute.xlu0 %6055 }
 0x523   : > { %v6070_v2 = vsel %vm763_vm2, %v6054_v53, %v6056_v17 }
 0x524   : > { %v6060_v20 = vpop.permute.xlu1 %6059 }
 0x526   : > { %v6058_v22 = vpop.permute.xlu0 %6057 }
 0x527   : > { %v6072_v32 = vsel %vm763_vm2, %v6058_v22, %v6060_v20  ;;  %v6071_v33 = vsel %vm763_vm2, %v6056_v17, %v6058_v22 }
 0x528   : > { %v6064_v24 = vpop.permute.xlu1 %6063 }
 0x52a   : > { %v6062_v43 = vpop.permute.xlu0 %6061 }
 0x52b   : > { %v6074_v51 = vsel %vm763_vm2, %v6062_v43, %v6064_v24  ;;  %v6073_v56 = vsel %vm763_vm2, %v6060_v20, %v6062_v43 }
 0x52c   : > { %v6068_v23 = vpop.permute.xlu1 %6067 }
 0x52e   : > { %v6066_v28 = vpop.permute.xlu0 %6065 }
 0x52f   : > { %v6076_v52 = vsel %vm763_vm2, %v6066_v28, %v6068_v23  ;;  %v6075_v48 = vsel %vm763_vm2, %v6064_v24, %v6066_v28 }
 0x530   : > { %v10636_v27 = vpop.permute.xlu1 %6443 }
 0x532   : > { %v7838_v45 = vpop.permute.xlu0 %7837 }
 0x533   : > { %v7845_v44 = vrot.slane %v7838_v45, 4 }
 0x534   : > { %v5720_v34 = vpop.permute.xlu1 %5719 }
 0x535   : > { %v7849_v5 = vsel %vm2095_vm13, %v7845_v44, %v7838_v45  ;;  %v5729_v42 = vsel %vm763_vm2, %v5718_v46, %v5720_v34  ;;  %v5730_v39 = vsel %vm763_vm2, %v5720_v34, %v5722_v14  ;;  %v7831_v14 = vld [vmem:[#allocation3 + $0x24] sm:$0xf] }
 0x536   : > { %v7861_v25 = vmul.f32 %v7849_v5, %v10458_v63  ;;  %v10642_v8 = vpop.permute.xlu0 %6445  ;;  %8869 = vmatprep.subr.msk.mxu1 %vm468_vm5, %v5730_v39  ;;  %v1931_v63 = vld [vmem:[%s10900_s4 + $0x14] sm:$0xf]  ;;  %v7866_v7 = vmul.f32 %v7849_v5, %v10384_v9  ;;  %v7830_v9 = vld [vmem:[#allocation3 + $0x1c] sm:$0xff] }
 0x537   : > { %8870 = vmatpush1.msk.msra.mxu1 %vm468_vm5, %v5729_v42  ;;  %v6460_v41 = vsel %vm3554_vm14, %v10636_v27, %v10642_v8 }
 0x538   : > { %v7876_v6 = vcombine.high %v7861_v25, %v7861_v25  ;;  %8871 = vmatmul.mubr.msk.f32.vlgmr.msra.gmra.mrb[6].mxu1 %vm464_vm6, %v1922_v35  ;;  %8872 = vmatprep.subr.msk.mxu1 %vm468_vm5, %v6070_v2  ;;  %v7840_v13 = vpop.permute.xlu1 %7839  ;;  %v8222_v10 = vcombine.high %v7866_v7, %v7866_v7 }
 0x539   : > { %v7846_v29 = vrot.slane %v7840_v13, 4  ;;  %8873 = vmatpush1.msk.msra.mxu1 %vm468_vm5, %v6069_v57  ;;  %6160 = vmatprep.mubr.f32.mxu1 %v9474_v1 }
 0x53a   : > { %v6442_v50 = vpop.permute.xlu0 %6441  ;;  %7882 = vrot.lane.b32.xlu0 %v7876_v6, %s9484_s15  ;;  %8875 = vmatprep.subr.msk.mxu1 %vm468_vm5, %v6072_v32 }
 0x53b   : > { %v7850_v0 = vsel %vm468_vm5, %v7845_v44, %v7846_v29  ;;  %v6459_v12 = vsel %vm3554_vm14, %v6442_v50, %v10636_v27 }
 0x53c   : > { %v10661_v60 = vsel %vm2095_vm13, %v7850_v0, %v7840_v13  ;;  %8874 = vmatmul.mubr.msk.f32.vlgmr.msra.gmra.mrb[0].mxu1 %vm464_vm6, %v1931_v63  ;;  %v6448_v40 = vpop.permute.xlu1 %6447 }
 0x53d   : > { %v7862_v31 = vmul.f32 %v10661_v60, %v10466_v4  ;;  %8876 = vmatpush1.msk.msra.mxu1 %vm468_vm5, %v6071_v33  ;;  %6231 = vmatprep.mubr.f32.mxu1 %v9474_v1  ;;  %v6461_v53 = vsel %vm3554_vm14, %v10642_v8, %v6448_v40  ;;  %v7867_v27 = vmul.f32 %v10661_v60, %v10414_v30 }
 0x53e   : > { %8878 = vmatprep.subr.msk.mxu1 %vm468_vm5, %v6074_v51  ;;  %v6450_v47 = vpop.permute.xlu0 %6449  ;;  %7880 = vrot.lane.b32.xlu0 %v7861_v25, %s9484_s15 }
 0x53f   : > { %7884 = vrot.lane.b32.xlu1 %v7862_v31, %s9484_s15  ;;  %v7877_v18 = vcombine.high %v7862_v31, %v7862_v31  ;;  %v6462_v15 = vsel %vm3554_vm14, %v6448_v40, %v6450_v47  ;;  %v8223_v42 = vcombine.high %v7867_v27, %v7867_v27 }
 0x540   : > { %8877 = vmatmul.mubr.msk.f32.vlgmr.msra.gmra.mrb[2].mxu1 %vm464_vm6, %v1931_v63  ;;  %v7842_v36 = vpop.permute.xlu1 %7841 }
 0x541   : > { %8879 = vmatpush1.msk.msra.mxu1 %vm468_vm5, %v6073_v56  ;;  %v7847_v4 = vrot.slane %v7842_v36, 4  ;;  %6302 = vmatprep.mubr.f32.mxu1 %v9474_v1 }
 0x542   : > { %8881 = vmatprep.subr.msk.mxu1 %vm468_vm5, %v6076_v52  ;;  %v6452_v62 = vpop.permute.xlu0 %6451 }
 0x543   : > { %v7852_v16 = vsel %vm468_vm5, %v7846_v29, %v7847_v4  ;;  %7886 = vrot.lane.b32.xlu1 %v7877_v18, %s9484_s15  ;;  %v6463_v24 = vsel %vm3554_vm14, %v6450_v47, %v6452_v62  ;;  %v8563_v47 = vld [vmem:[%s10902_s6] sm:$0xf] }
 0x544   : > { %v7853_v58 = vsel %vm2095_vm13, %v7852_v16, %v7842_v36  ;;  %8880 = vmatmul.mubr.msk.f32.vlgmr.msra.gmra.mrb[4].mxu1 %vm464_vm6, %v1931_v63  ;;  %v6454_v59 = vpop.permute.xlu1 %6453 }
 0x545   : > { %v7863_v61 = vmul.f32 %v7853_v58, %v10602_v26  ;;  %8882 = vmatpush1.msk.msra.mxu1 %vm468_vm5, %v6075_v48  ;;  %6373 = vmatprep.mubr.f32.mxu1 %v9474_v1  ;;  %v6464_v17 = vsel %vm3554_vm14, %v6452_v62, %v6454_v59  ;;  %v7868_v39 = vmul.f32 %v7853_v58, %v10420_v49  ;;  %v1932_v49 = vld [vmem:[%s10900_s4 + $0x18] sm:$0xf]  ;;  %v1924_v48 = vld [vmem:[%s10899_s3 + $0x1c] sm:$0xf] }
 0x546   : > { %8884 = vmatprep.subr.msk.mxu1 %vm468_vm5, %v6460_v41  ;;  %v7844_v3 = vpop.permute.xlu0 %7843 }
 0x547   : > { %v7878_v55 = vcombine.high %v7863_v61, %v7863_v61  ;;  %v10690_v35 = vrot.slane %v7844_v3, 4  ;;  %7888 = vrot.lane.b32.xlu0 %v7863_v61, %s9484_s15  ;;  %v8224_v6 = vcombine.high %v7868_v39, %v7868_v39 }
 0x548   : > { %8883 = vmatmul.mubr.msk.f32.vlgmr.msra.gmra.mrb[6].mxu1 %vm464_vm6, %v1931_v63  ;;  %v6790_v26 = vpop.permute.xlu1 %6789  ;;  %v7836_v63 = vld [vmem:[#allocation4 + $0x24] sm:$0xf] }
 0x549   : > { %v7854_v19 = vsel %vm468_vm5, %v7847_v4, %v10690_v35  ;;  %8885 = vmatpush1.msk.msra.mxu1 %vm468_vm5, %v6459_v12  ;;  %7890 = vrot.lane.b32.xlu1 %v7878_v55, %s9484_s15  ;;  %v7865_v22 = vmul.f32 %v10690_v35, %v7831_v14  ;;  %v7870_v33 = vmul.f32 %v10690_v35, %v7836_v63 }
 0x54a   : > { %v7855_v11 = vsel %vm2095_vm13, %v7854_v19, %v7844_v3  ;;  %8887 = vmatprep.subr.msk.mxu1 %vm468_vm5, %v6462_v15  ;;  %v6458_v46 = vpop.permute.xlu0 %6457  ;;  %6550 = vmatprep.mubr.f32.mxu1 %v9474_v1 }
 0x54b   : > { %v7864_v54 = vmul.f32 %v7855_v11, %v7830_v9  ;;  %v7869_v13 = vmul.f32 %v7855_v11, %v10436_v38 }
 0x54c   : > { %8886 = vmatmul.mubr.msk.f32.vlgmr.msra.gmra.mrb[0].mxu1 %vm464_vm6, %v1923_v21  ;;  %v6788_v37 = vpop.permute.xlu1 %6787 }
 0x54d   : > { %8888 = vmatpush1.msk.msra.mxu1 %vm468_vm5, %v6461_v53  ;;  %7892 = vrot.lane.b32.xlu0 %v7864_v54, %s9484_s15  ;;  %v7879_v43 = vcombine.high %v7864_v54, %v7864_v54  ;;  %v6805_v25 = vsel %vm3554_vm14, %v6788_v37, %v6790_v26  ;;  %v8225_v38 = vcombine.high %v7869_v13, %v7869_v13  ;;  %v1933_v54 = vld [vmem:[%s10900_s4 + $0x1c] sm:$0xf] }
 0x54e   : > { %8228 = vrot.lane.b32.xlu1 %v8222_v10, %s9484_s15  ;;  %8890 = vmatprep.subr.msk.mxu1 %vm468_vm5, %v6464_v17  ;;  %v6792_v20 = vpop.permute.xlu0 %6791 }
 0x54f   : > { %6621 = vmatprep.mubr.f32.mxu1 %v9474_v1  ;;  %v6806_v30 = vsel %vm3554_vm14, %v6790_v26, %v6792_v20 }
 0x550   : > { %8889 = vmatmul.mubr.msk.f32.vlgmr.msra.gmra.mrb[2].mxu1 %vm464_vm6, %v1923_v21  ;;  %v6796_v23 = vpop.permute.xlu1 %6795 }
 0x551   : > { %8891 = vmatpush1.msk.msra.mxu1 %vm468_vm5, %v6463_v24  ;;  %7896 = vrot.lane.b32.xlu0 %v7865_v22, %s9484_s15 }
 0x552   : > { %7894 = vrot.lane.b32.xlu1 %v7879_v43, %s9484_s15  ;;  %v6794_v28 = vpop.permute.xlu0 %6793  ;;  %6692 = vmatprep.mubr.f32.mxu1 %v9474_v1 }
 0x553   : > { %v6808_v2 = vsel %vm3554_vm14, %v6794_v28, %v6796_v23  ;;  %v6807_v32 = vsel %vm3554_vm14, %v6792_v20, %v6794_v28 }
 0x554   : > { %8892 = vmatmul.mubr.msk.f32.vlgmr.msra.gmra.mrb[4].mxu1 %vm464_vm6, %v1923_v21  ;;  %v6456_v45 = vpop.permute.xlu1 %6455 }
 0x555   : > { %v6465_v44 = vsel %vm3554_vm14, %v6454_v59, %v6456_v45  ;;  %v6466_v34 = vsel %vm3554_vm14, %v6456_v45, %v6458_v46  ;;  %8230 = vrot.lane.b32.xlu0 %v7867_v27, %s9484_s15  ;;  %6763 = vmatprep.mubr.f32.mxu1 %v9474_v1 }
 0x556   : > { %8226 = vrot.lane.b32.xlu1 %v7866_v7, %s9484_s15  ;;  %v6798_v5 = vpop.permute.xlu0 %6797  ;;  %8893 = vmatprep.subr.msk.mxu1 %vm468_vm5, %v6466_v34 }
 0x557   : > { %8894 = vmatpush1.msk.msra.mxu1 %vm468_vm5, %v6465_v44  ;;  %v6809_v60 = vsel %vm3554_vm14, %v6796_v23, %v6798_v5  ;;  %v1925_v44 = vld [vmem:[%s10899_s3 + $0x20] sm:$0xf] }
 0x558   : > { %8895 = vmatmul.mubr.msk.f32.vlgmr.msra.gmra.mrb[6].mxu1 %vm464_vm6, %v1923_v21  ;;  %8896 = vmatprep.subr.msk.mxu1 %vm468_vm5, %v6806_v30  ;;  %v6800_v8 = vpop.permute.xlu1 %6799 }
 0x559   : > { %8232 = vrot.lane.b32.xlu0 %v8223_v42, %s9484_s15  ;;  %8897 = vmatpush1.msk.msra.mxu1 %vm468_vm5, %v6805_v25  ;;  %v6810_v50 = vsel %vm3554_vm14, %v6798_v5, %v6800_v8 }
 0x55a   : > { %8234 = vrot.lane.b32.xlu1 %v7868_v39, %s9484_s15  ;;  %v6802_v57 = vpop.permute.xlu0 %6801  ;;  %8899 = vmatprep.subr.msk.mxu1 %vm468_vm5, %v6808_v2 }
 0x55b   : > { %6896 = vmatprep.mubr.f32.mxu1 %v9474_v1  ;;  %v6811_v56 = vsel %vm3554_vm14, %v6800_v8, %v6802_v57 }
 0x55c   : > { %8898 = vmatmul.mubr.msk.f32.vlgmr.msra.gmra.mrb[0].mxu1 %vm464_vm6, %v1932_v49  ;;  %v6804_v29 = vpop.permute.xlu1 %6803 }
 0x55d   : > { %8900 = vmatpush1.msk.msra.mxu1 %vm468_vm5, %v6807_v32  ;;  %8236 = vrot.lane.b32.xlu0 %v8224_v6, %s9484_s15  ;;  %v6812_v51 = vsel %vm3554_vm14, %v6802_v57, %v6804_v29 }
 0x55e   : > { %8238 = vrot.lane.b32.xlu1 %v7869_v13, %s9484_s15  ;;  %8902 = vmatprep.subr.msk.mxu1 %vm468_vm5, %v6810_v50  ;;  %v7146_v0 = vpop.permute.xlu0 %7145 }
 0x55f   : > { %6967 = vmatprep.mubr.f32.mxu1 %v9474_v1 }
 0x560   : > { %8901 = vmatmul.mubr.msk.f32.vlgmr.msra.gmra.mrb[2].mxu1 %vm464_vm6, %v1932_v49  ;;  %v7148_v40 = vpop.permute.xlu1 %7147 }
 0x561   : > { %8903 = vmatpush1.msk.msra.mxu1 %vm468_vm5, %v6809_v60  ;;  %8240 = vrot.lane.b32.xlu0 %v8225_v38, %s9484_s15  ;;  %v7163_v52 = vsel %vm7161_vm1, %v7146_v0, %v7148_v40 }
 0x562   : > { %8242 = vrot.lane.b32.xlu1 %v7870_v33, %s9484_s15  ;;  %8905 = vmatprep.subr.msk.mxu1 %vm468_vm5, %v6812_v51  ;;  %v7144_v31 = vpop.permute.xlu0 %7143  ;;  %v1934_v33 = vld [vmem:[%s10900_s4 + $0x20] sm:$0xf] }
 0x563   : > { %7038 = vmatprep.mubr.f32.mxu1 %v9474_v1  ;;  %v7162_v62 = vsel %vm7161_vm1, %v7144_v31, %v7146_v0 }
 0x564   : > { %8904 = vmatmul.mubr.msk.f32.vlgmr.msra.gmra.mrb[4].mxu1 %vm464_vm6, %v1932_v49  ;;  %v7150_v36 = vpop.permute.xlu1 %7149 }
 0x565   : > { %8906 = vmatpush1.msk.msra.mxu1 %vm468_vm5, %v6811_v56  ;;  %8566 = vperm.xlu0 %9406, %v8563_v47   ;;  %v7164_v41 = vsel %vm7161_vm1, %v7148_v40, %v7150_v36 }
 0x566   : > { %8908 = vmatprep.subr.msk.mxu1 %vm468_vm5, %v7163_v52  ;;  %v7152_v18 = vpop.permute.xlu0 %7151  ;;  %7109 = vmatprep.mubr.f32.mxu1 %v9474_v1 }
 0x567   : > { %v7165_v4 = vsel %vm7161_vm1, %v7150_v36, %v7152_v18 }
 0x568   : > { %8907 = vmatmul.mubr.msk.f32.vlgmr.msra.gmra.mrb[6].mxu1 %vm464_vm6, %v1932_v49  ;;  %v7154_v16 = vpop.permute.xlu1 %7153 }
 0x569   : > { %8909 = vmatpush1.msk.msra.mxu1 %vm468_vm5, %v7162_v62  ;;  %7253 = vmatprep.mubr.f32.mxu1 %v9474_v1  ;;  %v7166_v35 = vsel %vm7161_vm1, %v7152_v18, %v7154_v16 }
 0x56a   : > { %8911 = vmatprep.subr.msk.mxu1 %vm468_vm5, %v7165_v4  ;;  %v7156_v58 = vpop.permute.xlu0 %7155 }
 0x56b   : > { %v7167_v59 = vsel %vm7161_vm1, %v7154_v16, %v7156_v58 }
 0x56c   : > { %8910 = vmatmul.mubr.msk.f32.vlgmr.msra.gmra.mrb[0].mxu1 %vm464_vm6, %v1924_v48  ;;  %v7158_v61 = vpop.permute.xlu1 %7157 }
 0x56d   : > { %8912 = vmatpush1.msk.msra.mxu1 %vm468_vm5, %v7164_v41  ;;  %7324 = vmatprep.mubr.f32.mxu1 %v9474_v1  ;;  %v7168_v15 = vsel %vm7161_vm1, %v7156_v58, %v7158_v61 }
 0x56e   : > { %8914 = vmatprep.subr.msk.mxu1 %vm468_vm5, %v7167_v59  ;;  %v7160_v3 = vpop.permute.xlu0 %7159 }
 0x56f   : > { %v7169_v55 = vsel %vm7161_vm1, %v7158_v61, %v7160_v3 }
 0x570   : > { %8913 = vmatmul.mubr.msk.f32.vlgmr.msra.gmra.mrb[2].mxu1 %vm464_vm6, %v1924_v48  ;;  %v7493_v7 = vpop.permute.xlu1 %7492 }
 0x571   : > { %8915 = vmatpush1.msk.msra.mxu1 %vm468_vm5, %v7166_v35  ;;  %7395 = vmatprep.mubr.f32.mxu1 %v9474_v1 }
 0x572   : > { %8917 = vmatprep.subr.msk.mxu1 %vm468_vm5, %v7169_v55  ;;  %v7495_v12 = vpop.permute.xlu0 %7494 }
 0x573   : > { %v7509_v26 = vsel %vm7161_vm1, %v7493_v7, %v7495_v12 }
 0x574   : > { %8916 = vmatmul.mubr.msk.f32.vlgmr.msra.gmra.mrb[4].mxu1 %vm464_vm6, %v1924_v48  ;;  %v7491_v19 = vpop.permute.xlu1 %7490 }
 0x575   : > { %8918 = vmatpush1.msk.msra.mxu1 %vm468_vm5, %v7168_v15  ;;  %7466 = vmatprep.mubr.f32.mxu1 %v9474_v1  ;;  %v7508_v9 = vsel %vm7161_vm1, %v7491_v19, %v7493_v7 }
 0x576   : > { %v7497_v21 = vpop.permute.xlu0 %7496  ;;  %8920 = vmatprep.subr.msk.mxu1 %vm468_vm5, %v7509_v26 }
 0x577   : > { %v7510_v10 = vsel %vm7161_vm1, %v7495_v12, %v7497_v21 }
 0x578   : > { %8919 = vmatmul.mubr.msk.f32.vlgmr.msra.gmra.mrb[6].mxu1 %vm464_vm6, %v1924_v48  ;;  %v7499_v11 = vpop.permute.xlu1 %7498 }
 0x579   : > { %8921 = vmatpush1.msk.msra.mxu1 %vm468_vm5, %v7508_v9  ;;  %v7511_v46 = vsel %vm7161_vm1, %v7497_v21, %v7499_v11  ;;  %7599 = vmatprep.mubr.f32.mxu1 %v9474_v1 }
 0x57a   : > { %v7501_v53 = vpop.permute.xlu0 %7500  ;;  %8923 = vmatprep.subr.msk.mxu1 %vm468_vm5, %v7511_v46 }
 0x57b   : > { %v7512_v17 = vsel %vm7161_vm1, %v7499_v11, %v7501_v53 }
 0x57c   : > { %8922 = vmatmul.mubr.msk.f32.vlgmr.msra.gmra.mrb[0].mxu1 %vm464_vm6, %v1933_v54  ;;  %v7503_v14 = vpop.permute.xlu1 %7502 }
 0x57d   : > { %8924 = vmatpush1.msk.msra.mxu1 %vm468_vm5, %v7510_v10  ;;  %v7513_v37 = vsel %vm7161_vm1, %v7501_v53, %v7503_v14  ;;  %7670 = vmatprep.mubr.f32.mxu1 %v9474_v1 }
 0x57e   : > { %8926 = vmatprep.subr.msk.mxu1 %vm468_vm5, %v7513_v37  ;;  %v7505_v20 = vpop.permute.xlu0 %7504 }
 0x57f   : > { %v7514_v43 = vsel %vm7161_vm1, %v7503_v14, %v7505_v20 }
 0x580   : > { %8925 = vmatmul.mubr.msk.f32.vlgmr.msra.gmra.mrb[2].mxu1 %vm464_vm6, %v1933_v54  ;;  %v7507_v22 = vpop.permute.xlu1 %7506 }
 0x581   : > { %8927 = vmatpush1.msk.msra.mxu1 %vm468_vm5, %v7512_v17  ;;  %v7515_v24 = vsel %vm7161_vm1, %v7505_v20, %v7507_v22  ;;  %7741 = vmatprep.mubr.f32.mxu1 %v9474_v1 }
 0x582   : > { %8929 = vmatprep.subr.msk.mxu1 %vm468_vm5, %v7515_v24 }
 0x584   : > { %8928 = vmatmul.mubr.msk.f32.vlgmr.msra.gmra.mrb[4].mxu1 %vm464_vm6, %v1933_v54 }
 0x585   : > { %8930 = vmatpush1.msk.msra.mxu1 %vm468_vm5, %v7514_v43  ;;  %7812 = vmatprep.mubr.f32.mxu1 %v9474_v1 }
 0x588   : > { %8931 = vmatmul.mubr.msk.f32.vlgmr.msra.gmra.mrb[6].mxu1 %vm464_vm6, %v1933_v54 }
 0x589   : > { %7989 = vmatprep.mubr.f32.mxu1 %v9474_v1 }
 0x5ac   : > { %v7883_v23 = vpop.permute.xlu0 %7882 }
 0x5b0   : > { %v7881_v28 = vpop.permute.xlu0 %7880 }
 0x5b1   : > { %v7885_v27 = vpop.permute.xlu1 %7884  ;;  %v7898_v34 = vsel %vm2045_vm10, %v7881_v28, %v7883_v23 }
 0x5b2   : > { %v7899_v45 = vsel %vm2045_vm10, %v7883_v23, %v7885_v27 }
 0x5b3   : > { %8932 = vmatprep.subr.msk.mxu1 %vm468_vm5, %v7899_v45 }
 0x5b4   : > { %8933 = vmatpush1.msk.msra.mxu1 %vm468_vm5, %v7898_v34 }
 0x5b5   : > { %8934 = vmatmul.mubr.msk.f32.vlgmr.msra.gmra.mrb[0].mxu1 %vm464_vm6, %v1925_v44  ;;  %v7887_v5 = vpop.permute.xlu1 %7886 }
 0x5b6   : > { %8060 = vmatprep.mubr.f32.mxu1 %v9474_v1  ;;  %v7900_v30 = vsel %vm2045_vm10, %v7885_v27, %v7887_v5 }
 0x5b9   : > { %v7889_v42 = vpop.permute.xlu0 %7888 }
 0x5ba   : > { %v7901_v39 = vsel %vm2045_vm10, %v7887_v5, %v7889_v42 }
 0x5bb   : > { %8935 = vmatprep.subr.msk.mxu1 %vm468_vm5, %v7901_v39  ;;  %v7891_v25 = vpop.permute.xlu1 %7890 }
 0x5bc   : > { %8936 = vmatpush1.msk.msra.mxu1 %vm468_vm5, %v7900_v30  ;;  %v7902_v57 = vsel %vm2045_vm10, %v7889_v42, %v7891_v25 }
 0x5bd   : > { %8937 = vmatmul.mubr.msk.f32.vlgmr.msra.gmra.mrb[2].mxu1 %vm464_vm6, %v1925_v44 }
 0x5be   : > { %8131 = vmatprep.mubr.f32.mxu1 %v9474_v1 }
 0x5bf   : > { %v7893_v8 = vpop.permute.xlu0 %7892 }
 0x5c0   : > { %v7903_v2 = vsel %vm2045_vm10, %v7891_v25, %v7893_v8  ;;  %v8229_v49 = vpop.permute.xlu1 %8228 }
 0x5c1   : > { %8938 = vmatprep.subr.msk.mxu1 %vm468_vm5, %v7903_v2 }
 0x5c2   : > { %8939 = vmatpush1.msk.msra.mxu1 %vm468_vm5, %v7902_v57 }
 0x5c3   : > { %v7897_v6 = vpop.permute.xlu0 %7896  ;;  %8940 = vmatmul.mubr.msk.f32.vlgmr.msra.gmra.mrb[4].mxu1 %vm464_vm6, %v1925_v44 }
 0x5c4   : > { %v7895_v13 = vpop.permute.xlu1 %7894  ;;  %8202 = vmatprep.mubr.f32.mxu1 %v9474_v1 }
 0x5c5   : > { %v7904_v32 = vsel %vm2045_vm10, %v7893_v8, %v7895_v13  ;;  %v7905_v29 = vsel %vm2045_vm10, %v7895_v13, %v7897_v6 }
 0x5c6   : > { %8941 = vmatprep.subr.msk.mxu1 %vm468_vm5, %v7905_v29 }
 0x5c7   : > { %8942 = vmatpush1.msk.msra.mxu1 %vm468_vm5, %v7904_v32  ;;  %v8231_v63 = vpop.permute.xlu0 %8230 }
 0x5c8   : > { %v8245_v50 = vsel %vm2045_vm10, %v8229_v49, %v8231_v63  ;;  %8943 = vmatmul.mubr.msk.f32.vlgmr.msra.gmra.mrb[6].mxu1 %vm464_vm6, %v1925_v44  ;;  %v8227_v0 = vpop.permute.xlu1 %8226 }
 0x5c9   : > { %v8244_v38 = vsel %vm2045_vm10, %v8227_v0, %v8229_v49  ;;  %8944 = vmatprep.subr.msk.mxu1 %vm468_vm5, %v8245_v50  ;;  %8335 = vmatprep.mubr.f32.mxu1 %v9474_v1 }
 0x5ca   : > { %8945 = vmatpush1.msk.msra.mxu1 %vm468_vm5, %v8244_v38 }
 0x5cb   : > { %v8233_v60 = vpop.permute.xlu0 %8232 }
 0x5cc   : > { %v8246_v40 = vsel %vm2045_vm10, %v8231_v63, %v8233_v60  ;;  %8946 = vmatmul.mubr.msk.f32.vlgmr.msra.gmra.mrb[0].mxu1 %vm464_vm6, %v1934_v33  ;;  %v8235_v51 = vpop.permute.xlu1 %8234 }
 0x5cd   : > { %v8247_v31 = vsel %vm2045_vm10, %v8233_v60, %v8235_v51  ;;  %8406 = vmatprep.mubr.f32.mxu1 %v9474_v1 }
 0x5ce   : > { %8947 = vmatprep.subr.msk.mxu1 %vm468_vm5, %v8247_v31 }
 0x5cf   : > { %8948 = vmatpush1.msk.msra.mxu1 %vm468_vm5, %v8246_v40  ;;  %v8237_v47 = vpop.permute.xlu0 %8236 }
 0x5d0   : > { %v8248_v56 = vsel %vm2045_vm10, %v8235_v51, %v8237_v47  ;;  %8949 = vmatmul.mubr.msk.f32.vlgmr.msra.gmra.mrb[2].mxu1 %vm464_vm6, %v1934_v33  ;;  %v8239_v36 = vpop.permute.xlu1 %8238 }
 0x5d1   : > { %v8249_v52 = vsel %vm2045_vm10, %v8237_v47, %v8239_v36  ;;  %8477 = vmatprep.mubr.f32.mxu1 %v9474_v1 }
 0x5d2   : > { %8950 = vmatprep.subr.msk.mxu1 %vm468_vm5, %v8249_v52 }
 0x5d3   : > { %8951 = vmatpush1.msk.msra.mxu1 %vm468_vm5, %v8248_v56  ;;  %v8241_v18 = vpop.permute.xlu0 %8240 }
 0x5d4   : > { %v8250_v4 = vsel %vm2045_vm10, %v8239_v36, %v8241_v18  ;;  %8952 = vmatmul.mubr.msk.f32.vlgmr.msra.gmra.mrb[4].mxu1 %vm464_vm6, %v1934_v33  ;;  %v8243_v62 = vpop.permute.xlu1 %8242 }
 0x5d5   : > { %v8251_v16 = vsel %vm2045_vm10, %v8241_v18, %v8243_v62  ;;  %8548 = vmatprep.mubr.f32.mxu1 %v9474_v1 }
 0x5d6   : > { %8953 = vmatprep.subr.msk.mxu1 %vm468_vm5, %v8251_v16 }
 0x5d7   : > { %8954 = vmatpush1.msk.msra.mxu1 %vm468_vm5, %v8250_v4 }
 0x5d8   : > { %8955 = vmatmul.mubr.msk.f32.vlgmr.msra.gmra.mrb[6].mxu1 %vm464_vm6, %v1934_v33 }
 0x5e4   : > { %v8567_v48 = vpop.permute.xlu0 %8566 }
 0x69f   : > { %v8337_v58 = vpop.f32.mrb[0].mxu1 }
 0x6a0   : > { %v8569_v59 = vadd.f32 %v8567_v48, %v8337_v58  ;;  %v8339_v41 = vpop.f32.mrb[1].mxu1 }
 0x6a1   : > { %v8570_v61 = vadd.f32 %v8567_v48, %v8339_v41 }
 0x6a2   : > { %vm8577_vm2 = vcmp.gt.f32.partialorder %v8569_v59, 0.0  ;;  %v8585_v3 = vmul.f32 0.1, %v8569_v59 }
 0x6a3   : > { %vm8578_vm3 = vcmp.gt.f32.partialorder %v8570_v61, 0.0  ;;  %v8586_v55 = vmul.f32 0.1, %v8570_v61  ;;  %v8408_v35 = vpop.f32.mrb[2].mxu1 }
 0x6a4   : > { %v8593_v7 = vsel %vm8577_vm2, %v8569_v59, %v8585_v3  ;;  %v8571_v12 = vadd.f32 %v8567_v48, %v8408_v35  ;;  %v8410_v1 = vpop.f32.mrb[3].mxu1 }
 0x6a5   : > { %v8594_v26 = vsel %vm8578_vm3, %v8570_v61, %v8586_v55  ;;  %v8572_v15 = vadd.f32 %v8567_v48, %v8410_v1 }
 0x6a6   : > { %v8609_v19 = vcombine.low %v8593_v7, %v8594_v26  ;;  %vm8579_vm4 = vcmp.gt.f32.partialorder %v8571_v12, 0.0  ;;  %v8587_v21 = vmul.f32 0.1, %v8571_v12 }
 0x6a7   : > { %vm8580_vm5 = vcmp.gt.f32.partialorder %v8572_v15, 0.0  ;;  %v8588_v9 = vmul.f32 0.1, %v8572_v15  ;;  %v8479_v11 = vpop.f32.mrb[4].mxu1 }
 0x6a8   : > { %8617 = vst [vmem:[%s10887_s21] sm:$0xff] %v8609_v19  ;;  %v8595_v46 = vsel %vm8579_vm4, %v8571_v12, %v8587_v21  ;;  %v8573_v54 = vadd.f32 %v8567_v48, %v8479_v11  ;;  %v8481_v10 = vpop.f32.mrb[5].mxu1 }
 0x6a9   : > { %v8596_v53 = vsel %vm8580_vm5, %v8572_v15, %v8588_v9  ;;  %v8574_v14 = vadd.f32 %v8567_v48, %v8481_v10 }
 0x6aa   : > { %v8610_v37 = vcombine.low %v8595_v46, %v8596_v53  ;;  %vm8581_vm6 = vcmp.gt.f32.partialorder %v8573_v54, 0.0  ;;  %v8589_v17 = vmul.f32 0.1, %v8573_v54 }
 0x6ab   : > { %vm8582_vm7 = vcmp.gt.f32.partialorder %v8574_v14, 0.0  ;;  %v8590_v20 = vmul.f32 0.1, %v8574_v14  ;;  %v8550_v22 = vpop.f32.mrb[6].mxu1 }
 0x6ac   : > { %8618 = vst [vmem:[%s10887_s21 + $0x8] sm:$0xff] %v8610_v37  ;;  %v8597_v24 = vsel %vm8581_vm6, %v8573_v54, %v8589_v17  ;;  %v8575_v43 = vadd.f32 %v8567_v48, %v8550_v22  ;;  %v8552_v23 = vpop.f32.mrb[7].mxu1 }
 0x6ad   : > { %v8598_v28 = vsel %vm8582_vm7, %v8574_v14, %v8590_v20  ;;  %v8576_v27 = vadd.f32 %v8567_v48, %v8552_v23 }
 0x6ae   : > { %v8611_v45 = vcombine.low %v8597_v24, %v8598_v28  ;;  %vm8583_vm8 = vcmp.gt.f32.partialorder %v8575_v43, 0.0  ;;  %v8591_v44 = vmul.f32 0.1, %v8575_v43 }
 0x6af   : > { %vm8584_vm9 = vcmp.gt.f32.partialorder %v8576_v27, 0.0  ;;  %v8592_v34 = vmul.f32 0.1, %v8576_v27 }
 0x6b0   : > { %8619 = vst [vmem:[%s10887_s21 + $0x10] sm:$0xff] %v8611_v45  ;;  %v8599_v5 = vsel %vm8583_vm8, %v8575_v43, %v8591_v44 }
 0x6b1   : > { %v8600_v42 = vsel %vm8584_vm9, %v8576_v27, %v8592_v34 }
 0x6b2   : > { %v8612_v39 = vcombine.low %v8599_v5, %v8600_v42 }
 0x6b4   : > { %8620 = vst [vmem:[%s10887_s21 + $0x18] sm:$0xff] %v8612_v39 }
 0x6b5 PF: > { %s21_s13 = sadd.s32 1, %s9469_s13  }
 0x6b6   : > { %p18_p3 = scmp.ge.s32.totalorder %s21_s13, 4  }
 0x6b8   :  { %20 = sbr.rel (!%p18_p3) target bundleno = 1 (0x1), region = 98 }
 0x6bf   :  { %8642 = vsyncpa [#allocation6], 1 }
 0x6c0   :  { %8644 = vsyncpa [#allocation6 + $0x1], 1 }

</bundles_post_ra>
